<compile_context>
chip_gen: v6e
topology: v6e:2x2x1
jax: 0.10.0
libtpu: 0.0.40
codegen_flags: <defaults>
</compile_context>

<pallas_src>
import functools

import jax
import jax.numpy as jnp
from jax import lax
from jax.experimental import pallas as pl
from jax.experimental.pallas import tpu as pltpu

EPS = 1e-5


# ---------------------------------------------------------------------------
# In-kernel helpers
# ---------------------------------------------------------------------------
def _pad_hw(x):
    """(H, W, C) -> (H+2, W+2, C) zero-padded halo, built with two concats
    (outer + sublane axis only; no lane-axis movement, no HBM round trip)."""
    H, W, C = x.shape
    zc = jnp.zeros((H, 1, C), x.dtype)
    x = jnp.concatenate([zc, x, zc], axis=1)          # pad W (sublane axis)
    zr = jnp.zeros((1, W + 2, C), x.dtype)
    return jnp.concatenate([zr, x, zr], axis=0)       # pad H (outer axis)


def _im2col_patches(xp, H, W, C, dtype):
    """xp: (H+2, W+2, C) padded tile -> (H*W, 9*C) patch matrix in `dtype`.

    Column order (kh, kw, cin) matches the (kh, kw, cin, cout) -> (9C, C)
    weight reshape in the wrapper.  Each tap is cast to the MXU dtype before
    the lane-axis concatenate so the patch build moves half the bytes when
    dtype is bf16.  One contraction-dense MXU matmul per tile.
    """
    taps = [xp[kh:kh + H, kw:kw + W, :].astype(dtype)
            for kh in range(3) for kw in range(3)]
    return jnp.concatenate(taps, axis=-1).reshape(H * W, 9 * C)


def _tile_stats(y, inv_hw):
    """Per-tile sum and *centered* sum of squares (Chan-merge friendly)."""
    s = jnp.sum(y, axis=0, keepdims=True)             # (1, C)
    mu = s * inv_hw
    d = y - mu
    m2 = jnp.sum(d * d, axis=0, keepdims=True)        # (1, C)
    return s, m2


# ---------------------------------------------------------------------------
# Kernels
# ---------------------------------------------------------------------------
def _conv1_stats_kernel(x_ref, w_ref, hp_ref, s_ref, m2_ref):
    """3x3 conv1 (single im2col matmul, bf16 operands, f32 acc) + BN1 stats.

    Output is written *pre-padded* (1, H+2, W+2, C) so pass 2 needs no
    wrapper-side jnp.pad.
    """
    _, H, W, C = x_ref.shape
    xp = _pad_hw(x_ref[0])                                        # (H+2,W+2,C) f32
    patches = _im2col_patches(xp, H, W, C, w_ref.dtype)           # (H*W, 9C)
    y = jnp.dot(patches, w_ref[...], preferred_element_type=jnp.float32)
    hp_ref[...] = _pad_hw(y.reshape(H, W, C))[None]               # zero halo
    s, m2 = _tile_stats(y, 1.0 / (H * W))
    s_ref[...] = s[None]
    m2_ref[...] = m2[None]


def _bn_relu_conv2_stats_kernel(hp_ref, sc_ref, sh_ref, w_ref,
                                h_ref, s_ref, m2_ref):
    """BN1 affine + ReLU + 3x3 conv2 (im2col matmul) + BN2 stats."""
    _, H, W, C = h_ref.shape
    hp = hp_ref[0]                                                # (H+2,W+2,C) f32
    a = jnp.maximum(hp * sc_ref[...] + sh_ref[...], 0.0)
    # conv2 zero-pads the *post* BN/ReLU activation; the halo ring of hp holds
    # zeros from pass 1, which BN1-affine + ReLU turn into relu(shift1) != 0,
    # so force the border back to exactly zero with a pointwise select.
    r = lax.broadcasted_iota(jnp.int32, (H + 2, W + 2, 1), 0)
    c = lax.broadcasted_iota(jnp.int32, (H + 2, W + 2, 1), 1)
    inside = (r >= 1) & (r <= H) & (c >= 1) & (c <= W)
    a = jnp.where(inside, a, 0.0)

    patches = _im2col_patches(a, H, W, C, w_ref.dtype)
    y = jnp.dot(patches, w_ref[...], preferred_element_type=jnp.float32)
    h_ref[...] = y.reshape(1, H, W, C)
    s, m2 = _tile_stats(y, 1.0 / (H * W))
    s_ref[...] = s[None]
    m2_ref[...] = m2[None]


def _bn_residual_kernel(x_ref, h_ref, sc_ref, sh_ref, o_ref):
    """y = x + BN2(h), pointwise on a lane-dense (1, H, W*C) view."""
    o_ref[...] = x_ref[...] + h_ref[...] * sc_ref[...] + sh_ref[...]


# ---------------------------------------------------------------------------
# Wrapper
# ---------------------------------------------------------------------------
def _vmem_limit_bytes():
    """Generation-aware scoped-VMEM budget (~75% of capacity, capped)."""
    try:
        cap = int(pltpu.get_tpu_info().vmem_capacity_bytes)
    except Exception:
        cap = 64 * 1024 * 1024   # conservative: v7x per-TC physical VMEM
    return max(32 * 1024 * 1024, min(int(0.75 * cap), 100 * 1024 * 1024))


def _bn_affine(sum_nc, m2_nc, gamma, beta, tile_count, total_count):
    """Merge per-tile (sum, centered-M2) partials -> BN scale/shift (1, C).

    Chan parallel-variance merge: total_M2 = sum(M2_t) + n_t * sum((mu_t-mu)^2)
    with equal per-tile counts.  All f32; numerically robust vs E[x^2]-mean^2.
    """
    s = jnp.sum(sum_nc, axis=(0, 1))                       # (C,)
    mean = s / total_count
    tile_mean = sum_nc / tile_count                        # (N, 1, C)
    m2 = (jnp.sum(m2_nc, axis=(0, 1))
          + tile_count * jnp.sum((tile_mean - mean) ** 2, axis=(0, 1)))
    var = jnp.maximum(m2 / total_count, 0.0)               # biased var
    scale = gamma.astype(jnp.float32) * lax.rsqrt(var + EPS)
    shift = beta.astype(jnp.float32) - mean * scale
    return scale[None, :], shift[None, :]                  # (1, C) each


def residual_block_pallas(x_nchw, params, *, mxu_dtype=jnp.bfloat16):
    """x_nchw: (N, C, H, W) float32 -> (N, C, H, W) float32."""
    w1, b1, g1, be1, w2, b2, g2, be2 = params
    # Conv biases added right before training-mode BN are cancelled exactly by
    # the mean subtraction -> drop them (one full-slab VPU add + DMA saved).
    del b1, b2
    N, C, H, W = x_nchw.shape
    f32 = jnp.float32

    # NCHW -> NHWC (channels on the 128-lane axis); module interface is NCHW.
    x = jnp.transpose(x_nchw, (0, 2, 3, 1)).astype(f32)

    def conv_w(w):   # torch (Cout, Cin, kh, kw) -> im2col (9*Cin, Cout)
        return jnp.transpose(w, (2, 3, 1, 0)).reshape(9 * C, C).astype(mxu_dtype)

    # Only the batch axis is tiled, so every block's trailing dims equal the
    # full array dims (no (8,128) divisibility issues at any shape).
    x_spec = pl.BlockSpec((1, H, W, C), lambda n: (n, 0, 0, 0))
    hp_spec = pl.BlockSpec((1, H + 2, W + 2, C), lambda n: (n, 0, 0, 0))
    act_spec = pl.BlockSpec((1, H, W, C), lambda n: (n, 0, 0, 0))
    stat_spec = pl.BlockSpec((1, 1, C), lambda n: (n, 0, 0))
    wmat_spec = pl.BlockSpec((9 * C, C), lambda n: (0, 0))
    vrow_spec = pl.BlockSpec((1, C), lambda n: (0, 0))

    cparams = pltpu.CompilerParams(
        dimension_semantics=("parallel",),          # megacore-sharded on v7x
        vmem_limit_bytes=_vmem_limit_bytes())

    tile_count = H * W
    total_count = N * H * W

    # ---- pass 1: conv1 + per-tile BN1 statistics (output pre-padded) ----
    h1p, s1, m2_1 = pl.pallas_call(
        _conv1_stats_kernel,
        out_shape=(jax.ShapeDtypeStruct((N, H + 2, W + 2, C), f32),
                   jax.ShapeDtypeStruct((N, 1, C), f32),
                   jax.ShapeDtypeStruct((N, 1, C), f32)),
        grid=(N,),
        in_specs=[x_spec, wmat_spec],
        out_specs=(hp_spec, stat_spec, stat_spec),
        compiler_params=cparams,
    )(x, conv_w(w1))
    scale1, shift1 = _bn_affine(s1, m2_1, g1, be1, tile_count, total_count)

    # ---- pass 2: BN1 affine + ReLU + conv2 + per-tile BN2 statistics ----
    h2, s2, m2_2 = pl.pallas_call(
        _bn_relu_conv2_stats_kernel,
        out_shape=(jax.ShapeDtypeStruct((N, H, W, C), f32),
                   jax.ShapeDtypeStruct((N, 1, C), f32),
                   jax.ShapeDtypeStruct((N, 1, C), f32)),
        grid=(N,),
        in_specs=[hp_spec, vrow_spec, vrow_spec, wmat_spec],
        out_specs=(act_spec, stat_spec, stat_spec),
        compiler_params=cparams,
    )(h1p, scale1, shift1, conv_w(w2))
    scale2, shift2 = _bn_affine(s2, m2_2, g2, be2, tile_count, total_count)

    # ---- pass 3: BN2 affine + residual add, lane-dense (W*C) last dim ----
    WC = W * C
    flat_spec = pl.BlockSpec((1, H, WC), lambda n: (n, 0, 0))
    row_wc_spec = pl.BlockSpec((1, WC), lambda n: (0, 0))
    y = pl.pallas_call(
        _bn_residual_kernel,
        out_shape=jax.ShapeDtypeStruct((N, H, WC), f32),
        grid=(N,),
        in_specs=[flat_spec, flat_spec, row_wc_spec, row_wc_spec],
        out_specs=flat_spec,
        compiler_params=cparams,
    )(x.reshape(N, H, WC), h2.reshape(N, H, WC),
      jnp.tile(scale2, (1, W)), jnp.tile(shift2, (1, W)))

    return jnp.transpose(y.reshape(N, H, W, C), (0, 3, 1, 2))   # back to NCHW


# ---------------------------------------------------------------------------
# Pure-JAX reference (mirrors the PyTorch training-mode forward, with biases)
# ---------------------------------------------------------------------------
def residual_block_ref(x_nchw, params):
    w1, b1, g1, be1, w2, b2, g2, be2 = params

    def conv(x, w, b):
        y = lax.conv_general_dilated(
            x, w, window_strides=(1, 1), padding=((1, 1), (1, 1)),
            dimension_numbers=("NCHW", "OIHW", "NCHW"))
        return y + b.reshape(1, -1, 1, 1)

    def bn(h, gamma, beta):
        mean = jnp.mean(h, axis=(0, 2, 3), keepdims=True)
        var = jnp.mean((h - mean) ** 2, axis=(0, 2, 3), keepdims=True)
        return ((h - mean) * lax.rsqrt(var + EPS)
                * gamma.reshape(1, -1, 1, 1) + beta.reshape(1, -1, 1, 1))

    h = jnp.maximum(bn(conv(x_nchw, w1, b1), g1, be1), 0.0)
    h = bn(conv(h, w2, b2), g2, be2)
    return x_nchw + h


def init_params(key, in_features):
    c = in_features
    fan_in = c * 3 * 3
    bound = 1.0 / jnp.sqrt(fan_in)
    k1, k2, k3, k4 = jax.random.split(key, 4)
    w1 = jax.random.uniform(k1, (c, c, 3, 3), jnp.float32, -bound, bound)
    b1 = jax.random.uniform(k2, (c,), jnp.float32, -bound, bound)
    w2 = jax.random.uniform(k3, (c, c, 3, 3), jnp.float32, -bound, bound)
    b2 = jax.random.uniform(k4, (c,), jnp.float32, -bound, bound)
    g1 = jnp.ones((c,), jnp.float32)    # nn.BatchNorm2d default weight
    be1 = jnp.zeros((c,), jnp.float32)  # nn.BatchNorm2d default bias
    g2 = jnp.ones((c,), jnp.float32)
    be2 = jnp.zeros((c,), jnp.float32)
    return (w1, b1, g1, be1, w2, b2, g2, be2)


if __name__ == "__main__":
    key = jax.random.PRNGKey(0)
    kx, kp = jax.random.split(key)

    N, C, H, W = 2, 4, 16, 16
    x = jax.random.normal(kx, (N, C, H, W), jnp.float32)
    params = init_params(kp, C)

    y_ref = residual_block_ref(x, params)

    # Structural exactness check: f32 MXU operands must match the f32
    # reference tightly.
    fwd32 = jax.jit(functools.partial(residual_block_pallas,
                                      mxu_dtype=jnp.float32))
    y32 = jax.block_until_ready(fwd32(x, params))
    assert y32.shape == (N, C, H, W)
    assert jnp.allclose(y32, y_ref, atol=1e-4, rtol=1e-4), (
        float(jnp.max(jnp.abs(y32 - y_ref))))

    # Default fast path: bf16 MXU operands with f32 accumulation (looser
    # tolerance vs the pure-f32 reference, per the perf review).
    fwd = jax.jit(residual_block_pallas)
    y = jax.block_until_ready(fwd(x, params))
    assert y.shape == (N, C, H, W)
    assert jnp.allclose(y, y_ref, atol=1e-1, rtol=5e-2), (
        float(jnp.max(jnp.abs(y - y_ref))))

    print("KERNEL_OK")
</pallas_src>

<mosaic_0001>
module attributes {stable_mosaic.version = 11 : i64} {
  func.func @_conv1_stats_kernel(%arg0: i32, %arg1: memref<1x16x16x4xf32, #tpu.memory_space<vmem>>, %arg2: memref<36x4xf32, #tpu.memory_space<vmem>>, %arg3: memref<1x18x18x4xf32, #tpu.memory_space<vmem>>, %arg4: memref<1x1x4xf32, #tpu.memory_space<vmem>>, %arg5: memref<1x1x4xf32, #tpu.memory_space<vmem>>) attributes {dimension_semantics = [#tpu.dimension_semantics<parallel>], iteration_bounds = array<i64: 2>, scalar_prefetch = 0 : i64, scratch_operands = 0 : i64, tpu.core_type = #tpu.core_type<tc>, window_params = [{transform_indices = @transform_0, window_bounds = array<i64: 1, 16, 16, 4>}, {pipeline_mode = #tpu.pipeline_mode<synchronous>, transform_indices = @transform_1, window_bounds = array<i64: 36, 4>}, {transform_indices = @transform_2, window_bounds = array<i64: 1, 18, 18, 4>}, {transform_indices = @transform_3, window_bounds = array<i64: 1, 1, 4>}, {transform_indices = @transform_4, window_bounds = array<i64: 1, 1, 4>}]} {
    %c0 = arith.constant 0 : index
    %c0_0 = arith.constant 0 : index
    %c0_1 = arith.constant 0 : index
    %c0_2 = arith.constant 0 : index
    %0 = vector.load %arg1[%c0, %c0_0, %c0_1, %c0_2] : memref<1x16x16x4xf32, #tpu.memory_space<vmem>>, vector<1x16x16x4xf32>
    %1 = vector.shape_cast %0 : vector<1x16x16x4xf32> to vector<16x16x4xf32>
    %cst = arith.constant 0.000000e+00 : f32
    %2 = vector.broadcast %cst : f32 to vector<16x1x4xf32>
    %3 = tpu.concatenate %2, %1, %2 in 1 : vector<16x1x4xf32>, vector<16x16x4xf32>, vector<16x1x4xf32> -> vector<16x18x4xf32>
    %cst_3 = arith.constant 0.000000e+00 : f32
    %4 = vector.broadcast %cst_3 : f32 to vector<1x18x4xf32>
    %5 = tpu.concatenate %4, %3, %4 in 0 : vector<1x18x4xf32>, vector<16x18x4xf32>, vector<1x18x4xf32> -> vector<18x18x4xf32>
    %6 = vector.extract_strided_slice %5 {offsets = [0, 0, 0], sizes = [16, 16, 4], strides = [1, 1, 1]} : vector<18x18x4xf32> to vector<16x16x4xf32>
    %7 = vector.extract_strided_slice %5 {offsets = [0, 1, 0], sizes = [16, 16, 4], strides = [1, 1, 1]} : vector<18x18x4xf32> to vector<16x16x4xf32>
    %8 = vector.extract_strided_slice %5 {offsets = [0, 2, 0], sizes = [16, 16, 4], strides = [1, 1, 1]} : vector<18x18x4xf32> to vector<16x16x4xf32>
    %9 = vector.extract_strided_slice %5 {offsets = [1, 0, 0], sizes = [16, 16, 4], strides = [1, 1, 1]} : vector<18x18x4xf32> to vector<16x16x4xf32>
    %10 = vector.extract_strided_slice %5 {offsets = [1, 1, 0], sizes = [16, 16, 4], strides = [1, 1, 1]} : vector<18x18x4xf32> to vector<16x16x4xf32>
    %11 = vector.extract_strided_slice %5 {offsets = [1, 2, 0], sizes = [16, 16, 4], strides = [1, 1, 1]} : vector<18x18x4xf32> to vector<16x16x4xf32>
    %12 = vector.extract_strided_slice %5 {offsets = [2, 0, 0], sizes = [16, 16, 4], strides = [1, 1, 1]} : vector<18x18x4xf32> to vector<16x16x4xf32>
    %13 = vector.extract_strided_slice %5 {offsets = [2, 1, 0], sizes = [16, 16, 4], strides = [1, 1, 1]} : vector<18x18x4xf32> to vector<16x16x4xf32>
    %14 = vector.extract_strided_slice %5 {offsets = [2, 2, 0], sizes = [16, 16, 4], strides = [1, 1, 1]} : vector<18x18x4xf32> to vector<16x16x4xf32>
    %15 = tpu.concatenate %6, %7, %8, %9, %10, %11, %12, %13, %14 in 2 : vector<16x16x4xf32>, vector<16x16x4xf32>, vector<16x16x4xf32>, vector<16x16x4xf32>, vector<16x16x4xf32>, vector<16x16x4xf32>, vector<16x16x4xf32>, vector<16x16x4xf32>, vector<16x16x4xf32> -> vector<16x16x36xf32>
    %16 = vector.shape_cast %15 : vector<16x16x36xf32> to vector<256x36xf32>
    %c0_4 = arith.constant 0 : index
    %c0_5 = arith.constant 0 : index
    %17 = vector.load %arg2[%c0_4, %c0_5] : memref<36x4xf32, #tpu.memory_space<vmem>>, vector<36x4xf32>
    %cst_6 = arith.constant dense<0.000000e+00> : vector<256x4xf32>
    %18 = tpu.matmul %16, %17, %cst_6 {dimension_numbers = #tpu.dot_dimension_numbers<[1], [0], [0], [1], [0, 0, 1, 1], [], []>} : vector<256x36xf32>, vector<36x4xf32>, vector<256x4xf32> -> vector<256x4xf32>
    %19 = vector.shape_cast %18 : vector<256x4xf32> to vector<16x16x4xf32>
    %cst_7 = arith.constant 0.000000e+00 : f32
    %20 = vector.broadcast %cst_7 : f32 to vector<16x1x4xf32>
    %21 = tpu.concatenate %20, %19, %20 in 1 : vector<16x1x4xf32>, vector<16x16x4xf32>, vector<16x1x4xf32> -> vector<16x18x4xf32>
    %cst_8 = arith.constant 0.000000e+00 : f32
    %22 = vector.broadcast %cst_8 : f32 to vector<1x18x4xf32>
    %23 = tpu.concatenate %22, %21, %22 in 0 : vector<1x18x4xf32>, vector<16x18x4xf32>, vector<1x18x4xf32> -> vector<18x18x4xf32>
    %24 = vector.shape_cast %23 : vector<18x18x4xf32> to vector<1x18x18x4xf32>
    %c0_9 = arith.constant 0 : index
    %c0_10 = arith.constant 0 : index
    %c0_11 = arith.constant 0 : index
    %c0_12 = arith.constant 0 : index
    %25 = vector.load %arg3[%c0_9, %c0_10, %c0_11, %c0_12] : memref<1x18x18x4xf32, #tpu.memory_space<vmem>>, vector<1x18x18x4xf32>
    tpu.vector_store %arg3[%c0_9, %c0_10, %c0_11, %c0_12], %24 {strides = array<i32>} : memref<1x18x18x4xf32, #tpu.memory_space<vmem>>, vector<1x18x18x4xf32>,
    %cst_13 = arith.constant dense<0.000000e+00> : vector<4xf32>
    %26 = vector.multi_reduction <add>, %18, %cst_13 [0] : vector<256x4xf32> to vector<4xf32>
    %27 = vector.shape_cast %26 : vector<4xf32> to vector<1x4xf32>
    %cst_14 = arith.constant 3.906250e-03 : f32
    %28 = vector.broadcast %cst_14 : f32 to vector<1x4xf32>
    %29 = arith.mulf %27, %28 : vector<1x4xf32>
    %30 = vector.broadcast %29 : vector<1x4xf32> to vector<256x4xf32>
    %31 = arith.subf %18, %30 : vector<256x4xf32>
    %32 = arith.mulf %31, %31 : vector<256x4xf32>
    %cst_15 = arith.constant dense<0.000000e+00> : vector<4xf32>
    %33 = vector.multi_reduction <add>, %32, %cst_15 [0] : vector<256x4xf32> to vector<4xf32>
    %34 = vector.shape_cast %33 : vector<4xf32> to vector<1x4xf32>
    %35 = vector.shape_cast %27 : vector<1x4xf32> to vector<1x1x4xf32>
    %c0_16 = arith.constant 0 : index
    %c0_17 = arith.constant 0 : index
    %c0_18 = arith.constant 0 : index
    %36 = vector.load %arg4[%c0_16, %c0_17, %c0_18] : memref<1x1x4xf32, #tpu.memory_space<vmem>>, vector<1x1x4xf32>
    tpu.vector_store %arg4[%c0_16, %c0_17, %c0_18], %35 {strides = array<i32>} : memref<1x1x4xf32, #tpu.memory_space<vmem>>, vector<1x1x4xf32>,
    %37 = vector.shape_cast %34 : vector<1x4xf32> to vector<1x1x4xf32>
    %c0_19 = arith.constant 0 : index
    %c0_20 = arith.constant 0 : index
    %c0_21 = arith.constant 0 : index
    %38 = vector.load %arg5[%c0_19, %c0_20, %c0_21] : memref<1x1x4xf32, #tpu.memory_space<vmem>>, vector<1x1x4xf32>
    tpu.vector_store %arg5[%c0_19, %c0_20, %c0_21], %37 {strides = array<i32>} : memref<1x1x4xf32, #tpu.memory_space<vmem>>, vector<1x1x4xf32>,
    return
  }
  func.func @transform_0(%arg0: i32) -> (i32, i32, i32, i32) {
    %c0_i32 = arith.constant 0 : i32
    %c0_i32_0 = arith.constant 0 : i32
    %c0_i32_1 = arith.constant 0 : i32
    %c0_i32_2 = arith.constant 0 : i32
    return %arg0, %c0_i32, %c0_i32_0, %c0_i32_1 : i32, i32, i32, i32
  }
  func.func @transform_1(%arg0: i32) -> (i32, i32) {
    %c0_i32 = arith.constant 0 : i32
    %c0_i32_0 = arith.constant 0 : i32
    %c0_i32_1 = arith.constant 0 : i32
    return %c0_i32, %c0_i32_0 : i32, i32
  }
  func.func @transform_2(%arg0: i32) -> (i32, i32, i32, i32) {
    %c0_i32 = arith.constant 0 : i32
    %c0_i32_0 = arith.constant 0 : i32
    %c0_i32_1 = arith.constant 0 : i32
    %c0_i32_2 = arith.constant 0 : i32
    return %arg0, %c0_i32, %c0_i32_0, %c0_i32_1 : i32, i32, i32, i32
  }
  func.func @transform_3(%arg0: i32) -> (i32, i32, i32) {
    %c0_i32 = arith.constant 0 : i32
    %c0_i32_0 = arith.constant 0 : i32
    %c0_i32_1 = arith.constant 0 : i32
    return %arg0, %c0_i32, %c0_i32_0 : i32, i32, i32
  }
  func.func @transform_4(%arg0: i32) -> (i32, i32, i32) {
    %c0_i32 = arith.constant 0 : i32
    %c0_i32_0 = arith.constant 0 : i32
    %c0_i32_1 = arith.constant 0 : i32
    return %arg0, %c0_i32, %c0_i32_0 : i32, i32, i32
  }
}

module attributes {stable_mosaic.version = 11 : i64} {
  func.func @_bn_relu_conv2_stats_kernel(%arg0: i32, %arg1: memref<1x18x18x4xf32, #tpu.memory_space<vmem>>, %arg2: memref<1x4xf32, #tpu.memory_space<vmem>>, %arg3: memref<1x4xf32, #tpu.memory_space<vmem>>, %arg4: memref<36x4xf32, #tpu.memory_space<vmem>>, %arg5: memref<1x16x16x4xf32, #tpu.memory_space<vmem>>, %arg6: memref<1x1x4xf32, #tpu.memory_space<vmem>>, %arg7: memref<1x1x4xf32, #tpu.memory_space<vmem>>) attributes {dimension_semantics = [#tpu.dimension_semantics<parallel>], iteration_bounds = array<i64: 2>, scalar_prefetch = 0 : i64, scratch_operands = 0 : i64, tpu.core_type = #tpu.core_type<tc>, window_params = [{transform_indices = @transform_0, window_bounds = array<i64: 1, 18, 18, 4>}, {pipeline_mode = #tpu.pipeline_mode<synchronous>, transform_indices = @transform_1, window_bounds = array<i64: 1, 4>}, {pipeline_mode = #tpu.pipeline_mode<synchronous>, transform_indices = @transform_2, window_bounds = array<i64: 1, 4>}, {pipeline_mode = #tpu.pipeline_mode<synchronous>, transform_indices = @transform_3, window_bounds = array<i64: 36, 4>}, {transform_indices = @transform_4, window_bounds = array<i64: 1, 16, 16, 4>}, {transform_indices = @transform_5, window_bounds = array<i64: 1, 1, 4>}, {transform_indices = @transform_6, window_bounds = array<i64: 1, 1, 4>}]} {
    %c0 = arith.constant 0 : index
    %c0_0 = arith.constant 0 : index
    %c0_1 = arith.constant 0 : index
    %c0_2 = arith.constant 0 : index
    %0 = vector.load %arg1[%c0, %c0_0, %c0_1, %c0_2] : memref<1x18x18x4xf32, #tpu.memory_space<vmem>>, vector<1x18x18x4xf32>
    %1 = vector.shape_cast %0 : vector<1x18x18x4xf32> to vector<18x18x4xf32>
    %c0_3 = arith.constant 0 : index
    %c0_4 = arith.constant 0 : index
    %2 = vector.load %arg2[%c0_3, %c0_4] : memref<1x4xf32, #tpu.memory_space<vmem>>, vector<1x4xf32>
    %3 = vector.shape_cast %2 : vector<1x4xf32> to vector<1x1x4xf32>
    %4 = vector.broadcast %3 : vector<1x1x4xf32> to vector<18x18x4xf32>
    %5 = arith.mulf %1, %4 : vector<18x18x4xf32>
    %c0_5 = arith.constant 0 : index
    %c0_6 = arith.constant 0 : index
    %6 = vector.load %arg3[%c0_5, %c0_6] : memref<1x4xf32, #tpu.memory_space<vmem>>, vector<1x4xf32>
    %7 = vector.shape_cast %6 : vector<1x4xf32> to vector<1x1x4xf32>
    %8 = vector.broadcast %7 : vector<1x1x4xf32> to vector<18x18x4xf32>
    %9 = arith.addf %5, %8 : vector<18x18x4xf32>
    %cst = arith.constant 0.000000e+00 : f32
    %10 = vector.broadcast %cst : f32 to vector<18x18x4xf32>
    %11 = arith.maximumf %9, %10 : vector<18x18x4xf32>
    %12 = tpu.iota {dimensions = array<i32: 0>} : vector<18x18x1xi32>
    %13 = tpu.iota {dimensions = array<i32: 1>} : vector<18x18x1xi32>
    %c1_i32 = arith.constant 1 : i32
    %14 = vector.broadcast %c1_i32 : i32 to vector<18x18x1xi32>
    %15 = arith.cmpi sge, %12, %14 : vector<18x18x1xi32>
    %c16_i32 = arith.constant 16 : i32
    %16 = vector.broadcast %c16_i32 : i32 to vector<18x18x1xi32>
    %17 = arith.cmpi sle, %12, %16 : vector<18x18x1xi32>
    %18 = arith.andi %15, %17 : vector<18x18x1xi1>
    %c1_i32_7 = arith.constant 1 : i32
    %19 = vector.broadcast %c1_i32_7 : i32 to vector<18x18x1xi32>
    %20 = arith.cmpi sge, %13, %19 : vector<18x18x1xi32>
    %21 = arith.andi %18, %20 : vector<18x18x1xi1>
    %c16_i32_8 = arith.constant 16 : i32
    %22 = vector.broadcast %c16_i32_8 : i32 to vector<18x18x1xi32>
    %23 = arith.cmpi sle, %13, %22 : vector<18x18x1xi32>
    %24 = arith.andi %21, %23 : vector<18x18x1xi1>
    %cst_9 = arith.constant 0.000000e+00 : f32
    %25 = vector.shape_cast %24 : vector<18x18x1xi1> to vector<18x18x1xi1>
    %26 = vector.broadcast %25 : vector<18x18x1xi1> to vector<18x18x4xi1>
    %27 = vector.broadcast %cst_9 : f32 to vector<18x18x4xf32>
    %28 = arith.select %26, %11, %27 : vector<18x18x4xi1>, vector<18x18x4xf32>
    %29 = vector.extract_strided_slice %28 {offsets = [0, 0, 0], sizes = [16, 16, 4], strides = [1, 1, 1]} : vector<18x18x4xf32> to vector<16x16x4xf32>
    %30 = vector.extract_strided_slice %28 {offsets = [0, 1, 0], sizes = [16, 16, 4], strides = [1, 1, 1]} : vector<18x18x4xf32> to vector<16x16x4xf32>
    %31 = vector.extract_strided_slice %28 {offsets = [0, 2, 0], sizes = [16, 16, 4], strides = [1, 1, 1]} : vector<18x18x4xf32> to vector<16x16x4xf32>
    %32 = vector.extract_strided_slice %28 {offsets = [1, 0, 0], sizes = [16, 16, 4], strides = [1, 1, 1]} : vector<18x18x4xf32> to vector<16x16x4xf32>
    %33 = vector.extract_strided_slice %28 {offsets = [1, 1, 0], sizes = [16, 16, 4], strides = [1, 1, 1]} : vector<18x18x4xf32> to vector<16x16x4xf32>
    %34 = vector.extract_strided_slice %28 {offsets = [1, 2, 0], sizes = [16, 16, 4], strides = [1, 1, 1]} : vector<18x18x4xf32> to vector<16x16x4xf32>
    %35 = vector.extract_strided_slice %28 {offsets = [2, 0, 0], sizes = [16, 16, 4], strides = [1, 1, 1]} : vector<18x18x4xf32> to vector<16x16x4xf32>
    %36 = vector.extract_strided_slice %28 {offsets = [2, 1, 0], sizes = [16, 16, 4], strides = [1, 1, 1]} : vector<18x18x4xf32> to vector<16x16x4xf32>
    %37 = vector.extract_strided_slice %28 {offsets = [2, 2, 0], sizes = [16, 16, 4], strides = [1, 1, 1]} : vector<18x18x4xf32> to vector<16x16x4xf32>
    %38 = tpu.concatenate %29, %30, %31, %32, %33, %34, %35, %36, %37 in 2 : vector<16x16x4xf32>, vector<16x16x4xf32>, vector<16x16x4xf32>, vector<16x16x4xf32>, vector<16x16x4xf32>, vector<16x16x4xf32>, vector<16x16x4xf32>, vector<16x16x4xf32>, vector<16x16x4xf32> -> vector<16x16x36xf32>
    %39 = vector.shape_cast %38 : vector<16x16x36xf32> to vector<256x36xf32>
    %c0_10 = arith.constant 0 : index
    %c0_11 = arith.constant 0 : index
    %40 = vector.load %arg4[%c0_10, %c0_11] : memref<36x4xf32, #tpu.memory_space<vmem>>, vector<36x4xf32>
    %cst_12 = arith.constant dense<0.000000e+00> : vector<256x4xf32>
    %41 = tpu.matmul %39, %40, %cst_12 {dimension_numbers = #tpu.dot_dimension_numbers<[1], [0], [0], [1], [0, 0, 1, 1], [], []>} : vector<256x36xf32>, vector<36x4xf32>, vector<256x4xf32> -> vector<256x4xf32>
    %42 = vector.shape_cast %41 : vector<256x4xf32> to vector<1x16x16x4xf32>
    %c0_13 = arith.constant 0 : index
    %c0_14 = arith.constant 0 : index
    %c0_15 = arith.constant 0 : index
    %c0_16 = arith.constant 0 : index
    %43 = vector.load %arg5[%c0_13, %c0_14, %c0_15, %c0_16] : memref<1x16x16x4xf32, #tpu.memory_space<vmem>>, vector<1x16x16x4xf32>
    tpu.vector_store %arg5[%c0_13, %c0_14, %c0_15, %c0_16], %42 {strides = array<i32>} : memref<1x16x16x4xf32, #tpu.memory_space<vmem>>, vector<1x16x16x4xf32>,
    %cst_17 = arith.constant dense<0.000000e+00> : vector<4xf32>
    %44 = vector.multi_reduction <add>, %41, %cst_17 [0] : vector<256x4xf32> to vector<4xf32>
    %45 = vector.shape_cast %44 : vector<4xf32> to vector<1x4xf32>
    %cst_18 = arith.constant 3.906250e-03 : f32
    %46 = vector.broadcast %cst_18 : f32 to vector<1x4xf32>
    %47 = arith.mulf %45, %46 : vector<1x4xf32>
    %48 = vector.broadcast %47 : vector<1x4xf32> to vector<256x4xf32>
    %49 = arith.subf %41, %48 : vector<256x4xf32>
    %50 = arith.mulf %49, %49 : vector<256x4xf32>
    %cst_19 = arith.constant dense<0.000000e+00> : vector<4xf32>
    %51 = vector.multi_reduction <add>, %50, %cst_19 [0] : vector<256x4xf32> to vector<4xf32>
    %52 = vector.shape_cast %51 : vector<4xf32> to vector<1x4xf32>
    %53 = vector.shape_cast %45 : vector<1x4xf32> to vector<1x1x4xf32>
    %c0_20 = arith.constant 0 : index
    %c0_21 = arith.constant 0 : index
    %c0_22 = arith.constant 0 : index
    %54 = vector.load %arg6[%c0_20, %c0_21, %c0_22] : memref<1x1x4xf32, #tpu.memory_space<vmem>>, vector<1x1x4xf32>
    tpu.vector_store %arg6[%c0_20, %c0_21, %c0_22], %53 {strides = array<i32>} : memref<1x1x4xf32, #tpu.memory_space<vmem>>, vector<1x1x4xf32>,
    %55 = vector.shape_cast %52 : vector<1x4xf32> to vector<1x1x4xf32>
    %c0_23 = arith.constant 0 : index
    %c0_24 = arith.constant 0 : index
    %c0_25 = arith.constant 0 : index
    %56 = vector.load %arg7[%c0_23, %c0_24, %c0_25] : memref<1x1x4xf32, #tpu.memory_space<vmem>>, vector<1x1x4xf32>
    tpu.vector_store %arg7[%c0_23, %c0_24, %c0_25], %55 {strides = array<i32>} : memref<1x1x4xf32, #tpu.memory_space<vmem>>, vector<1x1x4xf32>,
    return
  }
  func.func @transform_0(%arg0: i32) -> (i32, i32, i32, i32) {
    %c0_i32 = arith.constant 0 : i32
    %c0_i32_0 = arith.constant 0 : i32
    %c0_i32_1 = arith.constant 0 : i32
    %c0_i32_2 = arith.constant 0 : i32
    return %arg0, %c0_i32, %c0_i32_0, %c0_i32_1 : i32, i32, i32, i32
  }
  func.func @transform_1(%arg0: i32) -> (i32, i32) {
    %c0_i32 = arith.constant 0 : i32
    %c0_i32_0 = arith.constant 0 : i32
    %c0_i32_1 = arith.constant 0 : i32
    return %c0_i32, %c0_i32_0 : i32, i32
  }
  func.func @transform_2(%arg0: i32) -> (i32, i32) {
    %c0_i32 = arith.constant 0 : i32
    %c0_i32_0 = arith.constant 0 : i32
    %c0_i32_1 = arith.constant 0 : i32
    return %c0_i32, %c0_i32_0 : i32, i32
  }
  func.func @transform_3(%arg0: i32) -> (i32, i32) {
    %c0_i32 = arith.constant 0 : i32
    %c0_i32_0 = arith.constant 0 : i32
    %c0_i32_1 = arith.constant 0 : i32
    return %c0_i32, %c0_i32_0 : i32, i32
  }
  func.func @transform_4(%arg0: i32) -> (i32, i32, i32, i32) {
    %c0_i32 = arith.constant 0 : i32
    %c0_i32_0 = arith.constant 0 : i32
    %c0_i32_1 = arith.constant 0 : i32
    %c0_i32_2 = arith.constant 0 : i32
    return %arg0, %c0_i32, %c0_i32_0, %c0_i32_1 : i32, i32, i32, i32
  }
  func.func @transform_5(%arg0: i32) -> (i32, i32, i32) {
    %c0_i32 = arith.constant 0 : i32
    %c0_i32_0 = arith.constant 0 : i32
    %c0_i32_1 = arith.constant 0 : i32
    return %arg0, %c0_i32, %c0_i32_0 : i32, i32, i32
  }
  func.func @transform_6(%arg0: i32) -> (i32, i32, i32) {
    %c0_i32 = arith.constant 0 : i32
    %c0_i32_0 = arith.constant 0 : i32
    %c0_i32_1 = arith.constant 0 : i32
    return %arg0, %c0_i32, %c0_i32_0 : i32, i32, i32
  }
}

module attributes {stable_mosaic.version = 11 : i64} {
  func.func @_bn_residual_kernel(%arg0: i32, %arg1: memref<1x16x64xf32, #tpu.memory_space<vmem>>, %arg2: memref<1x16x64xf32, #tpu.memory_space<vmem>>, %arg3: memref<1x64xf32, #tpu.memory_space<vmem>>, %arg4: memref<1x64xf32, #tpu.memory_space<vmem>>, %arg5: memref<1x16x64xf32, #tpu.memory_space<vmem>>) attributes {dimension_semantics = [#tpu.dimension_semantics<parallel>], iteration_bounds = array<i64: 2>, scalar_prefetch = 0 : i64, scratch_operands = 0 : i64, tpu.core_type = #tpu.core_type<tc>, window_params = [{transform_indices = @transform_0, window_bounds = array<i64: 1, 16, 64>}, {transform_indices = @transform_1, window_bounds = array<i64: 1, 16, 64>}, {pipeline_mode = #tpu.pipeline_mode<synchronous>, transform_indices = @transform_2, window_bounds = array<i64: 1, 64>}, {pipeline_mode = #tpu.pipeline_mode<synchronous>, transform_indices = @transform_3, window_bounds = array<i64: 1, 64>}, {transform_indices = @transform_4, window_bounds = array<i64: 1, 16, 64>}]} {
    %c0 = arith.constant 0 : index
    %c0_0 = arith.constant 0 : index
    %c0_1 = arith.constant 0 : index
    %0 = vector.load %arg1[%c0, %c0_0, %c0_1] : memref<1x16x64xf32, #tpu.memory_space<vmem>>, vector<1x16x64xf32>
    %c0_2 = arith.constant 0 : index
    %c0_3 = arith.constant 0 : index
    %c0_4 = arith.constant 0 : index
    %1 = vector.load %arg2[%c0_2, %c0_3, %c0_4] : memref<1x16x64xf32, #tpu.memory_space<vmem>>, vector<1x16x64xf32>
    %c0_5 = arith.constant 0 : index
    %c0_6 = arith.constant 0 : index
    %2 = vector.load %arg3[%c0_5, %c0_6] : memref<1x64xf32, #tpu.memory_space<vmem>>, vector<1x64xf32>
    %3 = vector.shape_cast %2 : vector<1x64xf32> to vector<1x1x64xf32>
    %4 = vector.broadcast %3 : vector<1x1x64xf32> to vector<1x16x64xf32>
    %5 = arith.mulf %1, %4 : vector<1x16x64xf32>
    %6 = arith.addf %0, %5 : vector<1x16x64xf32>
    %c0_7 = arith.constant 0 : index
    %c0_8 = arith.constant 0 : index
    %7 = vector.load %arg4[%c0_7, %c0_8] : memref<1x64xf32, #tpu.memory_space<vmem>>, vector<1x64xf32>
    %8 = vector.shape_cast %7 : vector<1x64xf32> to vector<1x1x64xf32>
    %9 = vector.broadcast %8 : vector<1x1x64xf32> to vector<1x16x64xf32>
    %10 = arith.addf %6, %9 : vector<1x16x64xf32>
    %c0_9 = arith.constant 0 : index
    %c0_10 = arith.constant 0 : index
    %c0_11 = arith.constant 0 : index
    %11 = vector.load %arg5[%c0_9, %c0_10, %c0_11] : memref<1x16x64xf32, #tpu.memory_space<vmem>>, vector<1x16x64xf32>
    tpu.vector_store %arg5[%c0_9, %c0_10, %c0_11], %10 {strides = array<i32>} : memref<1x16x64xf32, #tpu.memory_space<vmem>>, vector<1x16x64xf32>,
    return
  }
  func.func @transform_0(%arg0: i32) -> (i32, i32, i32) {
    %c0_i32 = arith.constant 0 : i32
    %c0_i32_0 = arith.constant 0 : i32
    %c0_i32_1 = arith.constant 0 : i32
    return %arg0, %c0_i32, %c0_i32_0 : i32, i32, i32
  }
  func.func @transform_1(%arg0: i32) -> (i32, i32, i32) {
    %c0_i32 = arith.constant 0 : i32
    %c0_i32_0 = arith.constant 0 : i32
    %c0_i32_1 = arith.constant 0 : i32
    return %arg0, %c0_i32, %c0_i32_0 : i32, i32, i32
  }
  func.func @transform_2(%arg0: i32) -> (i32, i32) {
    %c0_i32 = arith.constant 0 : i32
    %c0_i32_0 = arith.constant 0 : i32
    %c0_i32_1 = arith.constant 0 : i32
    return %c0_i32, %c0_i32_0 : i32, i32
  }
  func.func @transform_3(%arg0: i32) -> (i32, i32) {
    %c0_i32 = arith.constant 0 : i32
    %c0_i32_0 = arith.constant 0 : i32
    %c0_i32_1 = arith.constant 0 : i32
    return %c0_i32, %c0_i32_0 : i32, i32
  }
  func.func @transform_4(%arg0: i32) -> (i32, i32, i32) {
    %c0_i32 = arith.constant 0 : i32
    %c0_i32_0 = arith.constant 0 : i32
    %c0_i32_1 = arith.constant 0 : i32
    return %arg0, %c0_i32, %c0_i32_0 : i32, i32, i32
  }
}

</mosaic_0001>

<bundles_post_ra>
// kernel: residual_block_pallas.5
= control target key start
LH: loop header
LB: loop body
LE: loop exit
PB: predicated region body
PF: predicated region fallthrough
CT: control target
= control target key end

     0   :  { %s371_s15 = smov 0   ;;  %s397_s0 = inlined_call_operand.vmem [shape: f32[2,16,64], index: 0, kind: input, shape index: {}]   ;;  %s398_s1 = inlined_call_operand.vmem [shape: f32[2,16,64], index: 1, kind: input, shape index: {}]   ;;  %s399_s2 = inlined_call_operand.vmem [shape: f32[1,64], index: 2, kind: input, shape index: {}]   ;;  %s400_s3 = inlined_call_operand.vmem [shape: f32[1,64], index: 3, kind: input, shape index: {}]   ;;  %s401_s4 = inlined_call_operand.vmem [shape: f32[2,16,64], index: 4, kind: output, shape index: {}]  }
   0x1 LB: > { %s312_s16 = sadd.s32 4294967295, %s344_s15   ;;  %p316_p0 = scmp.ge.s32.totalorder %s344_s15, 1  ;;  %s344_s15 = sphi %s371_s15, %s14_s15  }
   0x2   : > { %p172_p1 = scmp.lt.s32.totalorder %s344_s15, 3 }
   0x4   : > { %p173_p2 = pnand %p316_p0, %p172_p1 }
   0x5   : > { %p203_p3 = scmp.lt.s32.totalorder (!%p173_p2), %s312_s16, 1 }
   0x6   : > { %176 = sbr.rel (%p173_p2) target bundleno = 23 (0x17), region = 36 }
   0xb   : > { %s403_s16 = smov (!%p203_p3, %s312_s16), 1  ;;  %v323_v0 = vld [vmem:[%s399_s2] ss:$0 sm:$0xff]  ;;  %vm242_vm0 = vcmask 523264  }
   0xc   : > { %s327_s17 = sshll.u32 %s403_s16, 4  ;;  %v324_v7 = vld [vmem:[%s400_s3] ss:$0 sm:$0xff] }
   0xd   : > { %s207_s22 = scalar_lea.vmem %s397_s0, %s327_s17  ;;  %s212_s25 = scalar_lea.vmem %s398_s1, %s327_s17 }
   0xe   : > { %v218_v1 = vld [vmem:[%s207_s22] sm:$0xff]  ;;  %v221_v3 = vld [vmem:[%s212_s25 + $0x8] sm:$0xff]  ;;  %s217_s30 = scalar_lea.vmem %s401_s4, %s327_s17 }
   0xf   : > { %v220_v2 = vld [vmem:[%s212_s25] sm:$0xff]  ;;  %v219_v5 = vld [vmem:[%s207_s22 + $0x8] sm:$0xff]  ;;  %v230_v6 = vmul.f32 %v323_v0, %v221_v3 }
  0x10   : > { %v229_v4 = vmul.f32 %v323_v0, %v220_v2 }
  0x11   : > { %v232_v9 = vadd.f32 %v230_v6, %v219_v5 }
  0x12   : > { %v231_v8 = vadd.f32 %v229_v4, %v218_v1 }
  0x13   : > { %v241_v11 = vadd.f32 %v324_v7, %v232_v9 }
  0x14   : > { %v240_v10 = vadd.f32 %v324_v7, %v231_v8 }
  0x15   : > { %244 = vst.msk [vmem:[%s217_s30 + $0x8] sm:$0xff] %vm242_vm0, %v241_v11 }
  0x16   : > { %243 = vst.msk [vmem:[%s217_s30] sm:$0xff] %vm242_vm0, %v240_v10 }
  0x17 PF: > { %s14_s15 = sadd.s32 1, %s344_s15  }
  0x18   : > { %p11_p4 = scmp.ge.s32.totalorder %s14_s15, 4  }
  0x1a   :  { %13 = sbr.rel (!%p11_p4) target bundleno = 1 (0x1), region = 69 }

// kernel: residual_block_pallas.3
= control target key start
LH: loop header
LB: loop body
LE: loop exit
PB: predicated region body
PF: predicated region fallthrough
CT: control target
= control target key end

     0   :  { %s2687_s15 = smov 0   ;;  %s4536_s0 = inlined_call_operand.vmem [shape: f32[2,16,16,4], index: 0, kind: input, shape index: {}]   ;;  %s4537_s1 = inlined_call_operand.vmem [shape: f32[36,4], index: 1, kind: input, shape index: {}]   ;;  %s4538_s2 = inlined_call_operand.vmem [shape: f32[2,18,18,4], index: 2, kind: output, shape index: {0}]   ;;  %s4539_s3 = inlined_call_operand.vmem [shape: f32[2,1,4], index: 3, kind: output, shape index: {1}]   ;;  %s4540_s4 = inlined_call_operand.vmem [shape: f32[2,1,4], index: 4, kind: output, shape index: {2}]  }
   0x1 LB: > { %s2478_s16 = sadd.s32 4294967295, %s2651_s15   ;;  %p2482_p0 = scmp.ge.s32.totalorder %s2651_s15, 1  ;;  %s2651_s15 = sphi %s2687_s15, %s15_s15  }
   0x2   : > { %p167_p1 = scmp.lt.s32.totalorder %s2651_s15, 3 }
   0x4   : > { %p168_p2 = pnand %p2482_p0, %p167_p1 }
   0x6   : > { %171 = sbr.rel (%p168_p2) target bundleno = 932 (0x3a4), region = 28 }
   0xb   : > { %p199_p3 = scmp.lt.s32.totalorder %s2478_s16, 1  ;;  %v4541_v0 = vmov 0.0   ;;  %s2654_s17 = smov 4   ;;  %vm1359_vm0 = vcmask 31744   ;;  %vm2114_vm1 = vcmask 25600   ;;  %vm279_vm2 = vcmask 1040384  }
   0xc   : > { %v2696_v1 = vrot.slane %v4541_v0, 1  ;;  %vm438_vm3 = vcmask 1046528   ;;  %vm609_vm4 = vcmask 1045504   ;;  %s2655_s26 = smov 8   ;;  %s2656_s27 = smov 12   ;;  %vm1723_vm5 = vcmask 1043456  }
   0xd   : > { %s4716_s16 = smov (!%p199_p3, %s2478_s16), 1  ;;  %s2657_s28 = smov 16   ;;  %vm1391_vm6 = vcmask 64512   ;;  %vm1423_vm7 = vcmask 97280   ;;  %vm1456_vm8 = vcmask 130048   ;;  %vm1489_vm9 = vcmask 162816  }
   0xe   : > { %4601 = vst [vmem:[#allocation2_spill] sm:$0xff] %v2696_v1  ;;  %516 = vrot.lane.b32.xlu0 %v2696_v1, %s2654_s17  ;;  %s2627_s18 = smul.u32 432, %s4716_s16  ;;  %s2521_s19 = sshll.u32 %s4716_s16, 8  ;;  %vm1522_vm10 = vcmask 195584   ;;  %vm1555_vm11 = vcmask 228352   ;;  %vm1588_vm12 = vcmask 261120  }
   0xf   : > { %s2707_s22 = scalar_lea.vmem %s4536_s0, %s2521_s19  ;;  %s2658_s29 = smov 20   ;;  %vm1626_vm13 = vcmask 293888   ;;  %vm2370_vm14 = vcmask 24576  }
  0x10   : > { %s2712_s25 = scalar_lea.vmem %s4538_s2, %s2627_s18  ;;  %v215_v2 = vld [vmem:[%s2707_s22] sm:$0xff]  ;;  %v216_v3 = vld [vmem:[%s2707_s22 + $0x8] sm:$0xff]  ;;  %v217_v4 = vld [vmem:[%s2707_s22 + $0x10] sm:$0xff]  ;;  %s2659_s8 = smov 24  }
  0x11   : > { %2112 = vst.msk [vmem:[%s2712_s25] sm:$0xff] %vm1359_vm0, %v4541_v0  ;;  %2113 = vst.msk [vmem:[%s2712_s25 + $0x8] sm:$0xff] %vm1359_vm0, %v4541_v0  ;;  %v280_v5 = vrot.slane %v215_v2, 7  ;;  %v281_v6 = vrot.slane %v216_v3, 7  ;;  %v218_v7 = vld [vmem:[%s2707_s22 + $0x18] sm:$0xff]  ;;  %v283_v8 = vrot.slane %v217_v4, 7  ;;  %s211_s21 = scalar_lea.vmem %s4539_s3, %s4716_s16  ;;  %s214_s24 = scalar_lea.vmem %s4540_s4, %s4716_s16 }
  0x12   : > { %2115 = vst.msk [vmem:[%s2712_s25 + $0x10] sm:$0x3] %vm2114_vm1, %v4541_v0  ;;  %2166 = vst.msk [vmem:[%s2712_s25 + $0x1a8] sm:$0x3] %vm2114_vm1, %v4541_v0  ;;  %v219_v9 = vld [vmem:[%s2707_s22 + $0x20] sm:$0xff]  ;;  %v220_v10 = vld [vmem:[%s2707_s22 + $0x28] sm:$0xff] }
  0x13   : > { %2164 = vst.msk [vmem:[%s2712_s25 + $0x198] sm:$0xff] %vm1359_vm0, %v4541_v0  ;;  %2165 = vst.msk [vmem:[%s2712_s25 + $0x1a0] sm:$0xff] %vm1359_vm0, %v4541_v0  ;;  %v284_v11 = vrot.slane %v218_v7, 7  ;;  %v286_v12 = vrot.slane %v219_v9, 7  ;;  %v287_v13 = vrot.slane %v220_v10, 7  ;;  %v2739_v14 = vsel %vm279_vm2, %v280_v5, %v281_v6  ;;  %v221_v26 = vld [vmem:[%s2707_s22 + $0x30] sm:$0xff] }
  0x14   : > { %v2742_v15 = vsel %vm279_vm2, %v281_v6, 0.0  ;;  %v2745_v16 = vsel %vm279_vm2, 0.0, %v280_v5  ;;  %v2748_v17 = vsel %vm279_vm2, 0.0, %v283_v8  ;;  %v442_v18 = vrot.slane %v2739_v14, 1  ;;  %v222_v27 = vld [vmem:[%s2707_s22 + $0x38] sm:$0xff]  ;;  %v223_v32 = vld [vmem:[%s2707_s22 + $0x40] sm:$0xff] }
  0x15   : > { %v444_v19 = vrot.slane %v2742_v15, 1  ;;  %v441_v20 = vrot.slane %v2745_v16, 1  ;;  %v2754_v21 = vsel %vm279_vm2, %v283_v8, %v284_v11  ;;  %v446_v22 = vrot.slane %v2748_v17, 1  ;;  %v224_v33 = vld [vmem:[%s2707_s22 + $0x48] sm:$0xff]  ;;  %v225_v42 = vld [vmem:[%s2707_s22 + $0x50] sm:$0xff]  ;;  %v226_v49 = vld [vmem:[%s2707_s22 + $0x58] sm:$0xff] }
  0x16   : > { %v447_v23 = vrot.slane %v2754_v21, 1  ;;  %v2759_v24 = vsel %vm279_vm2, %v284_v11, 0.0  ;;  %v2762_v25 = vsel %vm279_vm2, %v286_v12, %v287_v13  ;;  %v2774_v31 = vsel %vm279_vm2, 0.0, %v286_v12  ;;  %v227_v58 = vld [vmem:[%s2707_s22 + $0x60] sm:$0xff]  ;;  %v228_v60 = vld [vmem:[%s2707_s22 + $0x68] sm:$0xff]  ;;  %v229_v3 = vld [vmem:[%s2707_s22 + $0x70] sm:$0xff] }
  0x17   : > { %v2767_v28 = vsel %vm438_vm3, %v442_v18, %v444_v19  ;;  %v2770_v29 = vsel %vm438_vm3, %v441_v20, %v442_v18  ;;  %v449_v30 = vrot.slane %v2759_v24, 1  ;;  %v451_v35 = vrot.slane %v2774_v31, 1  ;;  %v230_v8 = vld [vmem:[%s2707_s22 + $0x78] sm:$0xff]  ;;  %s2661_s18 = smov 32  }
  0x18   : > { %520 = vrot.lane.b32.xlu1 %v2767_v28, %s2654_s17  ;;  %518 = vrot.lane.b32.xlu0 %v2770_v29, %s2654_s17  ;;  %v2783_v34 = vsel %vm438_vm3, %v446_v22, %v447_v23  ;;  %v452_v36 = vrot.slane %v2762_v25, 1  ;;  %v2788_v37 = vsel %vm279_vm2, %v287_v13, 0.0  ;;  %v289_v40 = vrot.slane %v221_v26, 7  ;;  %v231_v22 = vld [vmem:[%s2707_s22 + $0x80] sm:$0xff] }
  0x19   : > { %v2791_v38 = vsel %vm438_vm3, %v447_v23, %v449_v30  ;;  %v454_v39 = vrot.slane %v2788_v37, 1  ;;  %v290_v41 = vrot.slane %v222_v27, 7  ;;  %v292_v43 = vrot.slane %v223_v32, 7  ;;  %v232_v32 = vld [vmem:[%s2707_s22 + $0x88] sm:$0xff] }
  0x1a   : > { %v293_v44 = vrot.slane %v224_v33, 7  ;;  %v2796_v45 = vsel %vm438_vm3, %v451_v35, %v452_v36  ;;  %v2802_v47 = vsel %vm279_vm2, 0.0, %v289_v40  ;;  %v295_v53 = vrot.slane %v225_v42, 7 }
  0x1b   : > { %v2799_v46 = vsel %vm279_vm2, %v289_v40, %v290_v41  ;;  %v2805_v48 = vsel %vm279_vm2, %v290_v41, 0.0  ;;  %v2813_v50 = vsel %vm438_vm3, %v452_v36, %v454_v39  ;;  %v456_v51 = vrot.slane %v2802_v47, 1 }
  0x1c   : > { %522 = vrot.lane.b32.xlu1 %v2783_v34, %s2654_s17  ;;  %524 = vrot.lane.b32.xlu0 %v2791_v38, %s2654_s17  ;;  %v2817_v52 = vsel %vm279_vm2, %v292_v43, %v293_v44  ;;  %v457_v54 = vrot.slane %v2799_v46, 1  ;;  %v459_v55 = vrot.slane %v2805_v48, 1  ;;  %v2822_v56 = vsel %vm279_vm2, 0.0, %v292_v43 }
  0x1d   : > { %4602 = vst [vmem:[#allocation3_spill] sm:$0xff] %v2817_v52  ;;  %v2825_v57 = vsel %vm279_vm2, %v293_v44, 0.0  ;;  %v296_v59 = vrot.slane %v226_v49, 7  ;;  %v461_v61 = vrot.slane %v2822_v56, 1  ;;  %v462_v62 = vrot.slane %v2817_v52, 1 }
  0x1e   : > { %v464_v63 = vrot.slane %v2825_v57, 1  ;;  %v298_v2 = vrot.slane %v227_v58, 7  ;;  %v2838_v4 = vsel %vm438_vm3, %v456_v51, %v457_v54  ;;  %v2841_v5 = vsel %vm438_vm3, %v457_v54, %v459_v55  ;;  %v233_v51 = vld [vmem:[%s2707_s22 + $0x90] sm:$0xff] }
  0x1f   : > { %v2844_v6 = vsel %vm279_vm2, 0.0, %v295_v53  ;;  %v299_v7 = vrot.slane %v228_v60, 7  ;;  %v2848_v9 = vsel %vm279_vm2, %v295_v53, %v296_v59  ;;  %v2851_v10 = vsel %vm279_vm2, %v296_v59, 0.0  ;;  %v234_v53 = vld [vmem:[%s2707_s22 + $0x98] sm:$0xff] }
  0x20   : > { %526 = vrot.lane.b32.xlu1 %v2796_v45, %s2654_s17  ;;  %528 = vrot.lane.b32.xlu0 %v2813_v50, %s2654_s17  ;;  %4603 = vst [vmem:[#allocation4_spill] sm:$0xff] %v2844_v6  ;;  %4604 = vst [vmem:[#allocation5_spill] sm:$0xff] %v2848_v9  ;;  %v2854_v11 = vsel %vm438_vm3, %v461_v61, %v462_v62  ;;  %v301_v12 = vrot.slane %v229_v3, 7  ;;  %v2861_v13 = vsel %vm438_vm3, %v462_v62, %v464_v63 }
  0x21   : > { %v466_v18 = vrot.slane %v2844_v6, 1  ;;  %v2865_v19 = vsel %vm279_vm2, 0.0, %v298_v2  ;;  %v302_v20 = vrot.slane %v230_v8, 7  ;;  %v467_v23 = vrot.slane %v2848_v9, 1  ;;  %v236_v8 = vld [vmem:[%s2707_s22 + $0xa8] sm:$0xff] }
  0x22   : > { %v469_v26 = vrot.slane %v2851_v10, 1  ;;  %v2871_v27 = vsel %vm279_vm2, %v298_v2, %v299_v7  ;;  %v2874_v30 = vsel %vm279_vm2, %v299_v7, 0.0  ;;  %v471_v33 = vrot.slane %v2865_v19, 1  ;;  %v235_v7 = vld [vmem:[%s2707_s22 + $0xa0] sm:$0xff] }
  0x23   : > { %v2879_v35 = vsel %vm279_vm2, 0.0, %v301_v12  ;;  %v304_v36 = vrot.slane %v231_v22, 7  ;;  %v472_v39 = vrot.slane %v2871_v27, 1  ;;  %v474_v40 = vrot.slane %v2874_v30, 1 }
  0x24   : > { %530 = vrot.lane.b32.xlu1 %v2838_v4, %s2654_s17  ;;  %532 = vrot.lane.b32.xlu0 %v2841_v5, %s2654_s17  ;;  %v2888_v41 = vsel %vm279_vm2, %v301_v12, %v302_v20  ;;  %v305_v42 = vrot.slane %v232_v32, 7  ;;  %v2891_v43 = vsel %vm438_vm3, %v466_v18, %v467_v23  ;;  %v2894_v44 = vsel %vm438_vm3, %v467_v23, %v469_v26  ;;  %v237_v26 = vld [vmem:[%s2707_s22 + $0xb0] sm:$0xff] }
  0x25   : > { %v2897_v49 = vsel %vm279_vm2, %v302_v20, 0.0  ;;  %v476_v54 = vrot.slane %v2879_v35, 1  ;;  %v477_v55 = vrot.slane %v2888_v41, 1  ;;  %v2908_v58 = vsel %vm438_vm3, %v471_v33, %v472_v39 }
  0x26   : > { %v2911_v59 = vsel %vm438_vm3, %v472_v39, %v474_v40  ;;  %v2914_v60 = vsel %vm279_vm2, %v304_v36, %v305_v42  ;;  %v2917_v61 = vsel %vm279_vm2, 0.0, %v304_v36  ;;  %v479_v62 = vrot.slane %v2897_v49, 1 }
  0x27   : > { %v2921_v63 = vsel %vm279_vm2, %v305_v42, 0.0  ;;  %v307_v2 = vrot.slane %v233_v51, 7  ;;  %v308_v3 = vrot.slane %v234_v53, 7  ;;  %v481_v12 = vrot.slane %v2917_v61, 1  ;;  %v238_v42 = vld [vmem:[%s2707_s22 + $0xb8] sm:$0xff] }
  0x28   : > { %534 = vrot.lane.b32.xlu1 %v2854_v11, %s2654_s17  ;;  %536 = vrot.lane.b32.xlu0 %v2861_v13, %s2654_s17  ;;  %4605 = vst [vmem:[#allocation6_spill] sm:$0xff] %v2921_v63  ;;  %v482_v18 = vrot.slane %v2914_v60, 1  ;;  %v2932_v20 = vsel %vm438_vm3, %v476_v54, %v477_v55  ;;  %v484_v22 = vrot.slane %v2921_v63, 1  ;;  %v310_v23 = vrot.slane %v235_v7, 7 }
  0x29   : > { %v2937_v32 = vsel %vm438_vm3, %v477_v55, %v479_v62  ;;  %v2940_v33 = vsel %vm279_vm2, %v307_v2, %v308_v3  ;;  %v2943_v36 = vsel %vm279_vm2, 0.0, %v307_v2  ;;  %v311_v39 = vrot.slane %v236_v8, 7 }
  0x2a   : > { %4606 = vst [vmem:[#allocation7_spill] sm:$0xff] %v2940_v33  ;;  %4607 = vst [vmem:[#allocation8_spill] sm:$0xff] %v2943_v36  ;;  %v2946_v40 = vsel %vm279_vm2, %v308_v3, 0.0  ;;  %v2950_v51 = vsel %vm438_vm3, %v481_v12, %v482_v18  ;;  %v313_v53 = vrot.slane %v237_v26, 7  ;;  %v2957_v54 = vsel %vm438_vm3, %v482_v18, %v484_v22  ;;  %v239_v18 = vld [vmem:[%s2707_s22 + $0xc0] sm:$0xff]  ;;  %v240_v26 = vld [vmem:[%s2707_s22 + $0xc8] sm:$0xff] }
  0x2b   : > { %4608 = vst [vmem:[#allocation9_spill] sm:$0xff] %v2946_v40  ;;  %v486_v55 = vrot.slane %v2943_v36, 1  ;;  %v487_v62 = vrot.slane %v2940_v33, 1  ;;  %v2962_v2 = vsel %vm279_vm2, 0.0, %v310_v23  ;;  %v489_v3 = vrot.slane %v2946_v40, 1  ;;  %v241_v36 = vld [vmem:[%s2707_s22 + $0xd0] sm:$0xff] }
  0x2c   : > { %538 = vrot.lane.b32.xlu1 %v2891_v43, %s2654_s17  ;;  %540 = vrot.lane.b32.xlu0 %v2894_v44, %s2654_s17  ;;  %4609 = vst [vmem:[#allocation10_spill] sm:$0xff] %v2962_v2  ;;  %v2966_v7 = vsel %vm279_vm2, %v310_v23, %v311_v39  ;;  %v2969_v8 = vsel %vm279_vm2, %v311_v39, 0.0  ;;  %v314_v12 = vrot.slane %v238_v42, 7  ;;  %v491_v22 = vrot.slane %v2962_v2, 1 }
  0x2d   : > { %4610 = vst [vmem:[#allocation11_spill] sm:$0xff] %v2966_v7  ;;  %4611 = vst [vmem:[#allocation12_spill] sm:$0xff] %v2969_v8  ;;  %v2979_v0 = vsel %vm438_vm3, %v486_v55, %v487_v62  ;;  %v492_v23 = vrot.slane %v2966_v7, 1  ;;  %v494_v39 = vrot.slane %v2969_v8, 1  ;;  %v2984_v42 = vsel %vm279_vm2, 0.0, %v313_v53  ;;  %v242_v7 = vld [vmem:[%s2707_s22 + $0xd8] sm:$0xff] }
  0x2e   : > { %4612 = vst [vmem:[#allocation13_spill] sm:$0xff] %v2979_v0  ;;  %4613 = vst [vmem:[#allocation14_spill] sm:$0xff] %v2984_v42  ;;  %v2987_v1 = vsel %vm438_vm3, %v487_v62, %v489_v3  ;;  %v2990_v2 = vsel %vm279_vm2, %v313_v53, %v314_v12  ;;  %v2993_v40 = vsel %vm279_vm2, %v314_v12, 0.0  ;;  %v316_v33 = vrot.slane %v239_v18, 7 }
  0x2f   : > { %4614 = vst [vmem:[#allocation15_spill] sm:$0xff] %v2987_v1  ;;  %4615 = vst [vmem:[#allocation16_spill] sm:$0xff] %v2990_v2  ;;  %v317_v55 = vrot.slane %v240_v26, 7  ;;  %v3002_v62 = vsel %vm438_vm3, %v491_v22, %v492_v23  ;;  %v496_v53 = vrot.slane %v2984_v42, 1  ;;  %v497_v3 = vrot.slane %v2990_v2, 1  ;;  %v244_v42 = vld [vmem:[%s2707_s22 + $0xe8] sm:$0xff] }
  0x30   : > { %542 = vrot.lane.b32.xlu1 %v2908_v58, %s2654_s17  ;;  %544 = vrot.lane.b32.xlu0 %v2911_v59, %s2654_s17  ;;  %4616 = vst [vmem:[#allocation17_spill] sm:$0xff] %v2993_v40  ;;  %v499_v12 = vrot.slane %v2993_v40, 1  ;;  %v3008_v18 = vsel %vm438_vm3, %v492_v23, %v494_v39  ;;  %v3011_v26 = vsel %vm279_vm2, 0.0, %v316_v33  ;;  %v319_v8 = vrot.slane %v241_v36, 7 }
  0x31   : > { %4617 = vst [vmem:[#allocation18_spill] sm:$0xff] %v3008_v18  ;;  %4618 = vst [vmem:[#allocation19_spill] sm:$0xff] %v3011_v26  ;;  %v3014_v63 = vsel %vm279_vm2, %v316_v33, %v317_v55  ;;  %v3017_v22 = vsel %vm279_vm2, %v317_v55, 0.0  ;;  %v3026_v23 = vsel %vm438_vm3, %v496_v53, %v497_v3  ;;  %v501_v33 = vrot.slane %v3011_v26, 1 }
  0x32   : > { %4619 = vst [vmem:[#allocation20_spill] sm:$0xff] %v3014_v63  ;;  %4620 = vst [vmem:[#allocation21_spill] sm:$0xff] %v3017_v22  ;;  %v3029_v36 = vsel %vm438_vm3, %v497_v3, %v499_v12  ;;  %v504_v39 = vrot.slane %v3017_v22, 1  ;;  %v3038_v40 = vsel %vm279_vm2, 0.0, %v319_v8 }
  0x33   : > { %4621 = vst [vmem:[#allocation22_spill] sm:$0xff] %v3026_v23  ;;  %4622 = vst [vmem:[#allocation23_spill] sm:$0xff] %v3029_v36  ;;  %v506_v3 = vrot.slane %v3038_v40, 1 }
  0x34   : > { %546 = vrot.lane.b32.xlu1 %v2932_v20, %s2654_s17  ;;  %548 = vrot.lane.b32.xlu0 %v2937_v32, %s2654_s17  ;;  %4624 = vst [vmem:[#allocation25_spill] sm:$0xff] %v3038_v40  ;;  %v638_v40 = vrot.slane %v2848_v9, 2 }
  0x38   : > { %550 = vrot.lane.b32.xlu1 %v2950_v51, %s2654_s17  ;;  %552 = vrot.lane.b32.xlu0 %v2957_v54, %s2654_s17 }
  0x3c   : > { %554 = vrot.lane.b32.xlu1 %v2979_v0, %s2654_s17  ;;  %556 = vrot.lane.b32.xlu0 %v2987_v1, %s2654_s17  ;;  %v320_v0 = vrot.slane %v242_v7, 7  ;;  %v243_v1 = vld [vmem:[%s2707_s22 + $0xe0] sm:$0xff]  ;;  %v502_v7 = vrot.slane %v3014_v63, 1 }
  0x3d   : > { %v322_v53 = vrot.slane %v243_v1, 7 }
  0x3e   : > { %v3035_v55 = vsel %vm279_vm2, %v319_v8, %v320_v0  ;;  %v3041_v2 = vsel %vm279_vm2, %v320_v0, 0.0  ;;  %v3050_v22 = vsel %vm438_vm3, %v501_v33, %v502_v7  ;;  %v3053_v8 = vsel %vm438_vm3, %v502_v7, %v504_v39 }
  0x3f   : > { %4623 = vst [vmem:[#allocation24_spill] sm:$0xff] %v3035_v55  ;;  %4625 = vst [vmem:[#allocation26_spill] sm:$0xff] %v3041_v2  ;;  %v507_v12 = vrot.slane %v3035_v55, 1  ;;  %v509_v0 = vrot.slane %v3041_v2, 1 }
  0x40   : > { %558 = vrot.lane.b32.xlu1 %v3002_v62, %s2654_s17  ;;  %560 = vrot.lane.b32.xlu0 %v3008_v18, %s2654_s17  ;;  %v323_v18 = vrot.slane %v244_v42, 7  ;;  %4626 = vst [vmem:[#allocation27_spill] sm:$0xff] %v3050_v22  ;;  %4627 = vst [vmem:[#allocation28_spill] sm:$0xff] %v3053_v8  ;;  %v3060_v42 = vsel %vm279_vm2, 0.0, %v322_v53 }
  0x41   : > { %4629 = vst [vmem:[#allocation30_spill] sm:$0xff] %v3060_v42  ;;  %v3070_v33 = vsel %vm438_vm3, %v506_v3, %v507_v12  ;;  %v3073_v7 = vsel %vm438_vm3, %v507_v12, %v509_v0  ;;  %v511_v39 = vrot.slane %v3060_v42, 1  ;;  %v612_v12 = vrot.slane %v2745_v16, 2 }
  0x42   : > { %v3057_v1 = vsel %vm279_vm2, %v322_v53, %v323_v18  ;;  %v3063_v63 = vsel %vm279_vm2, %v323_v18, 0.0  ;;  %4631 = vst [vmem:[#allocation32_spill] sm:$0xff] %v3070_v33  ;;  %4632 = vst [vmem:[#allocation33_spill] sm:$0xff] %v3073_v7  ;;  %v613_v0 = vrot.slane %v2739_v14, 2 }
  0x43   : > { %4628 = vst [vmem:[#allocation29_spill] sm:$0xff] %v3057_v1  ;;  %4630 = vst [vmem:[#allocation31_spill] sm:$0xff] %v3063_v63  ;;  %v512_v53 = vrot.slane %v3057_v1, 1  ;;  %v514_v2 = vrot.slane %v3063_v63, 1  ;;  %v4635_v63 = vmov 0.0  }
  0x44   : > { %562 = vrot.lane.b32.xlu1 %v3026_v23, %s2654_s17  ;;  %564 = vrot.lane.b32.xlu0 %v3029_v36, %s2654_s17  ;;  %v3095_v1 = vrot.slane %v4635_v63, 2  ;;  %v614_v42 = vsel %vm609_vm4, %v612_v12, %v613_v0  ;;  %v620_v63 = vrot.slane %v2759_v24, 2  ;;  %v623_v12 = vrot.slane %v2762_v25, 2 }
  0x45   : > { %v3083_v18 = vsel %vm438_vm3, %v511_v39, %v512_v53  ;;  %v3086_v3 = vsel %vm438_vm3, %v512_v53, %v514_v2  ;;  %v615_v39 = vrot.slane %v2742_v15, 2  ;;  %v617_v2 = vrot.slane %v2748_v17, 2 }
  0x46   : > { %4633 = vst [vmem:[#allocation34_spill] sm:$0xff] %v3083_v18  ;;  %4634 = vst [vmem:[#allocation35_spill] sm:$0xff] %v3086_v3  ;;  %v618_v53 = vrot.slane %v2754_v21, 2  ;;  %v622_v15 = vrot.slane %v2774_v31, 2  ;;  %v628_v24 = vrot.slane %v2799_v46, 2 }
  0x47   : > { %4636 = vst [vmem:[#allocation36_spill] sm:$0xff] %v3095_v1 }
  0x48   : > { %566 = vrot.lane.b32.xlu1 %v3050_v22, %s2654_s17  ;;  %568 = vrot.lane.b32.xlu0 %v3053_v8, %s2654_s17  ;;  %v640_v22 = vrot.slane %v2851_v10, 2 }
  0x4c   : > { %570 = vrot.lane.b32.xlu1 %v3070_v33, %s2654_s17  ;;  %572 = vrot.lane.b32.xlu0 %v3073_v7, %s2654_s17  ;;  %v3116_v7 = vsel %vm609_vm4, %v618_v53, %v620_v63  ;;  %v630_v63 = vrot.slane %v2805_v48, 2 }
  0x4e   : > { %v3141_v33 = vsel %vm609_vm4, %v628_v24, %v630_v63 }
  0x50   : > { %574 = vrot.lane.b32.xlu1 %v3083_v18, %s2654_s17  ;;  %576 = vrot.lane.b32.xlu0 %v3086_v3, %s2654_s17  ;;  %v616_v18 = vsel %vm609_vm4, %v613_v0, %v615_v39  ;;  %v3106_v3 = vsel %vm609_vm4, %v617_v2, %v618_v53  ;;  %v3119_v0 = vsel %vm609_vm4, %v622_v15, %v623_v12  ;;  %v627_v39 = vrot.slane %v2802_v47, 2  ;;  %s2660_s17 = smov 28  }
  0x51   : > { %v632_v53 = vrot.slane %v2822_v56, 2  ;;  %v633_v15 = vrot.slane %v2817_v52, 2 }
  0x54   : > { %687 = vrot.lane.b32.xlu1 %v3095_v1, %s2655_s26  ;;  %689 = vrot.lane.b32.xlu0 %v614_v42, %s2655_s26  ;;  %v625_v1 = vrot.slane %v2788_v37, 2  ;;  %v3131_v37 = vsel %vm609_vm4, %v627_v39, %v628_v24  ;;  %v1624_v39 = vld [vmem:[%s4537_s1 + $0x18] sm:$0xff] }
  0x56   : > { %v3128_v2 = vsel %vm609_vm4, %v623_v12, %v625_v1  ;;  %v3144_v1 = vsel %vm609_vm4, %v632_v53, %v633_v15  ;;  %v635_v12 = vrot.slane %v2825_v57, 2  ;;  %v1625_v57 = vld [vmem:[%s4537_s1 + $0x20] sm:$0xf] }
  0x57   : > { %2559 = vmatprep.subr.msk.mxu0 %vm1723_vm5, %v1625_v57  ;;  %2617 = vmatprep.subr.msk.mxu1 %vm1723_vm5, %v1625_v57 }
  0x58   : > { %691 = vrot.lane.b32.xlu1 %v616_v18, %s2655_s26  ;;  %693 = vrot.lane.b32.xlu0 %v3106_v3, %s2655_s26  ;;  %v3152_v48 = vsel %vm609_vm4, %v633_v15, %v635_v12 }
  0x59   : > { %2560 = vmatpush3.msk.msra.mxu0 %vm1723_vm5, %v1625_v57  ;;  %2622 = vmatpush3.msk.msra.mxu1 %vm1723_vm5, %v1625_v57 }
  0x5a   : > { %2561 = vmatprep.subr.mxu0 %v1624_v39  ;;  %2618 = vmatprep.subr.mxu1 %v1624_v39 }
  0x5b   : > { %2562 = vmatpush3.msra.mxu0 %v1624_v39  ;;  %2623 = vmatpush3.msra.mxu1 %v1624_v39 }
  0x5c   : > { %695 = vrot.lane.b32.xlu1 %v3116_v7, %s2655_s26  ;;  %697 = vrot.lane.b32.xlu0 %v3119_v0, %s2655_s26 }
  0x60   : > { %699 = vrot.lane.b32.xlu1 %v3128_v2, %s2655_s26  ;;  %701 = vrot.lane.b32.xlu0 %v3131_v37, %s2655_s26 }
  0x64   : > { %703 = vrot.lane.b32.xlu1 %v3141_v33, %s2655_s26  ;;  %705 = vrot.lane.b32.xlu0 %v3144_v1, %s2655_s26 }
  0x68   : > { %707 = vrot.lane.b32.xlu1 %v3152_v48, %s2655_s26  ;;  %781 = vrot.lane.b32.xlu0 %v2745_v16, %s2656_s27 }
  0x6c   : > { %783 = vrot.lane.b32.xlu1 %v2739_v14, %s2656_s27  ;;  %883 = vrot.lane.b32.xlu0 %v2770_v29, %s2657_s28  ;;  %v1622_v29 = vld [vmem:[%s4537_s1 + $0x8] sm:$0xff] }
  0x70   : > { %885 = vrot.lane.b32.xlu1 %v2767_v28, %s2657_s28  ;;  %984 = vrot.lane.b32.xlu0 %v614_v42, %s2658_s29  ;;  %v1623_v28 = vld [vmem:[%s4537_s1 + $0x10] sm:$0xff]  ;;  %v1621_v42 = vld [vmem:[%s4537_s1] sm:$0xff] }
  0x71   : > { %2563 = vmatprep.subr.mxu0 %v1623_v28  ;;  %2619 = vmatprep.subr.mxu1 %v1623_v28 }
  0x72   : > { %2564 = vmatpush3.msra.mxu0 %v1623_v28  ;;  %2624 = vmatpush3.msra.mxu1 %v1623_v28 }
  0x73   : > { %2565 = vmatprep.subr.mxu0 %v1622_v29  ;;  %2620 = vmatprep.subr.mxu1 %v1622_v29 }
  0x74   : > { %986 = vrot.lane.b32.xlu1 %v616_v18, %s2658_s29  ;;  %1080 = vrot.lane.b32.xlu0 %v2748_v17, %s2659_s8 }
  0x75   : > { %2566 = vmatpush3.msra.mxu0 %v1622_v29  ;;  %2625 = vmatpush3.msra.mxu1 %v1622_v29 }
  0x76   : > { %2567 = vmatprep.subr.mxu0 %v1621_v42  ;;  %2621 = vmatprep.subr.mxu1 %v1621_v42 }
  0x77   : > { %2568 = vmatpush3.msra.mxu0 %v1621_v42  ;;  %2626 = vmatpush3.msra.mxu1 %v1621_v42 }
  0x78   : > { %785 = vrot.lane.b32.xlu1 %v2748_v17, %s2656_s27  ;;  %1082 = vrot.lane.b32.xlu0 %v2754_v21, %s2659_s8 }
  0x7c   : > { %1173 = vrot.lane.b32.xlu1 %v2783_v34, %s2660_s17  ;;  %787 = vrot.lane.b32.xlu0 %v2754_v21, %s2656_s27 }
  0x80   : > { %887 = vrot.lane.b32.xlu1 %v2783_v34, %s2657_s28  ;;  %1175 = vrot.lane.b32.xlu0 %v2791_v38, %s2660_s17  ;;  %v3199_v18 = vpop.permute.xlu0 %516 }
  0x84   : > { %1266 = vrot.lane.b32.xlu1 %v3106_v3, %s2661_s18  ;;  %889 = vrot.lane.b32.xlu0 %v2791_v38, %s2657_s28 }
  0x88   : > { %988 = vrot.lane.b32.xlu1 %v3106_v3, %s2658_s29  ;;  %1268 = vrot.lane.b32.xlu0 %v3116_v7, %s2661_s18 }
  0x8a   : > { %v3205_v24 = vpop.permute.xlu1 %520  ;;  %v3207_v34 = vpop.permute.xlu0 %518 }
  0x8c   : > { %990 = vrot.lane.b32.xlu1 %v3116_v7, %s2658_s29  ;;  %1084 = vrot.lane.b32.xlu0 %v2774_v31, %s2659_s8 }
  0x8e   : > { %v3213_v63 = vpop.permute.xlu1 %522  ;;  %v3215_v38 = vpop.permute.xlu0 %524 }
  0x90   : > { %789 = vrot.lane.b32.xlu1 %v2774_v31, %s2656_s27  ;;  %1086 = vrot.lane.b32.xlu0 %v2762_v25, %s2659_s8 }
  0x92   : > { %v3221_v3 = vpop.permute.xlu1 %526  ;;  %v3223_v53 = vpop.permute.xlu0 %528 }
  0x94   : > { %1177 = vrot.lane.b32.xlu1 %v2796_v45, %s2660_s17  ;;  %791 = vrot.lane.b32.xlu0 %v2762_v25, %s2656_s27 }
  0x96   : > { %v3229_v7 = vpop.permute.xlu1 %530  ;;  %v3231_v15 = vpop.permute.xlu0 %532 }
  0x98   : > { %891 = vrot.lane.b32.xlu1 %v2796_v45, %s2657_s28  ;;  %1179 = vrot.lane.b32.xlu0 %v2813_v50, %s2660_s17 }
  0x9a   : > { %v3237_v12 = vpop.permute.xlu1 %534  ;;  %v3239_v57 = vpop.permute.xlu0 %536 }
  0x9c   : > { %1270 = vrot.lane.b32.xlu1 %v3119_v0, %s2661_s18  ;;  %893 = vrot.lane.b32.xlu0 %v2813_v50, %s2657_s28 }
  0x9e   : > { %v3245_v39 = vpop.permute.xlu1 %538  ;;  %v3247_v28 = vpop.permute.xlu0 %540 }
  0x9f   : > { %4637 = vst [vmem:[#allocation37_spill] sm:$0xff] %v3245_v39  ;;  %4638 = vst [vmem:[#allocation38_spill] sm:$0xff] %v3247_v28 }
  0xa0   : > { %992 = vrot.lane.b32.xlu1 %v3119_v0, %s2658_s29  ;;  %1272 = vrot.lane.b32.xlu0 %v3128_v2, %s2661_s18 }
  0xa2   : > { %v3253_v45 = vpop.permute.xlu1 %542  ;;  %v3255_v29 = vpop.permute.xlu0 %544 }
  0xa3   : > { %4639 = vst [vmem:[#allocation39_spill] sm:$0xff] %v3253_v45  ;;  %4640 = vst [vmem:[#allocation40_spill] sm:$0xff] %v3255_v29 }
  0xa4   : > { %994 = vrot.lane.b32.xlu1 %v3128_v2, %s2658_s29  ;;  %1088 = vrot.lane.b32.xlu0 %v2802_v47, %s2659_s8 }
  0xa6   : > { %v3261_v50 = vpop.permute.xlu1 %546  ;;  %v3263_v42 = vpop.permute.xlu0 %548 }
  0xa7   : > { %4641 = vst [vmem:[#allocation41_spill] sm:$0xff] %v3261_v50  ;;  %4642 = vst [vmem:[#allocation42_spill] sm:$0xff] %v3263_v42 }
  0xa8   : > { %793 = vrot.lane.b32.xlu1 %v2802_v47, %s2656_s27  ;;  %1090 = vrot.lane.b32.xlu0 %v2799_v46, %s2659_s8 }
  0xaa   : > { %v3269_v0 = vpop.permute.xlu1 %550  ;;  %v3271_v55 = vpop.permute.xlu0 %552 }
  0xab   : > { %4643 = vst [vmem:[#allocation43_spill] sm:$0xff] %v3269_v0  ;;  %4644 = vst [vmem:[#allocation44_spill] sm:$0xff] %v3271_v55 }
  0xac   : > { %1181 = vrot.lane.b32.xlu1 %v2838_v4, %s2660_s17  ;;  %795 = vrot.lane.b32.xlu0 %v2799_v46, %s2656_s27 }
  0xae   : > { %v3277_v2 = vpop.permute.xlu1 %554  ;;  %v3279_v50 = vpop.permute.xlu0 %556 }
  0xaf   : > { %4645 = vst [vmem:[#allocation45_spill] sm:$0xff] %v3277_v2  ;;  %4646 = vst [vmem:[#allocation46_spill] sm:$0xff] %v3279_v50 }
  0xb0   : > { %895 = vrot.lane.b32.xlu1 %v2838_v4, %s2657_s28  ;;  %1183 = vrot.lane.b32.xlu0 %v2841_v5, %s2660_s17 }
  0xb2   : > { %v3285_v42 = vpop.permute.xlu1 %558  ;;  %v3287_v0 = vpop.permute.xlu0 %560 }
  0xb3   : > { %4647 = vst [vmem:[#allocation47_spill] sm:$0xff] %v3285_v42  ;;  %4648 = vst [vmem:[#allocation48_spill] sm:$0xff] %v3287_v0 }
  0xb4   : > { %1274 = vrot.lane.b32.xlu1 %v3131_v37, %s2661_s18  ;;  %897 = vrot.lane.b32.xlu0 %v2841_v5, %s2657_s28 }
  0xb6   : > { %v3293_v55 = vpop.permute.xlu1 %562  ;;  %v3295_v2 = vpop.permute.xlu0 %564 }
  0xb7   : > { %4649 = vst [vmem:[#allocation49_spill] sm:$0xff] %v3293_v55  ;;  %4650 = vst [vmem:[#allocation50_spill] sm:$0xff] %v3295_v2 }
  0xb8   : > { %996 = vrot.lane.b32.xlu1 %v3131_v37, %s2658_s29  ;;  %1276 = vrot.lane.b32.xlu0 %v3141_v33, %s2661_s18 }
  0xba   : > { %v3301_v4 = vpop.permute.xlu1 %566  ;;  %v3303_v42 = vpop.permute.xlu0 %568 }
  0xbb   : > { %4651 = vst [vmem:[#allocation51_spill] sm:$0xff] %v3301_v4  ;;  %4652 = vst [vmem:[#allocation52_spill] sm:$0xff] %v3303_v42 }
  0xbc   : > { %998 = vrot.lane.b32.xlu1 %v3141_v33, %s2658_s29  ;;  %1092 = vrot.lane.b32.xlu0 %v2822_v56, %s2659_s8 }
  0xbe   : > { %v3309_v5 = vpop.permute.xlu1 %570  ;;  %v3311_v55 = vpop.permute.xlu0 %572 }
  0xbf   : > { %4653 = vst [vmem:[#allocation53_spill] sm:$0xff] %v3309_v5  ;;  %4654 = vst [vmem:[#allocation54_spill] sm:$0xff] %v3311_v55 }
  0xc0   : > { %797 = vrot.lane.b32.xlu1 %v2822_v56, %s2656_s27  ;;  %1094 = vrot.lane.b32.xlu0 %v2817_v52, %s2659_s8 }
  0xc2   : > { %v3317_v37 = vpop.permute.xlu1 %574  ;;  %v3319_v4 = vpop.permute.xlu0 %576 }
  0xc3   : > { %4655 = vst [vmem:[#allocation55_spill] sm:$0xff] %v3317_v37  ;;  %4656 = vst [vmem:[#allocation56_spill] sm:$0xff] %v3319_v4 }
  0xc4   : > { %1185 = vrot.lane.b32.xlu1 %v2854_v11, %s2660_s17  ;;  %799 = vrot.lane.b32.xlu0 %v2817_v52, %s2656_s27 }
  0xc6   : > { %v688_v33 = vpop.permute.xlu1 %687  ;;  %v3325_v5 = vpop.permute.xlu0 %689 }
  0xc8   : > { %899 = vrot.lane.b32.xlu1 %v2854_v11, %s2657_s28  ;;  %1187 = vrot.lane.b32.xlu0 %v2861_v13, %s2660_s17 }
  0xca   : > { %v3331_v55 = vpop.permute.xlu1 %691  ;;  %v3333_v37 = vpop.permute.xlu0 %693 }
  0xcc   : > { %1278 = vrot.lane.b32.xlu1 %v3144_v1, %s2661_s18  ;;  %901 = vrot.lane.b32.xlu0 %v2861_v13, %s2657_s28 }
  0xce   : > { %v3339_v4 = vpop.permute.xlu1 %695  ;;  %v3341_v42 = vpop.permute.xlu0 %697 }
  0xd0   : > { %1000 = vrot.lane.b32.xlu1 %v3144_v1, %s2658_s29  ;;  %1280 = vrot.lane.b32.xlu0 %v3152_v48, %s2661_s18 }
  0xd2   : > { %v3347_v11 = vpop.permute.xlu1 %699  ;;  %v3349_v2 = vpop.permute.xlu0 %701 }
  0xd4   : > { %1002 = vrot.lane.b32.xlu1 %v3152_v48, %s2658_s29  ;;  %1096 = vrot.lane.b32.xlu0 %v2844_v6, %s2659_s8  ;;  %v637_v48 = vrot.slane %v2844_v6, 2 }
  0xd6   : > { %v3355_v13 = vpop.permute.xlu1 %703  ;;  %v3357_v0 = vpop.permute.xlu0 %705  ;;  %v639_v45 = vsel %vm609_vm4, %v637_v48, %v638_v40 }
  0xd8   : > { %801 = vrot.lane.b32.xlu1 %v2844_v6, %s2656_s27  ;;  %1098 = vrot.lane.b32.xlu0 %v2848_v9, %s2659_s8 }
  0xda   : > { %v3363_v1 = vpop.permute.xlu1 %707  ;;  %v782_v50 = vpop.permute.xlu0 %781 }
  0xdb   : > { %4657 = vst [vmem:[#allocation57_spill] sm:$0xff] %v3363_v1 }
  0xdc   : > { %1189 = vrot.lane.b32.xlu1 %v2891_v43, %s2660_s17  ;;  %803 = vrot.lane.b32.xlu0 %v2848_v9, %s2656_s27  ;;  %v641_v9 = vsel %vm609_vm4, %v638_v40, %v640_v22 }
  0xde   : > { %v784_v29 = vpop.permute.xlu1 %783  ;;  %v884_v8 = vpop.permute.xlu0 %883 }
  0xe0   : > { %903 = vrot.lane.b32.xlu1 %v2891_v43, %s2657_s28  ;;  %1191 = vrot.lane.b32.xlu0 %v2894_v44, %s2660_s17 }
  0xe2   : > { %v886_v26 = vpop.permute.xlu1 %885  ;;  %v985_v28 = vpop.permute.xlu0 %984 }
  0xe4   : > { %1282 = vrot.lane.b32.xlu1 %v639_v45, %s2661_s18  ;;  %905 = vrot.lane.b32.xlu0 %v2894_v44, %s2657_s28  ;;  %v1360_v44 = vsel %vm1359_vm0, 0.0, %v3199_v18 }
  0xe5   : > { %v1392_v40 = vsel %vm1391_vm6, %v1360_v44, %v688_v33 }
  0xe6   : > { %v987_v36 = vpop.permute.xlu1 %986  ;;  %v1081_v6 = vpop.permute.xlu0 %1080  ;;  %v1424_v22 = vsel %vm1423_vm7, %v1392_v40, %v782_v50  ;;  %v1425_v18 = vsel %vm1423_vm7, %v1392_v40, %v784_v29  ;;  %v643_v29 = vrot.slane %v2871_v27, 2 }
  0xe7   : > { %v1457_v1 = vsel %vm1456_vm8, %v1424_v22, %v884_v8  ;;  %v1458_v8 = vsel %vm1456_vm8, %v1425_v18, %v886_v26  ;;  %v645_v22 = vrot.slane %v2874_v30, 2  ;;  %v1361_v30 = vsel %vm1359_vm0, %v2745_v16, %v3207_v34 }
  0xe8   : > { %1004 = vrot.lane.b32.xlu1 %v639_v45, %s2658_s29  ;;  %1284 = vrot.lane.b32.xlu0 %v641_v9, %s2661_s18  ;;  %v1490_v52 = vsel %vm1489_vm9, %v1457_v1, %v985_v28  ;;  %v1491_v1 = vsel %vm1489_vm9, %v1458_v8, %v987_v36 }
  0xea   : > { %v3383_v43 = vpop.permute.xlu1 %785  ;;  %v1083_v48 = vpop.permute.xlu0 %1082 }
  0xec   : > { %709 = vrot.lane.b32.xlu1 %v639_v45, %s2655_s26  ;;  %1006 = vrot.lane.b32.xlu0 %v641_v9, %s2658_s29 }
  0xee   : > { %v1174_v10 = vpop.permute.xlu1 %1173  ;;  %v3387_v39 = vpop.permute.xlu0 %787 }
  0xf0   : > { %1100 = vrot.lane.b32.xlu1 %v2865_v19, %s2659_s8  ;;  %711 = vrot.lane.b32.xlu0 %v641_v9, %s2655_s26  ;;  %v1523_v9 = vsel %vm1522_vm10, %v1490_v52, %v1081_v6  ;;  %v1524_v52 = vsel %vm1522_vm10, %v1491_v1, %v1083_v48  ;;  %v642_v6 = vrot.slane %v2865_v19, 2 }
  0xf1   : > { %v1556_v50 = vsel %vm1555_vm11, %v1523_v9, %v1174_v10 }
  0xf2   : > { %v888_v45 = vpop.permute.xlu1 %887  ;;  %v1176_v23 = vpop.permute.xlu0 %1175  ;;  %v644_v48 = vsel %vm609_vm4, %v642_v6, %v643_v29 }
  0xf3   : > { %v1557_v26 = vsel %vm1555_vm11, %v1524_v52, %v1176_v23  ;;  %v646_v23 = vsel %vm609_vm4, %v643_v29, %v645_v22  ;;  %v1362_v29 = vsel %vm1359_vm0, %v2739_v14, %v3205_v24  ;;  %v647_v22 = vrot.slane %v2879_v35, 2 }
  0xf4   : > { %805 = vrot.lane.b32.xlu1 %v2865_v19, %s2656_s27  ;;  %1102 = vrot.lane.b32.xlu0 %v2871_v27, %s2659_s8  ;;  %v1394_v34 = vsel %vm1391_vm6, %v1362_v29, %v3331_v55 }
  0xf6   : > { %v1267_v33 = vpop.permute.xlu1 %1266  ;;  %v890_v44 = vpop.permute.xlu0 %889 }
  0xf7   : > { %v1589_v28 = vsel %vm1588_vm12, %v1556_v50, %v1267_v33 }
  0xf8   : > { %1193 = vrot.lane.b32.xlu1 %v2908_v58, %s2660_s17  ;;  %807 = vrot.lane.b32.xlu0 %v2871_v27, %s2656_s27 }
  0xf9   : > { %2569 = vmatprep.mubr.msk.f32.mxu0 %vm1626_vm13, %v1589_v28 }
  0xfa   : > { %v989_v10 = vpop.permute.xlu1 %988  ;;  %v1269_v40 = vpop.permute.xlu0 %1268 }
  0xfb   : > { %v1590_v36 = vsel %vm1588_vm12, %v1557_v26, %v1269_v40 }
  0xfc   : > { %907 = vrot.lane.b32.xlu1 %v2908_v58, %s2657_s28  ;;  %1195 = vrot.lane.b32.xlu0 %v2911_v59, %s2660_s17 }
  0xfd   : > { %2570 = vmatmul.mubr.msk.f32.vlgmr.msra.gmra.mxu0 %vm1626_vm13, %v1590_v36 }
  0xfe   : > { %v991_v9 = vpop.permute.xlu1 %990  ;;  %v1085_v18 = vpop.permute.xlu0 %1084 }
 0x100   : > { %1286 = vrot.lane.b32.xlu1 %v644_v48, %s2661_s18  ;;  %909 = vrot.lane.b32.xlu0 %v2911_v59, %s2657_s28  ;;  %v1393_v59 = vsel %vm1391_vm6, %v1361_v30, %v3325_v5 }
 0x101   : > { %v1426_v28 = vsel %vm1423_vm7, %v1393_v59, %v3383_v43  ;;  %v1427_v43 = vsel %vm1423_vm7, %v1394_v34, %v3387_v39 }
 0x102   : > { %v790_v50 = vpop.permute.xlu1 %789  ;;  %v1087_v58 = vpop.permute.xlu0 %1086  ;;  %v1459_v6 = vsel %vm1456_vm8, %v1426_v28, %v888_v45  ;;  %v1460_v14 = vsel %vm1456_vm8, %v1427_v43, %v890_v44 }
 0x103   : > { %v1492_v16 = vsel %vm1489_vm9, %v1459_v6, %v989_v10  ;;  %v1493_v10 = vsel %vm1489_vm9, %v1460_v14, %v991_v9  ;;  %v648_v9 = vrot.slane %v2888_v41, 2 }
 0x104   : > { %1008 = vrot.lane.b32.xlu1 %v644_v48, %s2658_s29  ;;  %1288 = vrot.lane.b32.xlu0 %v646_v23, %s2661_s18  ;;  %v1525_v5 = vsel %vm1522_vm10, %v1492_v16, %v1085_v18  ;;  %v1526_v55 = vsel %vm1522_vm10, %v1493_v10, %v1087_v58 }
 0x105   : > { %v649_v58 = vsel %vm609_vm4, %v647_v22, %v648_v9 }
 0x106   : > { %v1178_v33 = vpop.permute.xlu1 %1177  ;;  %v3431_v8 = vpop.permute.xlu0 %791 }
 0x107   : > { %v1558_v45 = vsel %vm1555_vm11, %v1525_v5, %v1178_v33  ;;  %v650_v33 = vrot.slane %v2897_v49, 2  ;;  %v1364_v5 = vsel %vm1359_vm0, %v2754_v21, %v3215_v38 }
 0x108   : > { %713 = vrot.lane.b32.xlu1 %v644_v48, %s2655_s26  ;;  %1010 = vrot.lane.b32.xlu0 %v646_v23, %s2658_s29 }
 0x109   : > { %v651_v28 = vsel %vm609_vm4, %v648_v9, %v650_v33  ;;  %v4658_v9 = vld [vmem:[#allocation6_spill] sm:$0xff]  ;;  %v1365_v33 = vsel %vm1359_vm0, %v2774_v31, %v3221_v3  ;;  %v1366_v31 = vsel %vm1359_vm0, %v2762_v25, %v3223_v53 }
 0x10a   : > { %v892_v1 = vpop.permute.xlu1 %891  ;;  %v1180_v52 = vpop.permute.xlu0 %1179 }
 0x10b   : > { %v1559_v39 = vsel %vm1555_vm11, %v1526_v55, %v1180_v52 }
 0x10c   : > { %1104 = vrot.lane.b32.xlu1 %v2879_v35, %s2659_s8  ;;  %715 = vrot.lane.b32.xlu0 %v646_v23, %s2655_s26 }
 0x10e   : > { %v1271_v26 = vpop.permute.xlu1 %1270  ;;  %v894_v40 = vpop.permute.xlu0 %893 }
 0x10f   : > { %v1591_v24 = vsel %vm1588_vm12, %v1558_v45, %v1271_v26 }
 0x110   : > { %809 = vrot.lane.b32.xlu1 %v2879_v35, %s2656_s27  ;;  %1106 = vrot.lane.b32.xlu0 %v2888_v41, %s2659_s8 }
 0x111   : > { %2572 = vmatprep.mubr.msk.f32.mxu0 %vm1626_vm13, %v1591_v24 }
 0x112   : > { %v993_v36 = vpop.permute.xlu1 %992  ;;  %v1273_v48 = vpop.permute.xlu0 %1272 }
 0x113   : > { %v1592_v44 = vsel %vm1588_vm12, %v1559_v39, %v1273_v48  ;;  %v652_v39 = vrot.slane %v2917_v61, 2 }
 0x114   : > { %1197 = vrot.lane.b32.xlu1 %v2932_v20, %s2660_s17  ;;  %811 = vrot.lane.b32.xlu0 %v2888_v41, %s2656_s27 }
 0x115   : > { %2573 = vmatmul.mubr.msk.f32.gmra.mxu0 %vm1626_vm13, %v1592_v44 }
 0x116   : > { %v995_v18 = vpop.permute.xlu1 %994  ;;  %v1089_v23 = vpop.permute.xlu0 %1088 }
 0x118   : > { %911 = vrot.lane.b32.xlu1 %v2932_v20, %s2657_s28  ;;  %1199 = vrot.lane.b32.xlu0 %v2937_v32, %s2660_s17  ;;  %v1363_v20 = vsel %vm1359_vm0, %v2748_v17, %v3213_v63  ;;  %v1396_v17 = vsel %vm1391_vm6, %v1364_v5, %v3339_v4 }
 0x119   : > { %v1395_v49 = vsel %vm1391_vm6, %v1363_v20, %v3333_v37  ;;  %v1429_v37 = vsel %vm1423_vm7, %v1396_v17, %v3431_v8 }
 0x11a   : > { %v794_v30 = vpop.permute.xlu1 %793  ;;  %v1091_v59 = vpop.permute.xlu0 %1090  ;;  %v1428_v29 = vsel %vm1423_vm7, %v1395_v49, %v790_v50  ;;  %v1462_v21 = vsel %vm1456_vm8, %v1429_v37, %v894_v40 }
 0x11b   : > { %v1461_v34 = vsel %vm1456_vm8, %v1428_v29, %v892_v1  ;;  %v1495_v26 = vsel %vm1489_vm9, %v1462_v21, %v995_v18  ;;  %v655_v18 = vrot.slane %v4658_v9, 2 }
 0x11c   : > { %1290 = vrot.lane.b32.xlu1 %v649_v58, %s2661_s18  ;;  %913 = vrot.lane.b32.xlu0 %v2937_v32, %s2657_s28  ;;  %v1494_v43 = vsel %vm1489_vm9, %v1461_v34, %v993_v36  ;;  %v1528_v4 = vsel %vm1522_vm10, %v1495_v26, %v1091_v59  ;;  %v653_v36 = vrot.slane %v2914_v60, 2 }
 0x11d   : > { %v1527_v63 = vsel %vm1522_vm10, %v1494_v43, %v1089_v23 }
 0x11e   : > { %v1182_v52 = vpop.permute.xlu1 %1181  ;;  %v3484_v6 = vpop.permute.xlu0 %795  ;;  %v654_v22 = vsel %vm609_vm4, %v652_v39, %v653_v36  ;;  %v656_v59 = vsel %vm609_vm4, %v653_v36, %v655_v18  ;;  %v4663_v39 = vld [vmem:[#allocation9_spill] sm:$0xff] }
 0x11f   : > { %v1560_v50 = vsel %vm1555_vm11, %v1527_v63, %v1182_v52  ;;  %v4659_v63 = vld [vmem:[#allocation8_spill] sm:$0xff]  ;;  %v660_v36 = vrot.slane %v4663_v39, 2 }
 0x120   : > { %1012 = vrot.lane.b32.xlu1 %v649_v58, %s2658_s29  ;;  %1292 = vrot.lane.b32.xlu0 %v651_v28, %s2661_s18  ;;  %v657_v26 = vrot.slane %v4659_v63, 2 }
 0x122   : > { %v896_v16 = vpop.permute.xlu1 %895  ;;  %v1184_v32 = vpop.permute.xlu0 %1183 }
 0x123   : > { %v1561_v8 = vsel %vm1555_vm11, %v1528_v4, %v1184_v32 }
 0x124   : > { %717 = vrot.lane.b32.xlu1 %v649_v58, %s2655_s26  ;;  %1014 = vrot.lane.b32.xlu0 %v651_v28, %s2658_s29 }
 0x126   : > { %v1275_v1 = vpop.permute.xlu1 %1274  ;;  %v898_v45 = vpop.permute.xlu0 %897 }
 0x127   : > { %v1593_v38 = vsel %vm1588_vm12, %v1560_v50, %v1275_v1  ;;  %v4660_v1 = vld [vmem:[#allocation7_spill] sm:$0xff] }
 0x128   : > { %1108 = vrot.lane.b32.xlu1 %v2917_v61, %s2659_s8  ;;  %719 = vrot.lane.b32.xlu0 %v651_v28, %s2655_s26  ;;  %v658_v4 = vrot.slane %v4660_v1, 2 }
 0x129   : > { %2575 = vmatprep.mubr.msk.f32.mxu0 %vm1626_vm13, %v1593_v38  ;;  %v4661_v38 = vld [vmem:[#allocation13_spill] sm:$0xff] }
 0x12a   : > { %v997_v14 = vpop.permute.xlu1 %996  ;;  %v1277_v24 = vpop.permute.xlu0 %1276 }
 0x12b   : > { %v1594_v10 = vsel %vm1588_vm12, %v1561_v8, %v1277_v24  ;;  %v1367_v24 = vsel %vm1359_vm0, %v2802_v47, %v3229_v7  ;;  %v1368_v47 = vsel %vm1359_vm0, %v2799_v46, %v3231_v15 }
 0x12c   : > { %813 = vrot.lane.b32.xlu1 %v2917_v61, %s2656_s27  ;;  %1110 = vrot.lane.b32.xlu0 %v2914_v60, %s2659_s8 }
 0x12d   : > { %2576 = vmatmul.mubr.msk.f32.gmra.mxu0 %vm1626_vm13, %v1594_v10  ;;  %v4662_v10 = vld [vmem:[#allocation15_spill] sm:$0xff] }
 0x12e   : > { %v999_v40 = vpop.permute.xlu1 %998  ;;  %v1093_v55 = vpop.permute.xlu0 %1092 }
 0x130   : > { %1201 = vrot.lane.b32.xlu1 %v2950_v51, %s2660_s17  ;;  %815 = vrot.lane.b32.xlu0 %v2914_v60, %s2656_s27 }
 0x132   : > { %v798_v48 = vpop.permute.xlu1 %797  ;;  %v1095_v44 = vpop.permute.xlu0 %1094 }
 0x134   : > { %915 = vrot.lane.b32.xlu1 %v2950_v51, %s2657_s28  ;;  %1203 = vrot.lane.b32.xlu0 %v2957_v54, %s2660_s17  ;;  %v1397_v51 = vsel %vm1391_vm6, %v1365_v33, %v3341_v42 }
 0x135   : > { %v1430_v28 = vsel %vm1423_vm7, %v1397_v51, %v794_v30 }
 0x136   : > { %v1186_v23 = vpop.permute.xlu1 %1185  ;;  %v3534_v58 = vpop.permute.xlu0 %799  ;;  %v1463_v49 = vsel %vm1456_vm8, %v1430_v28, %v896_v16 }
 0x137   : > { %v1496_v3 = vsel %vm1489_vm9, %v1463_v49, %v997_v14 }
 0x138   : > { %1294 = vrot.lane.b32.xlu1 %v654_v22, %s2661_s18  ;;  %917 = vrot.lane.b32.xlu0 %v2957_v54, %s2657_s28  ;;  %v1398_v54 = vsel %vm1391_vm6, %v1366_v31, %v3347_v11  ;;  %v1529_v42 = vsel %vm1522_vm10, %v1496_v3, %v1093_v55  ;;  %v659_v55 = vsel %vm609_vm4, %v657_v26, %v658_v4 }
 0x139   : > { %v1431_v30 = vsel %vm1423_vm7, %v1398_v54, %v3484_v6  ;;  %v1562_v29 = vsel %vm1555_vm11, %v1529_v42, %v1186_v23  ;;  %v661_v23 = vsel %vm609_vm4, %v658_v4, %v660_v36  ;;  %v4664_v42 = vld [vmem:[#allocation10_spill] sm:$0xff] }
 0x13a   : > { %v900_v52 = vpop.permute.xlu1 %899  ;;  %v1188_v20 = vpop.permute.xlu0 %1187  ;;  %v1464_v25 = vsel %vm1456_vm8, %v1431_v30, %v898_v45 }
 0x13b   : > { %v1497_v34 = vsel %vm1489_vm9, %v1464_v25, %v999_v40  ;;  %v1399_v40 = vsel %vm1391_vm6, %v1367_v24, %v3349_v2  ;;  %v1400_v2 = vsel %vm1391_vm6, %v1368_v47, %v3355_v13 }
 0x13c   : > { %1016 = vrot.lane.b32.xlu1 %v654_v22, %s2658_s29  ;;  %1296 = vrot.lane.b32.xlu0 %v656_v59, %s2661_s18  ;;  %v1530_v11 = vsel %vm1522_vm10, %v1497_v34, %v1095_v44  ;;  %v1432_v44 = vsel %vm1423_vm7, %v1399_v40, %v798_v48  ;;  %v1433_v33 = vsel %vm1423_vm7, %v1400_v2, %v3534_v58 }
 0x13d   : > { %v1563_v6 = vsel %vm1555_vm11, %v1530_v11, %v1188_v20  ;;  %v1465_v18 = vsel %vm1456_vm8, %v1432_v44, %v900_v52 }
 0x13e   : > { %v1279_v16 = vpop.permute.xlu1 %1278  ;;  %v902_v32 = vpop.permute.xlu0 %901 }
 0x13f   : > { %v1595_v53 = vsel %vm1588_vm12, %v1562_v29, %v1279_v16  ;;  %v4665_v16 = vld [vmem:[#allocation11_spill] sm:$0xff] }
 0x140   : > { %721 = vrot.lane.b32.xlu1 %v654_v22, %s2655_s26  ;;  %1018 = vrot.lane.b32.xlu0 %v656_v59, %s2658_s29  ;;  %v663_v34 = vrot.slane %v4665_v16, 2 }
 0x141   : > { %2578 = vmatprep.mubr.msk.f32.mxu0 %vm1626_vm13, %v1595_v53  ;;  %v662_v53 = vrot.slane %v4664_v42, 2 }
 0x142   : > { %v1001_v5 = vpop.permute.xlu1 %1000  ;;  %v1281_v43 = vpop.permute.xlu0 %1280 }
 0x143   : > { %v1596_v17 = vsel %vm1588_vm12, %v1563_v6, %v1281_v43  ;;  %v1498_v7 = vsel %vm1489_vm9, %v1465_v18, %v1001_v5  ;;  %v1369_v5 = vsel %vm1359_vm0, %v2822_v56, %v3237_v12  ;;  %v4666_v43 = vld [vmem:[#allocation18_spill] sm:$0xff]  ;;  %v4668_v12 = vld [vmem:[#allocation3_spill] sm:$0xff] }
 0x144   : > { %1112 = vrot.lane.b32.xlu1 %v4659_v63, %s2659_s8  ;;  %723 = vrot.lane.b32.xlu0 %v656_v59, %s2655_s26  ;;  %v1466_v59 = vsel %vm1456_vm8, %v1433_v33, %v902_v32 }
 0x145   : > { %2579 = vmatmul.mubr.msk.f32.gmra.mxu0 %vm1626_vm13, %v1596_v17  ;;  %v1401_v17 = vsel %vm1391_vm6, %v1369_v5, %v3357_v0  ;;  %v4669_v0 = vld [vmem:[#allocation57_spill] sm:$0xff] }
 0x146   : > { %v1003_v37 = vpop.permute.xlu1 %1002  ;;  %v1097_v50 = vpop.permute.xlu0 %1096 }
 0x147   : > { %v1531_v48 = vsel %vm1522_vm10, %v1498_v7, %v1097_v50  ;;  %v1499_v52 = vsel %vm1489_vm9, %v1466_v59, %v1003_v37  ;;  %v664_v37 = vsel %vm609_vm4, %v662_v53, %v663_v34  ;;  %v4667_v50 = vld [vmem:[#allocation12_spill] sm:$0xff] }
 0x148   : > { %817 = vrot.lane.b32.xlu1 %v4659_v63, %s2656_s27  ;;  %1114 = vrot.lane.b32.xlu0 %v4660_v1, %s2659_s8 }
 0x14a   : > { %v3576_v45 = vpop.permute.xlu1 %801  ;;  %v1099_v21 = vpop.permute.xlu0 %1098 }
 0x14b   : > { %v1532_v13 = vsel %vm1522_vm10, %v1499_v52, %v1099_v21  ;;  %v665_v21 = vrot.slane %v4667_v50, 2  ;;  %v4677_v50 = vld [vmem:[#allocation38_spill] sm:$0xff] }
 0x14c   : > { %1205 = vrot.lane.b32.xlu1 %v4661_v38, %s2660_s17  ;;  %819 = vrot.lane.b32.xlu0 %v4660_v1, %s2656_s27 }
 0x14e   : > { %v1190_v8 = vpop.permute.xlu1 %1189  ;;  %v3584_v14 = vpop.permute.xlu0 %803 }
 0x14f   : > { %v1564_v51 = vsel %vm1555_vm11, %v1531_v48, %v1190_v8 }
 0x150   : > { %919 = vrot.lane.b32.xlu1 %v4661_v38, %s2657_s28  ;;  %1207 = vrot.lane.b32.xlu0 %v4662_v10, %s2660_s17  ;;  %v1434_v38 = vsel %vm1423_vm7, %v1401_v17, %v3576_v45 }
 0x152   : > { %v904_v22 = vpop.permute.xlu1 %903  ;;  %v1192_v9 = vpop.permute.xlu0 %1191 }
 0x153   : > { %v1565_v58 = vsel %vm1555_vm11, %v1532_v13, %v1192_v9  ;;  %v1467_v56 = vsel %vm1456_vm8, %v1434_v38, %v904_v22 }
 0x154   : > { %1298 = vrot.lane.b32.xlu1 %v659_v55, %s2661_s18  ;;  %921 = vrot.lane.b32.xlu0 %v4662_v10, %s2657_s28  ;;  %v666_v10 = vsel %vm609_vm4, %v663_v34, %v665_v21  ;;  %v4676_v34 = vld [vmem:[#allocation17_spill] sm:$0xff] }
 0x155   : > { %v4678_v21 = vld [vmem:[#allocation5_spill] sm:$0xff] }
 0x156   : > { %v1283_v46 = vpop.permute.xlu1 %1282  ;;  %v906_v15 = vpop.permute.xlu0 %905  ;;  %v1372_v38 = vsel %vm1359_vm0, %v4678_v21, %v4677_v50 }
 0x157   : > { %v1597_v28 = vsel %vm1588_vm12, %v1564_v51, %v1283_v46  ;;  %v4671_v46 = vld [vmem:[#allocation16_spill] sm:$0xff] }
 0x158   : > { %1020 = vrot.lane.b32.xlu1 %v659_v55, %s2658_s29  ;;  %1300 = vrot.lane.b32.xlu0 %v661_v23, %s2661_s18  ;;  %v668_v13 = vrot.slane %v4671_v46, 2 }
 0x159   : > { %2581 = vmatprep.mubr.msk.f32.mxu0 %vm1626_vm13, %v1597_v28  ;;  %v4672_v28 = vld [vmem:[#allocation22_spill] sm:$0xff] }
 0x15a   : > { %v1005_v20 = vpop.permute.xlu1 %1004  ;;  %v1285_v49 = vpop.permute.xlu0 %1284 }
 0x15b   : > { %v1598_v31 = vsel %vm1588_vm12, %v1565_v58, %v1285_v49  ;;  %v1500_v8 = vsel %vm1489_vm9, %v1467_v56, %v1005_v20  ;;  %v4673_v49 = vld [vmem:[#allocation37_spill] sm:$0xff] }
 0x15c   : > { %725 = vrot.lane.b32.xlu1 %v659_v55, %s2655_s26  ;;  %1022 = vrot.lane.b32.xlu0 %v661_v23, %s2658_s29 }
 0x15d   : > { %2582 = vmatmul.mubr.msk.f32.gmra.mxu0 %vm1626_vm13, %v1598_v31  ;;  %v4674_v31 = vld [vmem:[#allocation4_spill] sm:$0xff] }
 0x15e   : > { %v3625_v3 = vpop.permute.xlu1 %709  ;;  %v1007_v54 = vpop.permute.xlu0 %1006 }
 0x160   : > { %1116 = vrot.lane.b32.xlu1 %v4664_v42, %s2659_s8  ;;  %727 = vrot.lane.b32.xlu0 %v661_v23, %s2655_s26  ;;  %v4670_v23 = vld [vmem:[#allocation14_spill] sm:$0xff] }
 0x161   : > { %v667_v52 = vrot.slane %v4670_v23, 2 }
 0x162   : > { %v1101_v30 = vpop.permute.xlu1 %1100  ;;  %v3630_v29 = vpop.permute.xlu0 %711 }
 0x163   : > { %v1533_v45 = vsel %vm1522_vm10, %v1500_v8, %v1101_v30  ;;  %v4675_v30 = vld [vmem:[#allocation23_spill] sm:$0xff]  ;;  %v669_v53 = vsel %vm609_vm4, %v667_v52, %v668_v13 }
 0x164   : > { %821 = vrot.lane.b32.xlu1 %v4664_v42, %s2656_s27  ;;  %1118 = vrot.lane.b32.xlu0 %v4665_v16, %s2659_s8 }
 0x166   : > { %v3636_v32 = vpop.permute.xlu1 %805  ;;  %v1103_v25 = vpop.permute.xlu0 %1102 }
 0x168   : > { %1209 = vrot.lane.b32.xlu1 %v3002_v62, %s2660_s17  ;;  %823 = vrot.lane.b32.xlu0 %v4665_v16, %s2656_s27 }
 0x16a   : > { %v1194_v11 = vpop.permute.xlu1 %1193  ;;  %v3644_v6 = vpop.permute.xlu0 %807 }
 0x16b   : > { %v1566_v55 = vsel %vm1555_vm11, %v1533_v45, %v1194_v11  ;;  %v670_v11 = vrot.slane %v4676_v34, 2  ;;  %v4685_v34 = vld [vmem:[#allocation40_spill] sm:$0xff] }
 0x16c   : > { %923 = vrot.lane.b32.xlu1 %v3002_v62, %s2657_s28  ;;  %1211 = vrot.lane.b32.xlu0 %v4666_v43, %s2660_s17  ;;  %v1370_v62 = vsel %vm1359_vm0, %v4668_v12, %v3239_v57 }
 0x16d   : > { %v1402_v24 = vsel %vm1391_vm6, %v1370_v62, %v4669_v0  ;;  %v671_v56 = vsel %vm609_vm4, %v668_v13, %v670_v11  ;;  %v4683_v13 = vld [vmem:[#allocation28_spill] sm:$0xff]  ;;  %v1374_v11 = vsel %vm1359_vm0, %v2871_v27, %v4685_v34 }
 0x16e   : > { %v908_v26 = vpop.permute.xlu1 %907  ;;  %v1196_v4 = vpop.permute.xlu0 %1195  ;;  %v1435_v40 = vsel %vm1423_vm7, %v1402_v24, %v3584_v14 }
 0x16f   : > { %v1468_v36 = vsel %vm1456_vm8, %v1435_v40, %v906_v15 }
 0x170   : > { %1302 = vrot.lane.b32.xlu1 %v664_v37, %s2661_s18  ;;  %925 = vrot.lane.b32.xlu0 %v4666_v43, %s2657_s28  ;;  %v1501_v22 = vsel %vm1489_vm9, %v1468_v36, %v1007_v54  ;;  %v1371_v54 = vsel %vm1359_vm0, %v4674_v31, %v4673_v49  ;;  %v4679_v36 = vld [vmem:[#allocation19_spill] sm:$0xff]  ;;  %v4684_v31 = vld [vmem:[#allocation21_spill] sm:$0xff] }
 0x171   : > { %v1534_v9 = vsel %vm1522_vm10, %v1501_v22, %v1103_v25  ;;  %v1403_v25 = vsel %vm1391_vm6, %v1371_v54, %v3625_v3  ;;  %v1404_v3 = vsel %vm1391_vm6, %v1372_v38, %v3630_v29  ;;  %v675_v54 = vrot.slane %v4684_v31, 2 }
 0x172   : > { %v1287_v57 = vpop.permute.xlu1 %1286  ;;  %v910_v39 = vpop.permute.xlu0 %909  ;;  %v1567_v14 = vsel %vm1555_vm11, %v1534_v9, %v1196_v4  ;;  %v1436_v5 = vsel %vm1423_vm7, %v1403_v25, %v3636_v32  ;;  %v4680_v9 = vld [vmem:[#allocation20_spill] sm:$0xff] }
 0x173   : > { %v1599_v44 = vsel %vm1588_vm12, %v1566_v55, %v1287_v57 }
 0x174   : > { %1024 = vrot.lane.b32.xlu1 %v664_v37, %s2658_s29  ;;  %1304 = vrot.lane.b32.xlu0 %v666_v10, %s2661_s18 }
 0x175   : > { %2584 = vmatprep.mubr.msk.f32.mxu0 %vm1626_vm13, %v1599_v44 }
 0x176   : > { %v1009_v18 = vpop.permute.xlu1 %1008  ;;  %v1289_v47 = vpop.permute.xlu0 %1288 }
 0x177   : > { %v1600_v7 = vsel %vm1588_vm12, %v1567_v14, %v1289_v47  ;;  %v4681_v47 = vld [vmem:[#allocation27_spill] sm:$0xff] }
 0x178   : > { %729 = vrot.lane.b32.xlu1 %v664_v37, %s2655_s26  ;;  %1026 = vrot.lane.b32.xlu0 %v666_v10, %s2658_s29  ;;  %v1469_v37 = vsel %vm1456_vm8, %v1436_v5, %v908_v26  ;;  %v1437_v26 = vsel %vm1423_vm7, %v1404_v3, %v3644_v6 }
 0x179   : > { %2585 = vmatmul.mubr.msk.f32.gmra.mxu0 %vm1626_vm13, %v1600_v7  ;;  %v1502_v4 = vsel %vm1489_vm9, %v1469_v37, %v1009_v18  ;;  %v1470_v0 = vsel %vm1456_vm8, %v1437_v26, %v910_v39  ;;  %v672_v7 = vrot.slane %v4679_v36, 2 }
 0x17a   : > { %v3686_v2 = vpop.permute.xlu1 %713  ;;  %v1011_v48 = vpop.permute.xlu0 %1010 }
 0x17b   : > { %v1503_v45 = vsel %vm1489_vm9, %v1470_v0, %v1011_v48  ;;  %v673_v48 = vrot.slane %v4680_v9, 2 }
 0x17c   : > { %1120 = vrot.lane.b32.xlu1 %v4670_v23, %s2659_s8  ;;  %731 = vrot.lane.b32.xlu0 %v666_v10, %s2655_s26 }
 0x17d   : > { %v674_v49 = vsel %vm609_vm4, %v672_v7, %v673_v48  ;;  %v4689_v7 = vld [vmem:[#allocation41_spill] sm:$0xff] }
 0x17e   : > { %v1105_v33 = vpop.permute.xlu1 %1104  ;;  %v3691_v51 = vpop.permute.xlu0 %715 }
 0x17f   : > { %v1535_v32 = vsel %vm1522_vm10, %v1502_v4, %v1105_v33 }
 0x180   : > { %825 = vrot.lane.b32.xlu1 %v4670_v23, %s2656_s27  ;;  %1122 = vrot.lane.b32.xlu0 %v4671_v46, %s2659_s8 }
 0x182   : > { %v3697_v15 = vpop.permute.xlu1 %809  ;;  %v1107_v59 = vpop.permute.xlu0 %1106 }
 0x183   : > { %v1536_v29 = vsel %vm1522_vm10, %v1503_v45, %v1107_v59 }
 0x184   : > { %1213 = vrot.lane.b32.xlu1 %v4672_v28, %s2660_s17  ;;  %827 = vrot.lane.b32.xlu0 %v4671_v46, %s2656_s27 }
 0x186   : > { %v1198_v58 = vpop.permute.xlu1 %1197  ;;  %v3705_v20 = vpop.permute.xlu0 %811 }
 0x187   : > { %v1568_v12 = vsel %vm1555_vm11, %v1535_v32, %v1198_v58 }
 0x188   : > { %927 = vrot.lane.b32.xlu1 %v4672_v28, %s2657_s28  ;;  %1215 = vrot.lane.b32.xlu0 %v4675_v30, %s2660_s17  ;;  %v4682_v28 = vld [vmem:[#allocation39_spill] sm:$0xff] }
 0x189   : > { %v1373_v52 = vsel %vm1359_vm0, %v2865_v19, %v4682_v28 }
 0x18a   : > { %v912_v43 = vpop.permute.xlu1 %911  ;;  %v1200_v17 = vpop.permute.xlu0 %1199  ;;  %v1405_v58 = vsel %vm1391_vm6, %v1373_v52, %v3686_v2  ;;  %v1406_v2 = vsel %vm1391_vm6, %v1374_v11, %v3691_v51  ;;  %v4690_v52 = vld [vmem:[#allocation33_spill] sm:$0xff] }
 0x18b   : > { %v1569_v6 = vsel %vm1555_vm11, %v1536_v29, %v1200_v17  ;;  %v676_v17 = vsel %vm609_vm4, %v673_v48, %v675_v54  ;;  %v1375_v48 = vsel %vm1359_vm0, %v2879_v35, %v4689_v7  ;;  %v4695_v7 = vld [vmem:[#allocation34_spill] sm:$0xff] }
 0x18c   : > { %1306 = vrot.lane.b32.xlu1 %v669_v53, %s2661_s18  ;;  %929 = vrot.lane.b32.xlu0 %v4675_v30, %s2657_s28  ;;  %v1438_v30 = vsel %vm1423_vm7, %v1405_v58, %v3697_v15 }
 0x18d   : > { %v1471_v19 = vsel %vm1456_vm8, %v1438_v30, %v912_v43  ;;  %v1439_v43 = vsel %vm1423_vm7, %v1406_v2, %v3705_v20 }
 0x18e   : > { %v1291_v62 = vpop.permute.xlu1 %1290  ;;  %v914_v8 = vpop.permute.xlu0 %913 }
 0x18f   : > { %v1601_v24 = vsel %vm1588_vm12, %v1568_v12, %v1291_v62  ;;  %v1472_v21 = vsel %vm1456_vm8, %v1439_v43, %v914_v8  ;;  %v4686_v62 = vld [vmem:[#allocation25_spill] sm:$0xff] }
 0x190   : > { %1028 = vrot.lane.b32.xlu1 %v669_v53, %s2658_s29  ;;  %1308 = vrot.lane.b32.xlu0 %v671_v56, %s2661_s18 }
 0x191   : > { %2587 = vmatprep.mubr.msk.f32.mxu0 %vm1626_vm13, %v1601_v24  ;;  %v4687_v24 = vld [vmem:[#allocation24_spill] sm:$0xff] }
 0x192   : > { %v1013_v10 = vpop.permute.xlu1 %1012  ;;  %v1293_v40 = vpop.permute.xlu0 %1292 }
 0x193   : > { %v1602_v55 = vsel %vm1588_vm12, %v1569_v6, %v1293_v40  ;;  %v1504_v5 = vsel %vm1489_vm9, %v1471_v19, %v1013_v10  ;;  %v4688_v6 = vld [vmem:[#allocation32_spill] sm:$0xff]  ;;  %v677_v40 = vrot.slane %v4686_v62, 2 }
 0x194   : > { %733 = vrot.lane.b32.xlu1 %v669_v53, %s2655_s26  ;;  %1030 = vrot.lane.b32.xlu0 %v671_v56, %s2658_s29 }
 0x195   : > { %2588 = vmatmul.mubr.msk.f32.gmra.mxu0 %vm1626_vm13, %v1602_v55  ;;  %v678_v55 = vrot.slane %v4687_v24, 2 }
 0x196   : > { %v3747_v57 = vpop.permute.xlu1 %717  ;;  %v1015_v39 = vpop.permute.xlu0 %1014 }
 0x197   : > { %v1505_v4 = vsel %vm1489_vm9, %v1472_v21, %v1015_v39  ;;  %v679_v58 = vsel %vm609_vm4, %v677_v40, %v678_v55 }
 0x198   : > { %1124 = vrot.lane.b32.xlu1 %v4679_v36, %s2659_s8  ;;  %735 = vrot.lane.b32.xlu0 %v671_v56, %s2655_s26 }
 0x19a   : > { %v1109_v44 = vpop.permute.xlu1 %1108  ;;  %v3752_v22 = vpop.permute.xlu0 %719 }
 0x19b   : > { %v1537_v15 = vsel %vm1522_vm10, %v1504_v5, %v1109_v44 }
 0x19c   : > { %829 = vrot.lane.b32.xlu1 %v4679_v36, %s2656_s27  ;;  %1126 = vrot.lane.b32.xlu0 %v4680_v9, %s2659_s8 }
 0x19e   : > { %v3758_v14 = vpop.permute.xlu1 %813  ;;  %v1111_v18 = vpop.permute.xlu0 %1110 }
 0x19f   : > { %v1538_v51 = vsel %vm1522_vm10, %v1505_v4, %v1111_v18 }
 0x1a0   : > { %1217 = vrot.lane.b32.xlu1 %v4681_v47, %s2660_s17  ;;  %831 = vrot.lane.b32.xlu0 %v4680_v9, %s2656_s27 }
 0x1a2   : > { %v1202_v33 = vpop.permute.xlu1 %1201  ;;  %v3766_v59 = vpop.permute.xlu0 %815 }
 0x1a3   : > { %v1570_v37 = vsel %vm1555_vm11, %v1537_v15, %v1202_v33 }
 0x1a4   : > { %931 = vrot.lane.b32.xlu1 %v4681_v47, %s2657_s28  ;;  %1219 = vrot.lane.b32.xlu0 %v4683_v13, %s2660_s17 }
 0x1a6   : > { %v916_v25 = vpop.permute.xlu1 %915  ;;  %v1204_v53 = vpop.permute.xlu0 %1203 }
 0x1a7   : > { %v1571_v20 = vsel %vm1555_vm11, %v1538_v51, %v1204_v53  ;;  %v4691_v53 = vld [vmem:[#allocation26_spill] sm:$0xff] }
 0x1a8   : > { %1310 = vrot.lane.b32.xlu1 %v674_v49, %s2661_s18  ;;  %933 = vrot.lane.b32.xlu0 %v4683_v13, %s2657_s28  ;;  %v1407_v13 = vsel %vm1391_vm6, %v1375_v48, %v3747_v57  ;;  %v680_v19 = vrot.slane %v4691_v53, 2  ;;  %v4692_v57 = vld [vmem:[#allocation42_spill] sm:$0xff] }
 0x1a9   : > { %v1440_v35 = vsel %vm1423_vm7, %v1407_v13, %v3758_v14  ;;  %v1376_v11 = vsel %vm1359_vm0, %v2888_v41, %v4692_v57 }
 0x1aa   : > { %v1295_v27 = vpop.permute.xlu1 %1294  ;;  %v3796_v50 = vpop.permute.xlu0 %917  ;;  %v1473_v34 = vsel %vm1456_vm8, %v1440_v35, %v916_v25  ;;  %v1408_v5 = vsel %vm1391_vm6, %v1376_v11, %v3752_v22  ;;  %v681_v41 = vsel %vm609_vm4, %v678_v55, %v680_v19  ;;  %v4696_v35 = vld [vmem:[#allocation43_spill] sm:$0xff] }
 0x1ab   : > { %v1603_v38 = vsel %vm1588_vm12, %v1570_v37, %v1295_v27  ;;  %v1441_v2 = vsel %vm1423_vm7, %v1408_v5, %v3766_v59  ;;  %v4698_v11 = vld [vmem:[#allocation31_spill] sm:$0xff]  ;;  %v4699_v5 = vld [vmem:[#allocation44_spill] sm:$0xff] }
 0x1ac   : > { %1032 = vrot.lane.b32.xlu1 %v674_v49, %s2658_s29  ;;  %1312 = vrot.lane.b32.xlu0 %v676_v17, %s2661_s18  ;;  %v1474_v37 = vsel %vm1456_vm8, %v1441_v2, %v3796_v50 }
 0x1ad   : > { %2590 = vmatprep.mubr.msk.f32.mxu0 %vm1626_vm13, %v1603_v38 }
 0x1ae   : > { %v1017_v3 = vpop.permute.xlu1 %1016  ;;  %v1297_v32 = vpop.permute.xlu0 %1296 }
 0x1af   : > { %v1604_v56 = vsel %vm1588_vm12, %v1571_v20, %v1297_v32  ;;  %v1506_v14 = vsel %vm1489_vm9, %v1473_v34, %v1017_v3  ;;  %v4693_v3 = vld [vmem:[#allocation30_spill] sm:$0xff] }
 0x1b0   : > { %737 = vrot.lane.b32.xlu1 %v674_v49, %s2655_s26  ;;  %1034 = vrot.lane.b32.xlu0 %v676_v17, %s2658_s29  ;;  %v682_v48 = vrot.slane %v4693_v3, 2 }
 0x1b1   : > { %2591 = vmatmul.mubr.msk.f32.gmra.mxu0 %vm1626_vm13, %v1604_v56 }
 0x1b2   : > { %v3810_v26 = vpop.permute.xlu1 %721  ;;  %v1019_v12 = vpop.permute.xlu0 %1018 }
 0x1b3   : > { %v1507_v21 = vsel %vm1489_vm9, %v1474_v37, %v1019_v12  ;;  %v245_v37 = vld [vmem:[%s2707_s22 + $0xf0] sm:$0xff] }
 0x1b4   : > { %1128 = vrot.lane.b32.xlu1 %v4686_v62, %s2659_s8  ;;  %739 = vrot.lane.b32.xlu0 %v676_v17, %s2655_s26 }
 0x1b6   : > { %v1113_v8 = vpop.permute.xlu1 %1112  ;;  %v3815_v0 = vpop.permute.xlu0 %723 }
 0x1b7   : > { %v1539_v25 = vsel %vm1522_vm10, %v1506_v14, %v1113_v8  ;;  %v4694_v8 = vld [vmem:[#allocation29_spill] sm:$0xff] }
 0x1b8   : > { %833 = vrot.lane.b32.xlu1 %v4686_v62, %s2656_s27  ;;  %1130 = vrot.lane.b32.xlu0 %v4687_v24, %s2659_s8 }
 0x1ba   : > { %v3821_v45 = vpop.permute.xlu1 %817  ;;  %v1115_v29 = vpop.permute.xlu0 %1114 }
 0x1bb   : > { %v1540_v22 = vsel %vm1522_vm10, %v1507_v21, %v1115_v29  ;;  %v246_v21 = vld [vmem:[%s2707_s22 + $0xf8] sm:$0xff] }
 0x1bc   : > { %1221 = vrot.lane.b32.xlu1 %v4688_v6, %s2660_s17  ;;  %835 = vrot.lane.b32.xlu0 %v4687_v24, %s2656_s27 }
 0x1bd   : > { %v3827_v10 = vpop.f32.mrf.mxu0 }
 0x1be   : > { %v1985_v39 = vrot.slane %v3827_v10, 7  ;;  %v1206_v44 = vpop.permute.xlu1 %1205  ;;  %v3832_v18 = vpop.permute.xlu0 %819 }
 0x1bf   : > { %v3834_v47 = vpop.f32.mrf.mxu0  ;;  %v1572_v15 = vsel %vm1555_vm11, %v1539_v25, %v1206_v44 }
 0x1c0   : > { %v2096_v33 = vsel %vm279_vm2, %v1985_v39, 0.0  ;;  %v1984_v28 = vrot.slane %v3834_v47, 7  ;;  %935 = vrot.lane.b32.xlu1 %v4688_v6, %s2657_s28  ;;  %1223 = vrot.lane.b32.xlu0 %v4690_v52, %s2660_s17 }
 0x1c1   : > { %2118 = vst.msk [vmem:[%s2712_s25 + $0x28] sm:$0x3] %vm2114_vm1, %v2096_v33  ;;  %v683_v33 = vrot.slane %v4694_v8, 2 }
 0x1c2   : > { %v1986_v49 = vsel %vm279_vm2, %v1984_v28, %v1985_v39  ;;  %v2080_v31 = vsel %vm279_vm2, 0.0, %v1984_v28  ;;  %v3854_v54 = vpop.permute.xlu1 %919  ;;  %v1208_v30 = vpop.permute.xlu0 %1207 }
 0x1c3   : > { %2116 = vst.msk [vmem:[%s2712_s25 + $0x18] sm:$0xff] %vm1359_vm0, %v2080_v31  ;;  %2117 = vst.msk [vmem:[%s2712_s25 + $0x20] sm:$0xff] %vm1359_vm0, %v1986_v49  ;;  %v1573_v59 = vsel %vm1555_vm11, %v1540_v22, %v1208_v30  ;;  %v1377_v49 = vsel %vm1359_vm0, %v2917_v61, %v4696_v35  ;;  %v4697_v30 = vld [vmem:[#allocation35_spill] sm:$0xff]  ;;  %v684_v53 = vsel %vm609_vm4, %v682_v48, %v683_v33  ;;  %v685_v61 = vrot.slane %v4698_v11, 2 }
 0x1c4   : > { %1314 = vrot.lane.b32.xlu1 %v679_v58, %s2661_s18  ;;  %937 = vrot.lane.b32.xlu0 %v4690_v52, %s2657_s28  ;;  %v1409_v31 = vsel %vm1391_vm6, %v1377_v49, %v3810_v26  ;;  %v1378_v26 = vsel %vm1359_vm0, %v2914_v60, %v4699_v5 }
 0x1c5   : > { %v1442_v19 = vsel %vm1423_vm7, %v1409_v31, %v3821_v45  ;;  %v1410_v45 = vsel %vm1391_vm6, %v1378_v26, %v3815_v0  ;;  %v686_v60 = vsel %vm609_vm4, %v683_v33, %v685_v61 }
 0x1c6   : > { %v1299_v17 = vpop.permute.xlu1 %1298  ;;  %v3875_v43 = vpop.permute.xlu0 %921  ;;  %v1475_v14 = vsel %vm1456_vm8, %v1442_v19, %v3854_v54 }
 0x1c7   : > { %v1605_v27 = vsel %vm1588_vm12, %v1572_v15, %v1299_v17  ;;  %v1443_v15 = vsel %vm1423_vm7, %v1410_v45, %v3832_v18 }
 0x1c8   : > { %1036 = vrot.lane.b32.xlu1 %v679_v58, %s2658_s29  ;;  %2593 = vmatprep.mubr.msk.f32.mxu1 %vm1626_vm13, %v1605_v27  ;;  %v1476_v27 = vsel %vm1456_vm8, %v1443_v15, %v3875_v43 }
 0x1c9   : > { %1316 = vrot.lane.b32.xlu0 %v681_v41, %s2661_s18 }
 0x1ca   : > { %v1021_v38 = vpop.permute.xlu1 %1020  ;;  %v1301_v4 = vpop.permute.xlu0 %1300 }
 0x1cb   : > { %v1606_v51 = vsel %vm1588_vm12, %v1573_v59, %v1301_v4  ;;  %v1508_v25 = vsel %vm1489_vm9, %v1475_v14, %v1021_v38  ;;  %v325_v59 = vrot.slane %v245_v37, 7 }
 0x1cc   : > { %741 = vrot.lane.b32.xlu1 %v679_v58, %s2655_s26  ;;  %2594 = vmatmul.mubr.msk.f32.vlgmr.msra.gmra.mxu1 %vm1626_vm13, %v1606_v51 }
 0x1cd   : > { %1038 = vrot.lane.b32.xlu0 %v681_v41, %s2658_s29 }
 0x1ce   : > { %v3891_v50 = vpop.permute.xlu1 %725  ;;  %v1023_v20 = vpop.permute.xlu0 %1022 }
 0x1cf   : > { %v1509_v22 = vsel %vm1489_vm9, %v1476_v27, %v1023_v20  ;;  %v390_v20 = vsel %vm279_vm2, 0.0, %v325_v59 }
 0x1d0   : > { %1132 = vrot.lane.b32.xlu1 %v4693_v3, %s2659_s8  ;;  %v979_v14 = vrot.slane %v390_v20, 2 }
 0x1d1   : > { %743 = vrot.lane.b32.xlu0 %v681_v41, %s2655_s26 }
 0x1d2   : > { %v1117_v32 = vpop.permute.xlu1 %1116  ;;  %v3896_v56 = vpop.permute.xlu0 %727 }
 0x1d3   : > { %v1541_v2 = vsel %vm1522_vm10, %v1508_v25, %v1117_v32  ;;  %v326_v32 = vrot.slane %v246_v21, 7 }
 0x1d4   : > { %837 = vrot.lane.b32.xlu1 %v4693_v3, %s2656_s27 }
 0x1d5   : > { %v3900_v12 = vpop.f32.mrf.mxu0  ;;  %1134 = vrot.lane.b32.xlu0 %v4694_v8, %s2659_s8  ;;  %v406_v35 = vsel %vm279_vm2, %v326_v32, 0.0 }
 0x1d6   : > { %v1988_v29 = vrot.slane %v3900_v12, 7  ;;  %v3905_v6 = vpop.permute.xlu1 %821  ;;  %v1119_v40 = vpop.permute.xlu0 %1118  ;;  %v881_v61 = vrot.slane %v406_v35, 1 }
 0x1d7   : > { %v3907_v55 = vpop.f32.mrf.mxu0  ;;  %v1542_v18 = vsel %vm1522_vm10, %v1509_v22, %v1119_v40  ;;  %v4701_v22 = vld [vmem:[#allocation46_spill] sm:$0xff] }
 0x1d8   : > { %v2097_v39 = vsel %vm279_vm2, %v1988_v29, 0.0  ;;  %v1987_v44 = vrot.slane %v3907_v55, 7  ;;  %1225 = vrot.lane.b32.xlu1 %v4695_v7, %s2660_s17 }
 0x1d9   : > { %2121 = vst.msk [vmem:[%s2712_s25 + $0x40] sm:$0x3] %vm2114_vm1, %v2097_v39  ;;  %839 = vrot.lane.b32.xlu0 %v4694_v8, %s2656_s27  ;;  %v327_v39 = vsel %vm279_vm2, %v325_v59, %v326_v32 }
 0x1da   : > { %v1989_v28 = vsel %vm279_vm2, %v1987_v44, %v1988_v29  ;;  %v2081_v52 = vsel %vm279_vm2, 0.0, %v1987_v44  ;;  %v1210_v13 = vpop.permute.xlu1 %1209  ;;  %v3921_v58 = vpop.permute.xlu0 %823  ;;  %v878_v44 = vrot.slane %v390_v20, 1  ;;  %v879_v48 = vrot.slane %v327_v39, 1 }
 0x1db   : > { %2119 = vst.msk [vmem:[%s2712_s25 + $0x30] sm:$0xff] %vm1359_vm0, %v2081_v52  ;;  %2120 = vst.msk [vmem:[%s2712_s25 + $0x38] sm:$0xff] %vm1359_vm0, %v1989_v28  ;;  %v1574_v54 = vsel %vm1555_vm11, %v1541_v2, %v1210_v13  ;;  %v980_v5 = vrot.slane %v327_v39, 2  ;;  %v4700_v2 = vld [vmem:[#allocation45_spill] sm:$0xff] }
 0x1dc   : > { %939 = vrot.lane.b32.xlu1 %v4695_v7, %s2657_s28  ;;  %v882_v45 = vsel %vm438_vm3, %v879_v48, %v881_v61  ;;  %v1379_v15 = vsel %vm1359_vm0, %v4659_v63, %v4700_v2  ;;  %v1380_v63 = vsel %vm1359_vm0, %v4660_v1, %v4701_v22  ;;  %v4706_v22 = vld [vmem:[#allocation48_spill] sm:$0xff] }
 0x1dd   : > { %1227 = vrot.lane.b32.xlu0 %v4697_v30, %s2660_s17 }
 0x1de   : > { %v3939_v34 = vpop.permute.xlu1 %923  ;;  %v1212_v57 = vpop.permute.xlu0 %1211 }
 0x1df   : > { %v1575_v38 = vsel %vm1555_vm11, %v1542_v18, %v1212_v57 }
 0x1e0   : > { %1318 = vrot.lane.b32.xlu1 %v684_v53, %s2661_s18 }
 0x1e1   : > { %941 = vrot.lane.b32.xlu0 %v4697_v30, %s2657_s28  ;;  %v880_v30 = vsel %vm438_vm3, %v878_v44, %v879_v48 }
 0x1e2   : > { %v1303_v17 = vpop.permute.xlu1 %1302  ;;  %v3957_v41 = vpop.permute.xlu0 %925 }
 0x1e3   : > { %v1607_v0 = vsel %vm1588_vm12, %v1574_v54, %v1303_v17  ;;  %v1411_v54 = vsel %vm1391_vm6, %v1379_v15, %v3891_v50  ;;  %v981_v17 = vsel %vm609_vm4, %v979_v14, %v980_v5  ;;  %v1412_v50 = vsel %vm1391_vm6, %v1380_v63, %v3896_v56  ;;  %v4705_v15 = vld [vmem:[#allocation47_spill] sm:$0xff] }
 0x1e4   : > { %1040 = vrot.lane.b32.xlu1 %v684_v53, %s2658_s29  ;;  %2596 = vmatprep.mubr.msk.f32.mxu1 %vm1626_vm13, %v1607_v0  ;;  %v982_v0 = vrot.slane %v406_v35, 2  ;;  %v1382_v63 = vsel %vm1359_vm0, %v4665_v16, %v4706_v22 }
 0x1e5   : > { %1320 = vrot.lane.b32.xlu0 %v686_v60, %s2661_s18 }
 0x1e6   : > { %v1025_v4 = vpop.permute.xlu1 %1024  ;;  %v1305_v51 = vpop.permute.xlu0 %1304  ;;  %v983_v1 = vsel %vm609_vm4, %v980_v5, %v982_v0 }
 0x1e7   : > { %v1608_v43 = vsel %vm1588_vm12, %v1575_v38, %v1305_v51 }
 0x1e8   : > { %745 = vrot.lane.b32.xlu1 %v684_v53, %s2655_s26  ;;  %2597 = vmatmul.mubr.msk.f32.gmra.mxu1 %vm1626_vm13, %v1608_v43 }
 0x1e9   : > { %1042 = vrot.lane.b32.xlu0 %v686_v60, %s2658_s29 }
 0x1ea   : > { %v3976_v29 = vpop.permute.xlu1 %729  ;;  %v1027_v40 = vpop.permute.xlu0 %1026 }
 0x1ec   : > { %1136 = vrot.lane.b32.xlu1 %v390_v20, %s2659_s8 }
 0x1ed   : > { %v3980_v7 = vpop.f32.mrf.mxu0  ;;  %747 = vrot.lane.b32.xlu0 %v686_v60, %s2655_s26  ;;  %v1444_v60 = vsel %vm1423_vm7, %v1411_v54, %v3905_v6  ;;  %v1445_v6 = vsel %vm1423_vm7, %v1412_v50, %v3921_v58  ;;  %v1381_v54 = vsel %vm1359_vm0, %v4664_v42, %v4705_v15 }
 0x1ee   : > { %v1991_v33 = vrot.slane %v3980_v7, 7  ;;  %v1121_v28 = vpop.permute.xlu1 %1120  ;;  %v3984_v52 = vpop.permute.xlu0 %731  ;;  %v1477_v21 = vsel %vm1456_vm8, %v1444_v60, %v3939_v34 }
 0x1ef   : > { %v3986_v13 = vpop.f32.mrf.mxu0  ;;  %v1510_v18 = vsel %vm1489_vm9, %v1477_v21, %v1025_v4  ;;  %v1478_v4 = vsel %vm1456_vm8, %v1445_v6, %v3957_v41  ;;  %v1414_v50 = vsel %vm1391_vm6, %v1382_v63, %v3984_v52 }
 0x1f0   : > { %v2098_v49 = vsel %vm279_vm2, %v1991_v33, 0.0  ;;  %v1990_v31 = vrot.slane %v3986_v13, 7  ;;  %841 = vrot.lane.b32.xlu1 %v390_v20, %s2656_s27  ;;  %v1543_v59 = vsel %vm1522_vm10, %v1510_v18, %v1121_v28  ;;  %v1511_v56 = vsel %vm1489_vm9, %v1478_v4, %v1027_v40 }
 0x1f1   : > { %2124 = vst.msk [vmem:[%s2712_s25 + $0x58] sm:$0x3] %vm2114_vm1, %v2098_v49  ;;  %1138 = vrot.lane.b32.xlu0 %v327_v39, %s2659_s8  ;;  %v4702_v40 = vmov 0.0  }
 0x1f2   : > { %v1992_v53 = vsel %vm279_vm2, %v1990_v31, %v1991_v33  ;;  %v2082_v19 = vsel %vm279_vm2, 0.0, %v1990_v31  ;;  %v3998_v57 = vpop.permute.xlu1 %825  ;;  %v1123_v11 = vpop.permute.xlu0 %1122 }
 0x1f3   : > { %2122 = vst.msk [vmem:[%s2712_s25 + $0x48] sm:$0xff] %vm1359_vm0, %v2082_v19  ;;  %2123 = vst.msk [vmem:[%s2712_s25 + $0x50] sm:$0xff] %vm1359_vm0, %v1992_v53  ;;  %v1544_v43 = vsel %vm1522_vm10, %v1511_v56, %v1123_v11  ;;  %v4704_v53 = vld [vmem:[#allocation36_spill] sm:$0xff] }
 0x1f4   : > { %1229 = vrot.lane.b32.xlu1 %v880_v30, %s2660_s17 }
 0x1f5   : > { %843 = vrot.lane.b32.xlu0 %v327_v39, %s2656_s27 }
 0x1f6   : > { %v1214_v26 = vpop.permute.xlu1 %1213  ;;  %v4006_v25 = vpop.permute.xlu0 %827 }
 0x1f7   : > { %v1576_v34 = vsel %vm1555_vm11, %v1543_v59, %v1214_v26 }
 0x1f8   : > { %943 = vrot.lane.b32.xlu1 %v880_v30, %s2657_s28  ;;  %v4703_v30 = vld [vmem:[#allocation2_spill] sm:$0xff] }
 0x1f9   : > { %1231 = vrot.lane.b32.xlu0 %v882_v45, %s2660_s17 }
 0x1fa   : > { %v928_v37 = vpop.permute.xlu1 %927  ;;  %v1216_v27 = vpop.permute.xlu0 %1215 }
 0x1fb   : > { %v1577_v58 = vsel %vm1555_vm11, %v1544_v43, %v1216_v27 }
 0x1fc   : > { %1322 = vrot.lane.b32.xlu1 %v981_v17, %s2661_s18 }
 0x1fd   : > { %945 = vrot.lane.b32.xlu0 %v882_v45, %s2657_s28 }
 0x1fe   : > { %v1307_v38 = vpop.permute.xlu1 %1306  ;;  %v930_v51 = vpop.permute.xlu0 %929 }
 0x1ff   : > { %v1609_v32 = vsel %vm1588_vm12, %v1576_v34, %v1307_v38 }
 0x200   : > { %1044 = vrot.lane.b32.xlu1 %v981_v17, %s2658_s29  ;;  %2599 = vmatprep.mubr.msk.f32.mxu1 %vm1626_vm13, %v1609_v32  ;;  %v1413_v17 = vsel %vm1391_vm6, %v1381_v54, %v3976_v29  ;;  %v1447_v29 = vsel %vm1423_vm7, %v1414_v50, %v4006_v25 }
 0x201   : > { %1324 = vrot.lane.b32.xlu0 %v983_v1, %s2661_s18  ;;  %v1446_v60 = vsel %vm1423_vm7, %v1413_v17, %v3998_v57 }
 0x202   : > { %v1029_v20 = vpop.permute.xlu1 %1028  ;;  %v1309_v39 = vpop.permute.xlu0 %1308  ;;  %v1479_v21 = vsel %vm1456_vm8, %v1446_v60, %v928_v37  ;;  %v1480_v37 = vsel %vm1456_vm8, %v1447_v29, %v930_v51  ;;  %v4708_v60 = vld [vmem:[#allocation50_spill] sm:$0xff] }
 0x203   : > { %v1610_v44 = vsel %vm1588_vm12, %v1577_v58, %v1309_v39  ;;  %v1512_v18 = vsel %vm1489_vm9, %v1479_v21, %v1029_v20 }
 0x204   : > { %1046 = vrot.lane.b32.xlu1 %v983_v1, %s2658_s29  ;;  %2600 = vmatmul.mubr.msk.f32.gmra.mxu1 %vm1626_vm13, %v1610_v44 }
 0x205   : > { %v4046_v41 = vpop.f32.mrf.mxu0  ;;  %1140 = vrot.lane.b32.xlu0 %v4702_v40, %s2659_s8 }
 0x206   : > { %v1994_v48 = vrot.slane %v4046_v41, 7  ;;  %v734_v33 = vpop.permute.xlu1 %733  ;;  %v1031_v28 = vpop.permute.xlu0 %1030 }
 0x207   : > { %v4051_v35 = vpop.f32.mrf.mxu0  ;;  %v1513_v16 = vsel %vm1489_vm9, %v1480_v37, %v1031_v28 }
 0x208   : > { %v2099_v49 = vsel %vm279_vm2, %v1994_v48, 0.0  ;;  %v1993_v31 = vrot.slane %v4051_v35, 7  ;;  %1233 = vrot.lane.b32.xlu1 %v4703_v30, %s2660_s17 }
 0x209   : > { %2127 = vst.msk [vmem:[%s2712_s25 + $0x70] sm:$0x3] %vm2114_vm1, %v2099_v49  ;;  %1326 = vrot.lane.b32.xlu0 %v4704_v53, %s2661_s18 }
 0x20a   : > { %v1995_v19 = vsel %vm279_vm2, %v1993_v31, %v1994_v48  ;;  %v2083_v11 = vsel %vm279_vm2, 0.0, %v1993_v31  ;;  %v1125_v61 = vpop.permute.xlu1 %1124  ;;  %v736_v14 = vpop.permute.xlu0 %735 }
 0x20b   : > { %2125 = vst.msk [vmem:[%s2712_s25 + $0x60] sm:$0xff] %vm1359_vm0, %v2083_v11  ;;  %2126 = vst.msk [vmem:[%s2712_s25 + $0x68] sm:$0xff] %vm1359_vm0, %v1995_v19  ;;  %v1545_v42 = vsel %vm1522_vm10, %v1512_v18, %v1125_v61  ;;  %v4707_v19 = vld [vmem:[#allocation49_spill] sm:$0xff] }
 0x20c   : > { %v1383_v11 = vsel %vm1359_vm0, %v4670_v23, %v4707_v19 }
 0x20d   : > { %v1415_v61 = vsel %vm1391_vm6, %v1383_v11, %v734_v33 }
 0x20e   : > { %v830_v5 = vpop.permute.xlu1 %829  ;;  %v1127_v26 = vpop.permute.xlu0 %1126 }
 0x20f   : > { %v1546_v52 = vsel %vm1522_vm10, %v1513_v16, %v1127_v26  ;;  %v1448_v26 = vsel %vm1423_vm7, %v1415_v61, %v830_v5 }
 0x212   : > { %v1218_v45 = vpop.permute.xlu1 %1217  ;;  %v832_v2 = vpop.permute.xlu0 %831 }
 0x213   : > { %v1578_v57 = vsel %vm1555_vm11, %v1545_v42, %v1218_v45 }
 0x216   : > { %v932_v27 = vpop.permute.xlu1 %931  ;;  %v1220_v0 = vpop.permute.xlu0 %1219 }
 0x217   : > { %v1579_v25 = vsel %vm1555_vm11, %v1546_v52, %v1220_v0  ;;  %v1481_v54 = vsel %vm1456_vm8, %v1448_v26, %v932_v27  ;;  %v1384_v0 = vsel %vm1359_vm0, %v4671_v46, %v4708_v60  ;;  %v4710_v26 = vld [vmem:[#allocation52_spill] sm:$0xff] }
 0x218   : > { %v1416_v22 = vsel %vm1391_vm6, %v1384_v0, %v736_v14 }
 0x219   : > { %v1449_v5 = vsel %vm1423_vm7, %v1416_v22, %v832_v2 }
 0x21a   : > { %v1311_v59 = vpop.permute.xlu1 %1310  ;;  %v934_v6 = vpop.permute.xlu0 %933 }
 0x21b   : > { %v1611_v34 = vsel %vm1588_vm12, %v1578_v57, %v1311_v59  ;;  %v1482_v27 = vsel %vm1456_vm8, %v1449_v5, %v934_v6 }
 0x21c   : > { %2602 = vmatprep.mubr.msk.f32.mxu1 %vm1626_vm13, %v1611_v34 }
 0x21d   : > { %v4090_v38 = vpop.f32.mrf.mxu0 }
 0x21e   : > { %v1997_v1 = vrot.slane %v4090_v38, 7  ;;  %v1033_v4 = vpop.permute.xlu1 %1032  ;;  %v1313_v32 = vpop.permute.xlu0 %1312 }
 0x21f   : > { %v4094_v56 = vpop.f32.mrf.mxu0  ;;  %v1612_v51 = vsel %vm1588_vm12, %v1579_v25, %v1313_v32  ;;  %v1514_v17 = vsel %vm1489_vm9, %v1481_v54, %v1033_v4 }
 0x220   : > { %v2100_v43 = vsel %vm279_vm2, %v1997_v1, 0.0  ;;  %v1996_v58 = vrot.slane %v4094_v56, 7  ;;  %2603 = vmatmul.mubr.msk.f32.gmra.mxu1 %vm1626_vm13, %v1612_v51 }
 0x221   : > { %2130 = vst.msk [vmem:[%s2712_s25 + $0x88] sm:$0x3] %vm2114_vm1, %v2100_v43 }
 0x222   : > { %v1998_v20 = vsel %vm279_vm2, %v1996_v58, %v1997_v1  ;;  %v2084_v39 = vsel %vm279_vm2, 0.0, %v1996_v58  ;;  %v738_v44 = vpop.permute.xlu1 %737  ;;  %v1035_v40 = vpop.permute.xlu0 %1034 }
 0x223   : > { %2128 = vst.msk [vmem:[%s2712_s25 + $0x78] sm:$0xff] %vm1359_vm0, %v2084_v39  ;;  %2129 = vst.msk [vmem:[%s2712_s25 + $0x80] sm:$0xff] %vm1359_vm0, %v1998_v20  ;;  %v1515_v50 = vsel %vm1489_vm9, %v1482_v27, %v1035_v40  ;;  %v4709_v39 = vld [vmem:[#allocation51_spill] sm:$0xff] }
 0x224   : > { %v1385_v40 = vsel %vm1359_vm0, %v4679_v36, %v4709_v39 }
 0x226   : > { %v1129_v48 = vpop.permute.xlu1 %1128  ;;  %v740_v28 = vpop.permute.xlu0 %739 }
 0x227   : > { %v1547_v21 = vsel %vm1522_vm10, %v1514_v17, %v1129_v48  ;;  %v1417_v48 = vsel %vm1391_vm6, %v1385_v40, %v738_v44 }
 0x22a   : > { %v834_v49 = vpop.permute.xlu1 %833  ;;  %v1131_v31 = vpop.permute.xlu0 %1130 }
 0x22b   : > { %v1548_v14 = vsel %vm1522_vm10, %v1515_v50, %v1131_v31  ;;  %v1450_v31 = vsel %vm1423_vm7, %v1417_v48, %v834_v49 }
 0x22e   : > { %v1222_v30 = vpop.permute.xlu1 %1221  ;;  %v836_v53 = vpop.permute.xlu0 %835 }
 0x22f   : > { %v1580_v23 = vsel %vm1555_vm11, %v1547_v21, %v1222_v30 }
 0x232   : > { %v936_v45 = vpop.permute.xlu1 %935  ;;  %v1224_v15 = vpop.permute.xlu0 %1223 }
 0x233   : > { %v1581_v57 = vsel %vm1555_vm11, %v1548_v14, %v1224_v15  ;;  %v1483_v19 = vsel %vm1456_vm8, %v1450_v31, %v936_v45  ;;  %v1386_v15 = vsel %vm1359_vm0, %v4680_v9, %v4710_v26  ;;  %v4712_v31 = vld [vmem:[#allocation54_spill] sm:$0xff] }
 0x234   : > { %v1418_v17 = vsel %vm1391_vm6, %v1386_v15, %v740_v28 }
 0x235   : > { %v1451_v44 = vsel %vm1423_vm7, %v1418_v17, %v836_v53 }
 0x236   : > { %v1315_v63 = vpop.permute.xlu1 %1314  ;;  %v938_v33 = vpop.permute.xlu0 %937 }
 0x237   : > { %v1613_v18 = vsel %vm1588_vm12, %v1580_v23, %v1315_v63  ;;  %v1484_v0 = vsel %vm1456_vm8, %v1451_v44, %v938_v33 }
 0x238   : > { %2605 = vmatprep.mubr.msk.f32.mxu1 %vm1626_vm13, %v1613_v18 }
 0x239   : > { %v4126_v46 = vpop.f32.mrf.mxu0 }
 0x23a   : > { %v2000_v42 = vrot.slane %v4126_v46, 7  ;;  %v1037_v29 = vpop.permute.xlu1 %1036 }
 0x23b   : > { %v4131_v2 = vpop.f32.mrf.mxu0  ;;  %v1317_v59 = vpop.permute.xlu0 %1316  ;;  %v1516_v61 = vsel %vm1489_vm9, %v1483_v19, %v1037_v29  ;;  %v1388_v19 = vsel %vm1359_vm0, %v4687_v24, %v4712_v31 }
 0x23c   : > { %v2101_v6 = vsel %vm279_vm2, %v2000_v42, 0.0  ;;  %v1999_v37 = vrot.slane %v4131_v2, 7  ;;  %v1614_v34 = vsel %vm1588_vm12, %v1581_v57, %v1317_v59 }
 0x23d   : > { %2133 = vst.msk [vmem:[%s2712_s25 + $0xa0] sm:$0x3] %vm2114_vm1, %v2101_v6  ;;  %2606 = vmatmul.mubr.msk.f32.gmra.mxu1 %vm1626_vm13, %v1614_v34 }
 0x23e   : > { %v2001_v16 = vsel %vm279_vm2, %v1999_v37, %v2000_v42  ;;  %v2085_v52 = vsel %vm279_vm2, 0.0, %v1999_v37  ;;  %v742_v25 = vpop.permute.xlu1 %741 }
 0x23f   : > { %2131 = vst.msk [vmem:[%s2712_s25 + $0x90] sm:$0xff] %vm1359_vm0, %v2085_v52  ;;  %2132 = vst.msk [vmem:[%s2712_s25 + $0x98] sm:$0xff] %vm1359_vm0, %v2001_v16  ;;  %v1039_v1 = vpop.permute.xlu0 %1038  ;;  %v4711_v52 = vld [vmem:[#allocation53_spill] sm:$0xff] }
 0x240   : > { %v1517_v21 = vsel %vm1489_vm9, %v1484_v0, %v1039_v1  ;;  %v1387_v1 = vsel %vm1359_vm0, %v4686_v62, %v4711_v52 }
 0x242   : > { %v1133_v4 = vpop.permute.xlu1 %1132 }
 0x243   : > { %v744_v32 = vpop.permute.xlu0 %743  ;;  %v1549_v54 = vsel %vm1522_vm10, %v1516_v61, %v1133_v4  ;;  %v1419_v4 = vsel %vm1391_vm6, %v1387_v1, %v742_v25 }
 0x244   : > { %v1420_v61 = vsel %vm1391_vm6, %v1388_v19, %v744_v32 }
 0x246   : > { %v838_v51 = vpop.permute.xlu1 %837 }
 0x247   : > { %v1135_v43 = vpop.permute.xlu0 %1134 }
 0x248   : > { %v1550_v28 = vsel %vm1522_vm10, %v1517_v21, %v1135_v43  ;;  %v1452_v43 = vsel %vm1423_vm7, %v1419_v4, %v838_v51 }
 0x24a   : > { %v1226_v58 = vpop.permute.xlu1 %1225 }
 0x24b   : > { %v840_v20 = vpop.permute.xlu0 %839  ;;  %v1582_v36 = vsel %vm1555_vm11, %v1549_v54, %v1226_v58 }
 0x24c   : > { %v1453_v25 = vsel %vm1423_vm7, %v1420_v61, %v840_v20 }
 0x24e   : > { %v940_v30 = vpop.permute.xlu1 %939 }
 0x24f   : > { %v1228_v11 = vpop.permute.xlu0 %1227  ;;  %v1485_v39 = vsel %vm1456_vm8, %v1452_v43, %v940_v30 }
 0x250   : > { %v1583_v53 = vsel %vm1555_vm11, %v1550_v28, %v1228_v11 }
 0x252   : > { %v1319_v60 = vpop.permute.xlu1 %1318 }
 0x253   : > { %v1615_v49 = vsel %vm1588_vm12, %v1582_v36, %v1319_v60  ;;  %v942_v45 = vpop.permute.xlu0 %941  ;;  %v4713_v60 = vld [vmem:[#allocation56_spill] sm:$0xff] }
 0x254   : > { %2608 = vmatprep.mubr.msk.f32.mxu1 %vm1626_vm13, %v1615_v49  ;;  %v1486_v30 = vsel %vm1456_vm8, %v1453_v25, %v942_v45  ;;  %v1390_v20 = vsel %vm1359_vm0, %v4694_v8, %v4713_v60 }
 0x255   : > { %v4163_v9 = vpop.f32.mrf.mxu0 }
 0x256   : > { %v2003_v22 = vrot.slane %v4163_v9, 7  ;;  %v1041_v23 = vpop.permute.xlu1 %1040 }
 0x257   : > { %v4168_v63 = vpop.f32.mrf.mxu0  ;;  %v1321_v5 = vpop.permute.xlu0 %1320  ;;  %v1518_v48 = vsel %vm1489_vm9, %v1485_v39, %v1041_v23  ;;  %v4714_v23 = vld [vmem:[#allocation55_spill] sm:$0xff] }
 0x258   : > { %v2102_v33 = vsel %vm279_vm2, %v2003_v22, 0.0  ;;  %v2002_v18 = vrot.slane %v4168_v63, 7  ;;  %v1616_v27 = vsel %vm1588_vm12, %v1583_v53, %v1321_v5  ;;  %v1389_v53 = vsel %vm1359_vm0, %v4693_v3, %v4714_v23 }
 0x259   : > { %2136 = vst.msk [vmem:[%s2712_s25 + $0xb8] sm:$0x3] %vm2114_vm1, %v2102_v33  ;;  %2609 = vmatmul.mubr.msk.f32.gmra.mxu1 %vm1626_vm13, %v1616_v27 }
 0x25a   : > { %v2004_v50 = vsel %vm279_vm2, %v2002_v18, %v2003_v22  ;;  %v2086_v14 = vsel %vm279_vm2, 0.0, %v2002_v18  ;;  %v746_v42 = vpop.permute.xlu1 %745 }
 0x25b   : > { %2134 = vst.msk [vmem:[%s2712_s25 + $0xa8] sm:$0xff] %vm1359_vm0, %v2086_v14  ;;  %2135 = vst.msk [vmem:[%s2712_s25 + $0xb0] sm:$0xff] %vm1359_vm0, %v2004_v50  ;;  %v1043_v29 = vpop.permute.xlu0 %1042  ;;  %v1421_v5 = vsel %vm1391_vm6, %v1389_v53, %v746_v42  ;;  %v2167_v53 = vsel %vm1359_vm0, %v3834_v47, 0.0 }
 0x25c   : > { %v1519_v54 = vsel %vm1489_vm9, %v1486_v30, %v1043_v29 }
 0x25e   : > { %v1137_v57 = vpop.permute.xlu1 %1136 }
 0x25f   : > { %v748_v59 = vpop.permute.xlu0 %747  ;;  %v1551_v11 = vsel %vm1522_vm10, %v1518_v48, %v1137_v57 }
 0x260   : > { %v1422_v0 = vsel %vm1391_vm6, %v1390_v20, %v748_v59 }
 0x262   : > { %v842_v6 = vpop.permute.xlu1 %841 }
 0x263   : > { %v1139_v37 = vpop.permute.xlu0 %1138  ;;  %v1454_v14 = vsel %vm1423_vm7, %v1421_v5, %v842_v6  ;;  %v2170_v5 = vsel %vm1359_vm0, %v3907_v55, 0.0 }
 0x264   : > { %v1552_v17 = vsel %vm1522_vm10, %v1519_v54, %v1139_v37 }
 0x266   : > { %v1230_v34 = vpop.permute.xlu1 %1229 }
 0x267   : > { %v844_v16 = vpop.permute.xlu0 %843  ;;  %v1584_v62 = vsel %vm1555_vm11, %v1551_v11, %v1230_v34 }
 0x268   : > { %v1455_v8 = vsel %vm1423_vm7, %v1422_v0, %v844_v16 }
 0x26a   : > { %v944_v58 = vpop.permute.xlu1 %943 }
 0x26b   : > { %v1232_v40 = vpop.permute.xlu0 %1231  ;;  %v1487_v57 = vsel %vm1456_vm8, %v1454_v14, %v944_v58 }
 0x26c   : > { %v1585_v44 = vsel %vm1555_vm11, %v1552_v17, %v1232_v40 }
 0x26e   : > { %v1323_v26 = vpop.permute.xlu1 %1322 }
 0x26f   : > { %v1617_v51 = vsel %vm1588_vm12, %v1584_v62, %v1323_v26  ;;  %v946_v15 = vpop.permute.xlu0 %945 }
 0x270   : > { %2611 = vmatprep.mubr.msk.f32.mxu1 %vm1626_vm13, %v1617_v51  ;;  %v1488_v33 = vsel %vm1456_vm8, %v1455_v8, %v946_v15  ;;  %v2168_v8 = vsel %vm1359_vm0, %v3827_v10, 0.0 }
 0x271   : > { %v4200_v24 = vpop.f32.mrf.mxu0 }
 0x272   : > { %v2006_v32 = vrot.slane %v4200_v24, 7  ;;  %v1045_v36 = vpop.permute.xlu1 %1044 }
 0x273   : > { %v4208_v49 = vpop.f32.mrf.mxu0  ;;  %v1325_v45 = vpop.permute.xlu0 %1324  ;;  %v1520_v42 = vsel %vm1489_vm9, %v1487_v57, %v1045_v36  ;;  %v2178_v57 = vsel %vm1359_vm0, %v4051_v35, 0.0 }
 0x274   : > { %v2103_v21 = vsel %vm279_vm2, %v2006_v32, 0.0  ;;  %v2005_v28 = vrot.slane %v4208_v49, 7  ;;  %v1618_v22 = vsel %vm1588_vm12, %v1585_v44, %v1325_v45 }
 0x275   : > { %2139 = vst.msk [vmem:[%s2712_s25 + $0xd0] sm:$0x3] %vm2114_vm1, %v2103_v21  ;;  %2612 = vmatmul.mubr.msk.f32.gmra.mxu1 %vm1626_vm13, %v1618_v22 }
 0x276   : > { %v2007_v18 = vsel %vm279_vm2, %v2005_v28, %v2006_v32  ;;  %v2087_v27 = vsel %vm279_vm2, 0.0, %v2005_v28  ;;  %v1047_v50 = vpop.permute.xlu1 %1046 }
 0x277   : > { %2137 = vst.msk [vmem:[%s2712_s25 + $0xc0] sm:$0xff] %vm1359_vm0, %v2087_v27  ;;  %2138 = vst.msk [vmem:[%s2712_s25 + $0xc8] sm:$0xff] %vm1359_vm0, %v2007_v18  ;;  %v1521_v3 = vsel %vm1489_vm9, %v1488_v33, %v1047_v50  ;;  %v1141_v29 = vpop.permute.xlu0 %1140  ;;  %v2169_v33 = vadd.f32 %v2168_v8, %v2167_v53  ;;  %v2172_v27 = vsel %vm1359_vm0, %v3900_v12, 0.0  ;;  %v2174_v50 = vsel %vm1359_vm0, %v3986_v13, 0.0 }
 0x278   : > { %v1553_v59 = vsel %vm1522_vm10, %v1520_v42, %v1141_v29  ;;  %v1554_v37 = vsel %vm1522_vm10, %v1521_v3, %v1141_v29  ;;  %v2176_v29 = vsel %vm1359_vm0, %v3980_v7, 0.0 }
 0x279   : > { %v2171_v18 = vadd.f32 %v2170_v5, %v2169_v33 }
 0x27a   : > { %v1234_v34 = vpop.permute.xlu1 %1233 }
 0x27b   : > { %v1586_v6 = vsel %vm1555_vm11, %v1553_v59, %v1234_v34  ;;  %v1587_v16 = vsel %vm1555_vm11, %v1554_v37, %v1234_v34  ;;  %v1327_v52 = vpop.permute.xlu0 %1326  ;;  %v2173_v14 = vadd.f32 %v2172_v27, %v2171_v18  ;;  %v2180_v37 = vsel %vm1359_vm0, %v4046_v41, 0.0 }
 0x27c   : > { %v1619_v1 = vsel %vm1588_vm12, %v1586_v6, %v1327_v52  ;;  %v1620_v4 = vsel %vm1588_vm12, %v1587_v16, %v1327_v52  ;;  %v2182_v34 = vsel %vm1359_vm0, %v4094_v56, 0.0 }
 0x27d   : > { %2614 = vmatprep.mubr.msk.f32.mxu1 %vm1626_vm13, %v1619_v1  ;;  %v2175_v3 = vadd.f32 %v2174_v50, %v2173_v14 }
 0x27e   : > { %2615 = vmatmul.mubr.msk.f32.gmra.mxu1 %vm1626_vm13, %v1620_v4 }
 0x27f   : > { %v2177_v42 = vadd.f32 %v2176_v29, %v2175_v3 }
 0x281   : > { %v2179_v59 = vadd.f32 %v2178_v57, %v2177_v42 }
 0x283   : > { %v2181_v16 = vadd.f32 %v2180_v37, %v2179_v59 }
 0x285   : > { %v2183_v4 = vadd.f32 %v2182_v34, %v2181_v16 }
 0x28c   : > { %v4241_v43 = vpop.f32.mrf.mxu1 }
 0x28d   : > { %v2009_v58 = vrot.slane %v4241_v43, 7  ;;  %v2200_v5 = vsel %vm1359_vm0, %v4241_v43, 0.0 }
 0x28e   : > { %v4244_v39 = vpop.f32.mrf.mxu1 }
 0x28f   : > { %v2104_v40 = vsel %vm279_vm2, %v2009_v58, 0.0  ;;  %v2008_v48 = vrot.slane %v4244_v39, 7 }
 0x290   : > { %2142 = vst.msk [vmem:[%s2712_s25 + $0xe8] sm:$0x3] %vm2114_vm1, %v2104_v40 }
 0x291   : > { %v2010_v31 = vsel %vm279_vm2, %v2008_v48, %v2009_v58  ;;  %v2088_v19 = vsel %vm279_vm2, 0.0, %v2008_v48 }
 0x292   : > { %2140 = vst.msk [vmem:[%s2712_s25 + $0xd8] sm:$0xff] %vm1359_vm0, %v2088_v19  ;;  %2141 = vst.msk [vmem:[%s2712_s25 + $0xe0] sm:$0xff] %vm1359_vm0, %v2010_v31  ;;  %v2184_v19 = vsel %vm1359_vm0, %v4090_v38, 0.0 }
 0x2a8   : > { %v4256_v11 = vpop.f32.mrf.mxu1 }
 0x2a9   : > { %v2012_v61 = vrot.slane %v4256_v11, 7  ;;  %v2204_v42 = vsel %vm1359_vm0, %v4256_v11, 0.0 }
 0x2aa   : > { %v4259_v62 = vpop.f32.mrf.mxu1 }
 0x2ab   : > { %v2105_v26 = vsel %vm279_vm2, %v2012_v61, 0.0  ;;  %v2011_v25 = vrot.slane %v4259_v62, 7  ;;  %v2202_v33 = vsel %vm1359_vm0, %v4259_v62, 0.0 }
 0x2ac   : > { %2145 = vst.msk [vmem:[%s2712_s25 + $0x100] sm:$0x3] %vm2114_vm1, %v2105_v26  ;;  %v2185_v26 = vadd.f32 %v2184_v19, %v2183_v4 }
 0x2ad   : > { %v2013_v51 = vsel %vm279_vm2, %v2011_v25, %v2012_v61  ;;  %v2089_v15 = vsel %vm279_vm2, 0.0, %v2011_v25  ;;  %v2186_v61 = vsel %vm1359_vm0, %v4131_v2, 0.0 }
 0x2ae   : > { %2143 = vst.msk [vmem:[%s2712_s25 + $0xf0] sm:$0xff] %vm1359_vm0, %v2089_v15  ;;  %2144 = vst.msk [vmem:[%s2712_s25 + $0xf8] sm:$0xff] %vm1359_vm0, %v2013_v51  ;;  %v2187_v25 = vadd.f32 %v2186_v61, %v2185_v26  ;;  %v2188_v51 = vsel %vm1359_vm0, %v4126_v46, 0.0  ;;  %v2190_v15 = vsel %vm1359_vm0, %v4168_v63, 0.0 }
 0x2c4   : > { %v4271_v30 = vpop.f32.mrf.mxu1 }
 0x2c5   : > { %v2015_v54 = vrot.slane %v4271_v30, 7  ;;  %v2208_v16 = vsel %vm1359_vm0, %v4271_v30, 0.0 }
 0x2c6   : > { %v4274_v17 = vpop.f32.mrf.mxu1 }
 0x2c7   : > { %v2106_v32 = vsel %vm279_vm2, %v2015_v54, 0.0  ;;  %v2014_v36 = vrot.slane %v4274_v17, 7  ;;  %v2206_v59 = vsel %vm1359_vm0, %v4274_v17, 0.0 }
 0x2c8   : > { %2148 = vst.msk [vmem:[%s2712_s25 + $0x118] sm:$0x3] %vm2114_vm1, %v2106_v32 }
 0x2c9   : > { %v2016_v60 = vsel %vm279_vm2, %v2014_v36, %v2015_v54  ;;  %v2090_v20 = vsel %vm279_vm2, 0.0, %v2014_v36  ;;  %v2189_v54 = vadd.f32 %v2188_v51, %v2187_v25  ;;  %v2192_v36 = vsel %vm1359_vm0, %v4163_v9, 0.0 }
 0x2ca   : > { %2146 = vst.msk [vmem:[%s2712_s25 + $0x108] sm:$0xff] %vm1359_vm0, %v2090_v20  ;;  %2147 = vst.msk [vmem:[%s2712_s25 + $0x110] sm:$0xff] %vm1359_vm0, %v2016_v60  ;;  %v2194_v60 = vsel %vm1359_vm0, %v4208_v49, 0.0 }
 0x2cb   : > { %v2191_v32 = vadd.f32 %v2190_v15, %v2189_v54 }
 0x2cd   : > { %v2193_v20 = vadd.f32 %v2192_v36, %v2191_v32 }
 0x2e0   : > { %v4286_v44 = vpop.f32.mrf.mxu1 }
 0x2e1   : > { %v2018_v45 = vrot.slane %v4286_v44, 7 }
 0x2e2   : > { %v4289_v0 = vpop.f32.mrf.mxu1 }
 0x2e3   : > { %v2107_v21 = vsel %vm279_vm2, %v2018_v45, 0.0  ;;  %v2017_v28 = vrot.slane %v4289_v0, 7 }
 0x2e4   : > { %2151 = vst.msk [vmem:[%s2712_s25 + $0x130] sm:$0x3] %vm2114_vm1, %v2107_v21  ;;  %v2196_v21 = vsel %vm1359_vm0, %v4200_v24, 0.0 }
 0x2e5   : > { %v2019_v22 = vsel %vm279_vm2, %v2017_v28, %v2018_v45  ;;  %v2091_v23 = vsel %vm279_vm2, 0.0, %v2017_v28  ;;  %v2195_v45 = vadd.f32 %v2194_v60, %v2193_v20  ;;  %v2198_v28 = vsel %vm1359_vm0, %v4244_v39, 0.0 }
 0x2e6   : > { %2149 = vst.msk [vmem:[%s2712_s25 + $0x120] sm:$0xff] %vm1359_vm0, %v2091_v23  ;;  %2150 = vst.msk [vmem:[%s2712_s25 + $0x128] sm:$0xff] %vm1359_vm0, %v2019_v22 }
 0x2e7   : > { %v2197_v22 = vadd.f32 %v2196_v21, %v2195_v45 }
 0x2e9   : > { %v2199_v23 = vadd.f32 %v2198_v28, %v2197_v22 }
 0x2eb   : > { %v2201_v27 = vadd.f32 %v2200_v5, %v2199_v23 }
 0x2ed   : > { %v2203_v3 = vadd.f32 %v2202_v33, %v2201_v27 }
 0x2ef   : > { %v2205_v37 = vadd.f32 %v2204_v42, %v2203_v3 }
 0x2f1   : > { %v2207_v34 = vadd.f32 %v2206_v59, %v2205_v37 }
 0x2f3   : > { %v2209_v4 = vadd.f32 %v2208_v16, %v2207_v34 }
 0x2fd   : > { %v4319_v6 = vpop.f32.mrf.mxu1 }
 0x2fe   : > { %v2021_v52 = vrot.slane %v4319_v6, 7  ;;  %v2216_v61 = vsel %vm1359_vm0, %v4319_v6, 0.0 }
 0x2ff   : > { %v4322_v1 = vpop.f32.mrf.mxu1 }
 0x300   : > { %v2108_v58 = vsel %vm279_vm2, %v2021_v52, 0.0  ;;  %v2020_v40 = vrot.slane %v4322_v1, 7 }
 0x301   : > { %2154 = vst.msk [vmem:[%s2712_s25 + $0x148] sm:$0x3] %vm2114_vm1, %v2108_v58 }
 0x302   : > { %v2022_v48 = vsel %vm279_vm2, %v2020_v40, %v2021_v52  ;;  %v2092_v31 = vsel %vm279_vm2, 0.0, %v2020_v40  ;;  %v2210_v52 = vsel %vm1359_vm0, %v4289_v0, 0.0  ;;  %v2212_v40 = vsel %vm1359_vm0, %v4286_v44, 0.0 }
 0x303   : > { %2152 = vst.msk [vmem:[%s2712_s25 + $0x138] sm:$0xff] %vm1359_vm0, %v2092_v31  ;;  %2153 = vst.msk [vmem:[%s2712_s25 + $0x140] sm:$0xff] %vm1359_vm0, %v2022_v48  ;;  %v2211_v58 = vadd.f32 %v2210_v52, %v2209_v4  ;;  %v2214_v48 = vsel %vm1359_vm0, %v4322_v1, 0.0 }
 0x305   : > { %v2213_v31 = vadd.f32 %v2212_v40, %v2211_v58 }
 0x307   : > { %v2215_v19 = vadd.f32 %v2214_v48, %v2213_v31 }
 0x309   : > { %v2217_v25 = vadd.f32 %v2216_v61, %v2215_v19 }
 0x319   : > { %v4350_v53 = vpop.f32.mrf.mxu1 }
 0x31a   : > { %v2024_v8 = vrot.slane %v4350_v53, 7  ;;  %v2220_v20 = vsel %vm1359_vm0, %v4350_v53, 0.0 }
 0x31b   : > { %v4357_v18 = vpop.f32.mrf.mxu1 }
 0x31c   : > { %v2109_v50 = vsel %vm279_vm2, %v2024_v8, 0.0  ;;  %v2023_v14 = vrot.slane %v4357_v18, 7  ;;  %v2218_v26 = vsel %vm1359_vm0, %v4357_v18, 0.0 }
 0x31d   : > { %2157 = vst.msk [vmem:[%s2712_s25 + $0x160] sm:$0x3] %vm2114_vm1, %v2109_v50  ;;  %v2219_v15 = vadd.f32 %v2218_v26, %v2217_v25 }
 0x31e   : > { %v2025_v29 = vsel %vm279_vm2, %v2023_v14, %v2024_v8  ;;  %v2093_v57 = vsel %vm279_vm2, 0.0, %v2023_v14 }
 0x31f   : > { %2155 = vst.msk [vmem:[%s2712_s25 + $0x150] sm:$0xff] %vm1359_vm0, %v2093_v57  ;;  %2156 = vst.msk [vmem:[%s2712_s25 + $0x158] sm:$0xff] %vm1359_vm0, %v2025_v29  ;;  %v2221_v22 = vadd.f32 %v2220_v20, %v2219_v15 }
 0x335   : > { %v4385_v51 = vpop.f32.mrf.mxu1 }
 0x336   : > { %v2027_v54 = vrot.slane %v4385_v51, 7  ;;  %v2224_v5 = vsel %vm1359_vm0, %v4385_v51, 0.0 }
 0x337   : > { %v4388_v32 = vpop.f32.mrf.mxu1 }
 0x338   : > { %v2110_v36 = vsel %vm279_vm2, %v2027_v54, 0.0  ;;  %v2026_v60 = vrot.slane %v4388_v32, 7  ;;  %v2222_v45 = vsel %vm1359_vm0, %v4388_v32, 0.0 }
 0x339   : > { %2160 = vst.msk [vmem:[%s2712_s25 + $0x178] sm:$0x3] %vm2114_vm1, %v2110_v36  ;;  %v2223_v23 = vadd.f32 %v2222_v45, %v2221_v22 }
 0x33a   : > { %v2028_v21 = vsel %vm279_vm2, %v2026_v60, %v2027_v54  ;;  %v2094_v28 = vsel %vm279_vm2, 0.0, %v2026_v60 }
 0x33b   : > { %2158 = vst.msk [vmem:[%s2712_s25 + $0x168] sm:$0xff] %vm1359_vm0, %v2094_v28  ;;  %2159 = vst.msk [vmem:[%s2712_s25 + $0x170] sm:$0xff] %vm1359_vm0, %v2028_v21  ;;  %v2225_v50 = vadd.f32 %v2224_v5, %v2223_v23 }
 0x33e   : > { %v4404_v8 = vpop.f32.mrf.mxu1 }
 0x33f   : > { %v2030_v33 = vrot.slane %v4404_v8, 7  ;;  %v2228_v42 = vsel %vm1359_vm0, %v4404_v8, 0.0 }
 0x340   : > { %v4409_v27 = vpop.f32.mrf.mxu1 }
 0x341   : > { %v2111_v14 = vsel %vm279_vm2, %v2030_v33, 0.0  ;;  %v2029_v3 = vrot.slane %v4409_v27, 7  ;;  %v2226_v29 = vsel %vm1359_vm0, %v4409_v27, 0.0 }
 0x342   : > { %2163 = vst.msk [vmem:[%s2712_s25 + $0x190] sm:$0x3] %vm2114_vm1, %v2111_v14  ;;  %v2227_v57 = vadd.f32 %v2226_v29, %v2225_v50 }
 0x343   : > { %v2031_v59 = vsel %vm279_vm2, %v2029_v3, %v2030_v33  ;;  %v2095_v37 = vsel %vm279_vm2, 0.0, %v2029_v3 }
 0x344   : > { %2161 = vst.msk [vmem:[%s2712_s25 + $0x180] sm:$0xff] %vm1359_vm0, %v2095_v37  ;;  %2162 = vst.msk [vmem:[%s2712_s25 + $0x188] sm:$0xff] %vm1359_vm0, %v2031_v59  ;;  %v2229_v34 = vadd.f32 %v2228_v42, %v2227_v57 }
 0x346   : > { %v2230_v16 = vrot.slane %v2229_v34, 4 }
 0x348   : > { %v2231_v52 = vadd.f32 %v2230_v16, %v2229_v34 }
 0x34a   : > { %v2232_v4 = vrot.slane %v2231_v52, 2 }
 0x34c   : > { %v2233_v58 = vadd.f32 %v2232_v4, %v2231_v52 }
 0x34e   : > { %v2234_v40 = vrot.slane %v2233_v58, 1 }
 0x350   : > { %v2235_v48 = vadd.f32 %v2234_v40, %v2233_v58 }
 0x352   : > { %2371 = vst.msk [vmem:[%s211_s21] sm:$0x1] %vm2370_vm14, %v2235_v48  ;;  %v4430_v31 = vmul.f32 0.00390625, %v2235_v48 }
 0x354   : > { %v2237_v19 = vsub.f32 %v3834_v47, %v4430_v31  ;;  %v2238_v61 = vsub.f32 %v3827_v10, %v4430_v31  ;;  %v2239_v26 = vsub.f32 %v3907_v55, %v4430_v31  ;;  %v2240_v25 = vsub.f32 %v3900_v12, %v4430_v31 }
 0x355   : > { %v2241_v36 = vsub.f32 %v3986_v13, %v4430_v31  ;;  %v2242_v20 = vsub.f32 %v3980_v7, %v4430_v31  ;;  %v2243_v55 = vsub.f32 %v4051_v35, %v4430_v31  ;;  %v2244_v13 = vsub.f32 %v4046_v41, %v4430_v31 }
 0x356   : > { %v2269_v15 = vmul.f32 %v2237_v19, %v2237_v19  ;;  %v2270_v54 = vmul.f32 %v2238_v61, %v2238_v61  ;;  %v2271_v60 = vmul.f32 %v2239_v26, %v2239_v26  ;;  %v2272_v45 = vmul.f32 %v2240_v25, %v2240_v25 }
 0x357   : > { %v2273_v28 = vmul.f32 %v2241_v36, %v2241_v36  ;;  %v2274_v23 = vmul.f32 %v2242_v20, %v2242_v20  ;;  %v2245_v33 = vsub.f32 %v4094_v56, %v4430_v31  ;;  %v2275_v50 = vmul.f32 %v2243_v55, %v2243_v55 }
 0x358   : > { %v2301_v47 = vsel %vm1359_vm0, %v2269_v15, 0.0  ;;  %v2302_v10 = vsel %vm1359_vm0, %v2270_v54, 0.0  ;;  %v2304_v12 = vsel %vm1359_vm0, %v2271_v60, 0.0  ;;  %v2306_v5 = vsel %vm1359_vm0, %v2272_v45, 0.0 }
 0x359   : > { %v2303_v21 = vadd.f32 %v2302_v10, %v2301_v47  ;;  %v2308_v14 = vsel %vm1359_vm0, %v2273_v28, 0.0  ;;  %v2246_v35 = vsub.f32 %v4090_v38, %v4430_v31  ;;  %v2276_v29 = vmul.f32 %v2244_v13, %v2244_v13 }
 0x35a   : > { %v2310_v57 = vsel %vm1359_vm0, %v2274_v23, 0.0  ;;  %v2247_v41 = vsub.f32 %v4131_v2, %v4430_v31  ;;  %v2277_v59 = vmul.f32 %v2245_v33, %v2245_v33  ;;  %v2312_v37 = vsel %vm1359_vm0, %v2275_v50, 0.0 }
 0x35b   : > { %v2305_v22 = vadd.f32 %v2304_v12, %v2303_v21  ;;  %v2248_v56 = vsub.f32 %v4126_v46, %v4430_v31  ;;  %v2278_v16 = vmul.f32 %v2246_v35, %v2246_v35  ;;  %v2314_v52 = vsel %vm1359_vm0, %v2276_v29, 0.0 }
 0x35c   : > { %v2249_v38 = vsub.f32 %v4168_v63, %v4430_v31  ;;  %v2279_v58 = vmul.f32 %v2247_v41, %v2247_v41  ;;  %v2316_v40 = vsel %vm1359_vm0, %v2277_v59, 0.0  ;;  %v2250_v2 = vsub.f32 %v4163_v9, %v4430_v31 }
 0x35d   : > { %v2307_v7 = vadd.f32 %v2306_v5, %v2305_v22  ;;  %v2280_v19 = vmul.f32 %v2248_v56, %v2248_v56  ;;  %v2318_v61 = vsel %vm1359_vm0, %v2278_v16, 0.0  ;;  %v2251_v46 = vsub.f32 %v4208_v49, %v4430_v31 }
 0x35e   : > { %v2281_v25 = vmul.f32 %v2249_v38, %v2249_v38  ;;  %v2320_v15 = vsel %vm1359_vm0, %v2279_v58, 0.0  ;;  %v2252_v63 = vsub.f32 %v4200_v24, %v4430_v31  ;;  %v2282_v36 = vmul.f32 %v2250_v2, %v2250_v2 }
 0x35f   : > { %v2309_v3 = vadd.f32 %v2308_v14, %v2307_v7  ;;  %v2322_v60 = vsel %vm1359_vm0, %v2280_v19, 0.0  ;;  %v2253_v9 = vsub.f32 %v4244_v39, %v4430_v31  ;;  %v2283_v45 = vmul.f32 %v2251_v46, %v2251_v46 }
 0x360   : > { %v2324_v47 = vsel %vm1359_vm0, %v2281_v25, 0.0  ;;  %v2254_v49 = vsub.f32 %v4241_v43, %v4430_v31  ;;  %v2284_v21 = vmul.f32 %v2252_v63, %v2252_v63  ;;  %v2326_v55 = vsel %vm1359_vm0, %v2282_v36, 0.0 }
 0x361   : > { %v2311_v42 = vadd.f32 %v2310_v57, %v2309_v3  ;;  %v2255_v24 = vsub.f32 %v4259_v62, %v4430_v31  ;;  %v2285_v12 = vmul.f32 %v2253_v9, %v2253_v9  ;;  %v2328_v22 = vsel %vm1359_vm0, %v2283_v45, 0.0 }
 0x362   : > { %v2256_v39 = vsub.f32 %v4256_v11, %v4430_v31  ;;  %v2286_v23 = vmul.f32 %v2254_v49, %v2254_v49  ;;  %v2330_v5 = vsel %vm1359_vm0, %v2284_v21, 0.0  ;;  %v2257_v43 = vsub.f32 %v4274_v17, %v4430_v31 }
 0x363   : > { %v2313_v34 = vadd.f32 %v2312_v37, %v2311_v42  ;;  %v2287_v33 = vmul.f32 %v2255_v24, %v2255_v24  ;;  %v2332_v50 = vsel %vm1359_vm0, %v2285_v12, 0.0  ;;  %v2258_v62 = vsub.f32 %v4271_v30, %v4430_v31 }
 0x364   : > { %v2288_v3 = vmul.f32 %v2256_v39, %v2256_v39  ;;  %v2334_v35 = vsel %vm1359_vm0, %v2286_v23, 0.0  ;;  %v2259_v11 = vsub.f32 %v4289_v0, %v4430_v31  ;;  %v2289_v57 = vmul.f32 %v2257_v43, %v2257_v43 }
 0x365   : > { %v2315_v4 = vadd.f32 %v2314_v52, %v2313_v34  ;;  %v2336_v42 = vsel %vm1359_vm0, %v2287_v33, 0.0  ;;  %v2260_v17 = vsub.f32 %v4286_v44, %v4430_v31  ;;  %v2290_v59 = vmul.f32 %v2258_v62, %v2258_v62 }
 0x366   : > { %v2338_v37 = vsel %vm1359_vm0, %v2288_v3, 0.0  ;;  %v2261_v30 = vsub.f32 %v4322_v1, %v4430_v31  ;;  %v2291_v56 = vmul.f32 %v2259_v11, %v2259_v11  ;;  %v2340_v16 = vsel %vm1359_vm0, %v2289_v57, 0.0 }
 0x367   : > { %v2317_v48 = vadd.f32 %v2316_v40, %v2315_v4  ;;  %v2262_v0 = vsub.f32 %v4319_v6, %v4430_v31  ;;  %v2292_v4 = vmul.f32 %v2260_v17, %v2260_v17  ;;  %v2342_v38 = vsel %vm1359_vm0, %v2290_v59, 0.0 }
 0x368   : > { %v2263_v44 = vsub.f32 %v4357_v18, %v4430_v31  ;;  %v2293_v40 = vmul.f32 %v2261_v30, %v2261_v30  ;;  %v2264_v1 = vsub.f32 %v4350_v53, %v4430_v31  ;;  %v2265_v6 = vsub.f32 %v4388_v32, %v4430_v31 }
 0x369   : > { %v2319_v26 = vadd.f32 %v2318_v61, %v2317_v48  ;;  %v2344_v48 = vsel %vm1359_vm0, %v2291_v56, 0.0  ;;  %v2294_v19 = vmul.f32 %v2262_v0, %v2262_v0  ;;  %v2346_v61 = vsel %vm1359_vm0, %v2292_v4, 0.0 }
 0x36a   : > { %v2295_v46 = vmul.f32 %v2263_v44, %v2263_v44  ;;  %v2348_v25 = vsel %vm1359_vm0, %v2293_v40, 0.0  ;;  %v2266_v18 = vsub.f32 %v4385_v51, %v4430_v31  ;;  %v2267_v53 = vsub.f32 %v4409_v27, %v4430_v31 }
 0x36b   : > { %v2321_v54 = vadd.f32 %v2320_v15, %v2319_v26  ;;  %v2350_v63 = vsel %vm1359_vm0, %v2294_v19, 0.0  ;;  %v2268_v32 = vsub.f32 %v4404_v8, %v4430_v31 }
 0x36c   : > { %v2298_v45 = vmul.f32 %v2266_v18, %v2266_v18  ;;  %v2299_v51 = vmul.f32 %v2267_v53, %v2267_v53 }
 0x36d   : > { %v2323_v20 = vadd.f32 %v2322_v60, %v2321_v54  ;;  %v2296_v54 = vmul.f32 %v2264_v1, %v2264_v1  ;;  %v2297_v60 = vmul.f32 %v2265_v6, %v2265_v6 }
 0x36e   : > { %v2360_v24 = vsel %vm1359_vm0, %v2299_v51, 0.0 }
 0x36f   : > { %v2325_v10 = vadd.f32 %v2324_v47, %v2323_v20  ;;  %v2352_v20 = vsel %vm1359_vm0, %v2295_v46, 0.0  ;;  %v2354_v47 = vsel %vm1359_vm0, %v2296_v54, 0.0  ;;  %v2356_v49 = vsel %vm1359_vm0, %v2297_v60, 0.0 }
 0x371   : > { %v2327_v28 = vadd.f32 %v2326_v55, %v2325_v10  ;;  %v2300_v55 = vmul.f32 %v2268_v32, %v2268_v32 }
 0x373   : > { %v2329_v13 = vadd.f32 %v2328_v22, %v2327_v28  ;;  %v2358_v28 = vsel %vm1359_vm0, %v2298_v45, 0.0  ;;  %v2362_v22 = vsel %vm1359_vm0, %v2300_v55, 0.0 }
 0x375   : > { %v2331_v7 = vadd.f32 %v2330_v5, %v2329_v13 }
 0x377   : > { %v2333_v14 = vadd.f32 %v2332_v50, %v2331_v7 }
 0x379   : > { %v2335_v29 = vadd.f32 %v2334_v35, %v2333_v14 }
 0x37b   : > { %v2337_v41 = vadd.f32 %v2336_v42, %v2335_v29 }
 0x37d   : > { %v2339_v34 = vadd.f32 %v2338_v37, %v2337_v41 }
 0x37f   : > { %v2341_v52 = vadd.f32 %v2340_v16, %v2339_v34 }
 0x381   : > { %v2343_v58 = vadd.f32 %v2342_v38, %v2341_v52 }
 0x383   : > { %v2345_v2 = vadd.f32 %v2344_v48, %v2343_v58 }
 0x385   : > { %v2347_v26 = vadd.f32 %v2346_v61, %v2345_v2 }
 0x387   : > { %v2349_v15 = vadd.f32 %v2348_v25, %v2347_v26 }
 0x389   : > { %v2351_v36 = vadd.f32 %v2350_v63, %v2349_v15 }
 0x38b   : > { %v2353_v9 = vadd.f32 %v2352_v20, %v2351_v36 }
 0x38d   : > { %v2355_v10 = vadd.f32 %v2354_v47, %v2353_v9 }
 0x38f   : > { %v2357_v21 = vadd.f32 %v2356_v49, %v2355_v10 }
 0x391   : > { %v2359_v27 = vadd.f32 %v2358_v28, %v2357_v21 }
 0x393   : > { %v2361_v12 = vadd.f32 %v2360_v24, %v2359_v27 }
 0x395   : > { %v2363_v13 = vadd.f32 %v2362_v22, %v2361_v12 }
 0x397   : > { %v2364_v8 = vrot.slane %v2363_v13, 4 }
 0x399   : > { %v2365_v31 = vadd.f32 %v2364_v8, %v2363_v13 }
 0x39b   : > { %v2366_v39 = vrot.slane %v2365_v31, 2 }
 0x39d   : > { %v2367_v23 = vadd.f32 %v2366_v39, %v2365_v31 }
 0x39f   : > { %v2368_v5 = vrot.slane %v2367_v23, 1 }
 0x3a1   : > { %v2369_v7 = vadd.f32 %v2368_v5, %v2367_v23 }
 0x3a3   : > { %2372 = vst.msk [vmem:[%s214_s24] sm:$0x1] %vm2370_vm14, %v2369_v7 }
 0x3a4 PF: > { %s15_s15 = sadd.s32 1, %s2651_s15  }
 0x3a5   : > { %p12_p4 = scmp.ge.s32.totalorder %s15_s15, 4  }
 0x3a7   :  { %14 = sbr.rel (!%p12_p4) target bundleno = 1 (0x1), region = 82 }

// kernel: residual_block_pallas.4
= control target key start
LH: loop header
LB: loop body
LE: loop exit
PB: predicated region body
PF: predicated region fallthrough
CT: control target
= control target key end

     0   :  { %s2777_s21 = smov 0   ;;  %s4693_s0 = inlined_call_operand.vmem [shape: f32[2,18,18,4], index: 0, kind: input, shape index: {}]   ;;  %s4694_s1 = inlined_call_operand.vmem [shape: f32[1,4], index: 1, kind: input, shape index: {}]   ;;  %s4695_s2 = inlined_call_operand.vmem [shape: f32[1,4], index: 2, kind: input, shape index: {}]   ;;  %s4696_s3 = inlined_call_operand.vmem [shape: f32[36,4], index: 3, kind: input, shape index: {}]   ;;  %s4697_s4 = inlined_call_operand.vmem [shape: f32[2,16,16,4], index: 4, kind: output, shape index: {0}]   ;;  %s4698_s5 = inlined_call_operand.vmem [shape: f32[2,1,4], index: 5, kind: output, shape index: {1}]   ;;  %s4699_s6 = inlined_call_operand.vmem [shape: f32[2,1,4], index: 6, kind: output, shape index: {2}]  }
   0x1 LB: > { %s2529_s22 = sadd.s32 4294967295, %s2731_s21   ;;  %p2533_p0 = scmp.ge.s32.totalorder %s2731_s21, 1  ;;  %s2731_s21 = sphi %s2777_s21, %s17_s21  }
   0x2   : > { %p217_p1 = scmp.lt.s32.totalorder %s2731_s21, 3 }
   0x4   : > { %p218_p2 = pnand %p2533_p0, %p217_p1 }
   0x6   : > { %221 = sbr.rel (%p218_p2) target bundleno = 939 (0x3ab), region = 36 }
   0xb   : > { %p253_p3 = scmp.lt.s32.totalorder %s2529_s22, 1  ;;  %v499_v0 = vlaneseq  ;;  %v4700_v1 = vmov 0.0   ;;  %s2734_s24 = smov 4   ;;  %v2798_v5 = vld [vmem:[%s4694_s1] ss:$0 sm:$0xff]  ;;  %vm635_vm0 = vcmask 1046528  }
   0xc   : > { %v636_v2 = vrot.slane %v4700_v1, 1  ;;  %v2811_v7 = vld [vmem:[%s4695_s2] ss:$0 sm:$0xff]  ;;  %vm812_vm3 = vcmask 1045504   ;;  %s2735_s8 = smov 8   ;;  %s2736_s9 = smov 12  }
   0xd   : > { %s4901_s22 = smov (!%p253_p3, %s2529_s22), 1  ;;  %v2788_v3 = vshrl.u32 %v499_v0, 7  ;;  %s2737_s10 = smov 16   ;;  %vm1957_vm4 = vcmask 1043456   ;;  %vm1591_vm5 = vcmask 31744   ;;  %vm1657_vm6 = vcmask 97280  }
   0xe   : > { %v2790_v4 = vpack.i.bf16 %v636_v2, %v636_v2  ;;  %s2680_s23 = smul.u32 432, %s4901_s22  ;;  %s2738_s11 = smov 20   ;;  %vm1624_vm7 = vcmask 64512   ;;  %vm1690_vm8 = vcmask 130048   ;;  %vm1723_vm9 = vcmask 162816  }
   0xf   : > { %4771 = vst [vmem:[#allocation2_spill] sm:$0xff] %v2788_v3  ;;  %v2801_v6 = vadd.s32 16, %v2788_v3  ;;  %vm503_vm1 = vcmp.ge.s32.totalorder %v2788_v3, 1  ;;  %s2739_s14 = smov 24   ;;  %s2741_s26 = smov 32   ;;  %vm1756_vm10 = vcmask 195584  }
  0x10   : > { %4772 = vst [vmem:[#allocation3_spill] sm:$0xff] %v2790_v4  ;;  %2699 = vrot.lane.b32.xlu0 %v2790_v4, %s2734_s24  ;;  %s2806_s29 = scalar_lea.vmem %s4693_s0, %s2680_s23  ;;  %s2740_s23 = smov 28   ;;  %vm1789_vm11 = vcmask 228352   ;;  %vm1822_vm12 = vcmask 261120   ;;  %vm1860_vm13 = vcmask 293888   ;;  %vm2421_vm14 = vcmask 24576  }
  0x11   : > { %4773 = vst [vmem:[#allocation4_spill] sm:$0xff] %v2801_v6  ;;  %v273_v8 = vld [vmem:[%s2806_s29 + $0x20] sm:$0xff]  ;;  %v274_v9 = vld [vmem:[%s2806_s29 + $0x28] sm:$0x3]  ;;  %v272_v10 = vld [vmem:[%s2806_s29 + $0x18] sm:$0xff]  ;;  %vm514_vm2 = vcmp.le.s32.totalorder %v2801_v6, 16 }
  0x12   : > { %v334_v11 = vmul.f32 %v2798_v5, %v273_v8  ;;  %v335_v12 = vmul.f32 %v2798_v5, %v274_v9  ;;  %v333_v13 = vmul.f32 %v2798_v5, %v272_v10  ;;  %v275_v14 = vld [vmem:[%s2806_s29 + $0x30] sm:$0xff]  ;;  %v276_v15 = vld [vmem:[%s2806_s29 + $0x38] sm:$0xff]  ;;  %v277_v16 = vld [vmem:[%s2806_s29 + $0x40] sm:$0x3]  ;;  %s2574_s27 = sshll.u32 %s4901_s22, 8 }
  0x13   : > { %v336_v17 = vmul.f32 %v2798_v5, %v275_v14  ;;  %v337_v18 = vmul.f32 %v2798_v5, %v276_v15  ;;  %v338_v19 = vmul.f32 %v2798_v5, %v277_v16  ;;  %v278_v20 = vld [vmem:[%s2806_s29 + $0x48] sm:$0xff]  ;;  %v279_v21 = vld [vmem:[%s2806_s29 + $0x50] sm:$0xff]  ;;  %v280_v38 = vld [vmem:[%s2806_s29 + $0x58] sm:$0x3]  ;;  %s4073_s7 = scalar_lea.vmem %s4697_s4, %s2574_s27 }
  0x14   : > { %v395_v22 = vadd.f32 %v2811_v7, %v334_v11  ;;  %v396_v23 = vadd.f32 %v2811_v7, %v335_v12  ;;  %v394_v24 = vadd.f32 %v2811_v7, %v333_v13  ;;  %v339_v25 = vmul.f32 %v2798_v5, %v278_v20  ;;  %v281_v43 = vld [vmem:[%s2806_s29 + $0x60] sm:$0xff]  ;;  %v283_v48 = vld [vmem:[%s2806_s29 + $0x70] sm:$0x3]  ;;  %v282_v53 = vld [vmem:[%s2806_s29 + $0x68] sm:$0xff] }
  0x15   : > { %v397_v26 = vadd.f32 %v2811_v7, %v336_v17  ;;  %v398_v27 = vadd.f32 %v2811_v7, %v337_v18  ;;  %v399_v28 = vadd.f32 %v2811_v7, %v338_v19  ;;  %v340_v29 = vmul.f32 %v2798_v5, %v279_v21  ;;  %v284_v54 = vld [vmem:[%s2806_s29 + $0x78] sm:$0xff]  ;;  %v285_v59 = vld [vmem:[%s2806_s29 + $0x80] sm:$0xff]  ;;  %v286_v0 = vld [vmem:[%s2806_s29 + $0x88] sm:$0x3] }
  0x16   : > { %v2837_v30 = vmax.f32 %v395_v22, 0.0  ;;  %v450_v31 = vmax.f32 %v396_v23, 0.0  ;;  %v448_v32 = vmax.f32 %v394_v24, 0.0  ;;  %v400_v33 = vadd.f32 %v2811_v7, %v339_v25  ;;  %v287_v11 = vld [vmem:[%s2806_s29 + $0x90] sm:$0xff]  ;;  %v288_v20 = vld [vmem:[%s2806_s29 + $0x98] sm:$0xff] }
  0x17   : > { %v451_v34 = vmax.f32 %v397_v26, 0.0  ;;  %v2840_v35 = vmax.f32 %v398_v27, 0.0  ;;  %v453_v36 = vmax.f32 %v399_v28, 0.0  ;;  %v401_v37 = vadd.f32 %v2811_v7, %v340_v29 }
  0x18   : > { %v2846_v39 = vsel %vm514_vm2, %v450_v31, 0.0  ;;  %v642_v40 = vrot.slane %v2837_v30, 1  ;;  %v2851_v41 = vsel %vm503_vm1, %v448_v32, 0.0  ;;  %v454_v42 = vmax.f32 %v400_v33, 0.0 }
  0x19   : > { %v644_v44 = vrot.slane %v2846_v39, 1  ;;  %v641_v45 = vrot.slane %v2851_v41, 1  ;;  %v2858_v46 = vsel %vm503_vm1, %v451_v34, 0.0  ;;  %v647_v47 = vrot.slane %v2840_v35, 1 }
  0x1a   : > { %v646_v49 = vrot.slane %v2858_v46, 1  ;;  %v2865_v50 = vsel %vm514_vm2, %v453_v36, 0.0  ;;  %v2867_v51 = vmax.f32 %v401_v37, 0.0  ;;  %v2871_v52 = vsel %vm503_vm1, %v454_v42, 0.0 }
  0x1b   : > { %v2876_v55 = vsel %vm635_vm0, %v642_v40, %v644_v44  ;;  %v2879_v56 = vsel %vm635_vm0, %v641_v45, %v642_v40  ;;  %v649_v57 = vrot.slane %v2865_v50, 1  ;;  %v651_v58 = vrot.slane %v2871_v52, 1  ;;  %v289_v40 = vld [vmem:[%s2806_s29 + $0xa0] sm:$0x3] }
  0x1c   : > { %722 = vrot.lane.b32.xlu1 %v2876_v55, %s2734_s24  ;;  %720 = vrot.lane.b32.xlu0 %v2879_v56, %s2734_s24  ;;  %v2889_v60 = vsel %vm635_vm0, %v646_v49, %v647_v47  ;;  %v652_v61 = vrot.slane %v2867_v51, 1  ;;  %v341_v62 = vmul.f32 %v2798_v5, %v280_v38  ;;  %v342_v63 = vmul.f32 %v2798_v5, %v281_v43 }
  0x1d   : > { %v2896_v2 = vsel %vm635_vm0, %v647_v47, %v649_v57  ;;  %v343_v8 = vmul.f32 %v2798_v5, %v282_v53  ;;  %v344_v9 = vmul.f32 %v2798_v5, %v283_v48  ;;  %v345_v10 = vmul.f32 %v2798_v5, %v284_v54  ;;  %v290_v47 = vld [vmem:[%s2806_s29 + $0xa8] sm:$0xff]  ;;  %v291_v57 = vld [vmem:[%s2806_s29 + $0xb0] sm:$0xff] }
  0x1e   : > { %v2903_v12 = vsel %vm635_vm0, %v651_v58, %v652_v61  ;;  %v402_v13 = vadd.f32 %v2811_v7, %v341_v62  ;;  %v403_v14 = vadd.f32 %v2811_v7, %v342_v63  ;;  %v346_v15 = vmul.f32 %v2798_v5, %v285_v59  ;;  %v292_v58 = vld [vmem:[%s2806_s29 + $0xb8] sm:$0x3] }
  0x1f   : > { %v404_v16 = vadd.f32 %v2811_v7, %v343_v8  ;;  %v405_v17 = vadd.f32 %v2811_v7, %v344_v9  ;;  %v406_v18 = vadd.f32 %v2811_v7, %v345_v10  ;;  %v347_v19 = vmul.f32 %v2798_v5, %v286_v0  ;;  %v293_v0 = vld [vmem:[%s2806_s29 + $0xc0] sm:$0xff] }
  0x20   : > { %724 = vrot.lane.b32.xlu1 %v2889_v60, %s2734_s24  ;;  %726 = vrot.lane.b32.xlu0 %v2896_v2, %s2734_s24  ;;  %v456_v21 = vmax.f32 %v402_v13, 0.0  ;;  %v457_v22 = vmax.f32 %v403_v14, 0.0  ;;  %v407_v23 = vadd.f32 %v2811_v7, %v346_v15  ;;  %v348_v24 = vmul.f32 %v2798_v5, %v287_v11 }
  0x21   : > { %v2919_v25 = vmax.f32 %v404_v16, 0.0  ;;  %v459_v26 = vmax.f32 %v405_v17, 0.0  ;;  %v460_v27 = vmax.f32 %v406_v18, 0.0  ;;  %v408_v28 = vadd.f32 %v2811_v7, %v347_v19  ;;  %v294_v17 = vld [vmem:[%s2806_s29 + $0xc8] sm:$0xff] }
  0x22   : > { %v2924_v29 = vsel %vm514_vm2, %v456_v21, 0.0  ;;  %v2928_v31 = vsel %vm503_vm1, %v457_v22, 0.0  ;;  %v2930_v32 = vmax.f32 %v407_v23, 0.0  ;;  %v349_v33 = vmul.f32 %v2798_v5, %v288_v20  ;;  %v295_v22 = vld [vmem:[%s2806_s29 + $0xd0] sm:$0x3] }
  0x23   : > { %v654_v34 = vrot.slane %v2924_v29, 1  ;;  %v656_v36 = vrot.slane %v2928_v31, 1  ;;  %v657_v37 = vrot.slane %v2919_v25, 1  ;;  %v2938_v38 = vsel %vm514_vm2, %v459_v26, 0.0 }
  0x24   : > { %728 = vrot.lane.b32.xlu1 %v2903_v12, %s2734_s24  ;;  %v659_v42 = vrot.slane %v2938_v38, 1  ;;  %v2946_v43 = vsel %vm503_vm1, %v460_v27, 0.0  ;;  %v662_v44 = vrot.slane %v2930_v32, 1  ;;  %v462_v45 = vmax.f32 %v408_v28, 0.0 }
  0x25   : > { %v2951_v48 = vsel %vm635_vm0, %v652_v61, %v654_v34  ;;  %v2954_v49 = vsel %vm635_vm0, %v656_v36, %v657_v37  ;;  %v661_v53 = vrot.slane %v2946_v43, 1  ;;  %v409_v54 = vadd.f32 %v2811_v7, %v348_v24 }
  0x26   : > { %730 = vrot.lane.b32.xlu0 %v2951_v48, %s2734_s24  ;;  %v2963_v59 = vsel %vm635_vm0, %v657_v37, %v659_v42  ;;  %v2967_v61 = vsel %vm514_vm2, %v462_v45, 0.0  ;;  %v410_v62 = vadd.f32 %v2811_v7, %v349_v33  ;;  %v350_v63 = vmul.f32 %v2798_v5, %v289_v40  ;;  %v296_v45 = vld [vmem:[%s2806_s29 + $0xd8] sm:$0xff] }
  0x27   : > { %v2973_v8 = vsel %vm635_vm0, %v661_v53, %v662_v44  ;;  %v664_v9 = vrot.slane %v2967_v61, 1  ;;  %v463_v10 = vmax.f32 %v409_v54, 0.0  ;;  %v351_v11 = vmul.f32 %v2798_v5, %v290_v47 }
  0x28   : > { %732 = vrot.lane.b32.xlu1 %v2954_v49, %s2734_s24  ;;  %v2979_v13 = vmax.f32 %v410_v62, 0.0  ;;  %v411_v14 = vadd.f32 %v2811_v7, %v350_v63  ;;  %v352_v15 = vmul.f32 %v2798_v5, %v291_v57  ;;  %v353_v16 = vmul.f32 %v2798_v5, %v292_v58 }
  0x29   : > { %v2986_v18 = vsel %vm635_vm0, %v662_v44, %v664_v9  ;;  %v2990_v19 = vsel %vm503_vm1, %v463_v10, 0.0  ;;  %v412_v20 = vadd.f32 %v2811_v7, %v351_v11  ;;  %v354_v21 = vmul.f32 %v2798_v5, %v293_v0  ;;  %v297_v9 = vld [vmem:[%s2806_s29 + $0xe0] sm:$0xff] }
  0x2a   : > { %4774 = vst [vmem:[#allocation5_spill] sm:$0xff] %v2979_v13  ;;  %734 = vrot.lane.b32.xlu0 %v2963_v59, %s2734_s24  ;;  %v666_v23 = vrot.slane %v2990_v19, 1  ;;  %v667_v24 = vrot.slane %v2979_v13, 1  ;;  %v465_v26 = vmax.f32 %v411_v14, 0.0  ;;  %v413_v27 = vadd.f32 %v2811_v7, %v352_v15 }
  0x2b   : > { %v466_v28 = vmax.f32 %v412_v20, 0.0  ;;  %v414_v33 = vadd.f32 %v2811_v7, %v353_v16  ;;  %v355_v34 = vmul.f32 %v2798_v5, %v294_v17  ;;  %v415_v36 = vadd.f32 %v2811_v7, %v354_v21  ;;  %v298_v16 = vld [vmem:[%s2806_s29 + $0xe8] sm:$0x3]  ;;  %v299_v17 = vld [vmem:[%s2806_s29 + $0xf0] sm:$0xff] }
  0x2c   : > { %736 = vrot.lane.b32.xlu1 %v2973_v8, %s2734_s24  ;;  %v3006_v37 = vsel %vm635_vm0, %v666_v23, %v667_v24  ;;  %v3010_v40 = vsel %vm514_vm2, %v465_v26, 0.0  ;;  %v3012_v42 = vmax.f32 %v413_v27, 0.0  ;;  %v356_v44 = vmul.f32 %v2798_v5, %v295_v22 }
  0x2d   : > { %v669_v47 = vrot.slane %v3010_v40, 1  ;;  %v3019_v53 = vsel %vm503_vm1, %v466_v28, 0.0  ;;  %v468_v54 = vmax.f32 %v414_v33, 0.0  ;;  %v416_v57 = vadd.f32 %v2811_v7, %v355_v34  ;;  %v300_v33 = vld [vmem:[%s2806_s29 + $0xf8] sm:$0xff]  ;;  %v301_v34 = vld [vmem:[%s2806_s29 + $0x100] sm:$0x3] }
  0x2e   : > { %4775 = vst [vmem:[#allocation6_spill] sm:$0xff] %v3019_v53  ;;  %738 = vrot.lane.b32.xlu0 %v2986_v18, %s2734_s24  ;;  %v671_v58 = vrot.slane %v3019_v53, 1  ;;  %v672_v62 = vrot.slane %v3012_v42, 1  ;;  %v469_v63 = vmax.f32 %v415_v36, 0.0  ;;  %v417_v0 = vadd.f32 %v2811_v7, %v356_v44 }
  0x2f   : > { %v3029_v10 = vsel %vm635_vm0, %v667_v24, %v669_v47  ;;  %v3033_v11 = vsel %vm514_vm2, %v468_v54, 0.0  ;;  %v3035_v14 = vmax.f32 %v416_v57, 0.0  ;;  %v357_v15 = vmul.f32 %v2798_v5, %v296_v45  ;;  %v302_v54 = vld [vmem:[%s2806_s29 + $0x108] sm:$0xff] }
  0x30   : > { %740 = vrot.lane.b32.xlu1 %v3006_v37, %s2734_s24  ;;  %v3043_v20 = vsel %vm635_vm0, %v671_v58, %v672_v62  ;;  %v674_v21 = vrot.slane %v3033_v11, 1  ;;  %v3048_v22 = vsel %vm503_vm1, %v469_v63, 0.0  ;;  %v471_v23 = vmax.f32 %v417_v0, 0.0 }
  0x31   : > { %v676_v24 = vrot.slane %v3048_v22, 1  ;;  %v677_v26 = vrot.slane %v3035_v14, 1  ;;  %v358_v27 = vmul.f32 %v2798_v5, %v297_v9  ;;  %v418_v28 = vadd.f32 %v2811_v7, %v357_v15 }
  0x32   : > { %742 = vrot.lane.b32.xlu0 %v3029_v10, %s2734_s24  ;;  %v3059_v36 = vsel %vm635_vm0, %v672_v62, %v674_v21  ;;  %v3063_v44 = vsel %vm514_vm2, %v471_v23, 0.0  ;;  %v359_v45 = vmul.f32 %v2798_v5, %v298_v16  ;;  %v360_v47 = vmul.f32 %v2798_v5, %v299_v17  ;;  %v303_v17 = vld [vmem:[%s2806_s29 + $0x110] sm:$0xff] }
  0x33   : > { %4776 = vst [vmem:[#allocation7_spill] sm:$0xff] %v3063_v44  ;;  %v3069_v57 = vsel %vm635_vm0, %v676_v24, %v677_v26  ;;  %v679_v58 = vrot.slane %v3063_v44, 1  ;;  %v419_v63 = vadd.f32 %v2811_v7, %v358_v27  ;;  %v472_v0 = vmax.f32 %v418_v28, 0.0  ;;  %v304_v28 = vld [vmem:[%s2806_s29 + $0x118] sm:$0x3] }
  0x34   : > { %744 = vrot.lane.b32.xlu1 %v3043_v20, %s2734_s24  ;;  %v420_v62 = vadd.f32 %v2811_v7, %v359_v45  ;;  %v361_v9 = vmul.f32 %v2798_v5, %v300_v33  ;;  %v421_v15 = vadd.f32 %v2811_v7, %v360_v47  ;;  %v362_v16 = vmul.f32 %v2798_v5, %v301_v34  ;;  %v308_v44 = vld [vmem:[%s2806_s29 + $0x138] sm:$0xff] }
  0x35   : > { %v3081_v21 = vsel %vm635_vm0, %v677_v26, %v679_v58  ;;  %v3083_v23 = vmax.f32 %v419_v63, 0.0  ;;  %v3087_v24 = vsel %vm503_vm1, %v472_v0, 0.0  ;;  %v363_v27 = vmul.f32 %v2798_v5, %v302_v54 }
  0x36   : > { %4777 = vst [vmem:[#allocation8_spill] sm:$0xff] %v3081_v21  ;;  %4779 = vst [vmem:[#allocation10_spill] sm:$0xff] %v3087_v24  ;;  %746 = vrot.lane.b32.xlu0 %v3059_v36, %s2734_s24  ;;  %v681_v33 = vrot.slane %v3087_v24, 1  ;;  %v474_v34 = vmax.f32 %v420_v62, 0.0  ;;  %v422_v26 = vadd.f32 %v2811_v7, %v361_v9  ;;  %v475_v45 = vmax.f32 %v421_v15, 0.0  ;;  %v305_v15 = vld [vmem:[%s2806_s29 + $0x120] sm:$0xff] }
  0x37   : > { %4778 = vst [vmem:[#allocation9_spill] sm:$0xff] %v3083_v23  ;;  %v682_v47 = vrot.slane %v3083_v23, 1  ;;  %v423_v58 = vadd.f32 %v2811_v7, %v362_v16  ;;  %v364_v63 = vmul.f32 %v2798_v5, %v303_v17  ;;  %v424_v54 = vadd.f32 %v2811_v7, %v363_v27  ;;  %v306_v16 = vld [vmem:[%s2806_s29 + $0x128] sm:$0xff] }
  0x38   : > { %748 = vrot.lane.b32.xlu1 %v3069_v57, %s2734_s24  ;;  %v3103_v0 = vsel %vm514_vm2, %v474_v34, 0.0  ;;  %v3105_v1 = vmax.f32 %v422_v26, 0.0  ;;  %v3109_v62 = vsel %vm503_vm1, %v475_v45, 0.0  ;;  %v365_v9 = vmul.f32 %v2798_v5, %v304_v28 }
  0x39   : > { %4780 = vst [vmem:[#allocation11_spill] sm:$0xff] %v3103_v0  ;;  %4782 = vst [vmem:[#allocation13_spill] sm:$0xff] %v3109_v62  ;;  %v3115_v17 = vsel %vm635_vm0, %v681_v33, %v682_v47  ;;  %v684_v27 = vrot.slane %v3103_v0, 1  ;;  %v686_v34 = vrot.slane %v3109_v62, 1  ;;  %v477_v4 = vmax.f32 %v423_v58, 0.0 }
  0x3a   : > { %4781 = vst [vmem:[#allocation12_spill] sm:$0xff] %v3105_v1  ;;  %4783 = vst [vmem:[#allocation14_spill] sm:$0xff] %v3115_v17  ;;  %750 = vrot.lane.b32.xlu0 %v3081_v21, %s2734_s24  ;;  %v687_v26 = vrot.slane %v3105_v1, 1  ;;  %v425_v28 = vadd.f32 %v2811_v7, %v364_v63  ;;  %v478_v45 = vmax.f32 %v424_v54, 0.0  ;;  %v426_v23 = vadd.f32 %v2811_v7, %v365_v9  ;;  %v307_v0 = vld [vmem:[%s2806_s29 + $0x130] sm:$0x3] }
  0x3b   : > { %v3125_v24 = vsel %vm635_vm0, %v682_v47, %v684_v27  ;;  %v3129_v33 = vsel %vm514_vm2, %v477_v4, 0.0  ;;  %v366_v58 = vmul.f32 %v2798_v5, %v305_v15  ;;  %v367_v62 = vmul.f32 %v2798_v5, %v306_v16  ;;  %v309_v9 = vld [vmem:[%s2806_s29 + $0x140] sm:$0xff]  ;;  %v314_v21 = vld [vmem:[%s2806_s29 + $0x168] sm:$0xff] }
  0x3c   : > { %4784 = vst [vmem:[#allocation15_spill] sm:$0xff] %v3125_v24  ;;  %4785 = vst [vmem:[#allocation16_spill] sm:$0xff] %v3129_v33  ;;  %752 = vrot.lane.b32.xlu1 %v3115_v17, %s2734_s24  ;;  %v3138_v63 = vsel %vm635_vm0, %v686_v34, %v687_v26  ;;  %v689_v47 = vrot.slane %v3129_v33, 1  ;;  %v3141_v54 = vmax.f32 %v425_v28, 0.0  ;;  %v3145_v4 = vsel %vm503_vm1, %v478_v45, 0.0 }
  0x3d   : > { %4786 = vst [vmem:[#allocation17_spill] sm:$0xff] %v3138_v63  ;;  %4788 = vst [vmem:[#allocation19_spill] sm:$0xff] %v3145_v4  ;;  %v691_v15 = vrot.slane %v3145_v4, 1  ;;  %v480_v16 = vmax.f32 %v426_v23, 0.0  ;;  %v427_v27 = vadd.f32 %v2811_v7, %v366_v58  ;;  %v428_v1 = vadd.f32 %v2811_v7, %v367_v62  ;;  %v310_v4 = vld [vmem:[%s2806_s29 + $0x148] sm:$0x3] }
  0x3e   : > { %4787 = vst [vmem:[#allocation18_spill] sm:$0xff] %v3141_v54  ;;  %754 = vrot.lane.b32.xlu0 %v3125_v24, %s2734_s24  ;;  %v3154_v34 = vsel %vm635_vm0, %v687_v26, %v689_v47  ;;  %v692_v28 = vrot.slane %v3141_v54, 1  ;;  %v368_v45 = vmul.f32 %v2798_v5, %v307_v0  ;;  %v369_v33 = vmul.f32 %v2798_v5, %v308_v44  ;;  %v311_v54 = vld [vmem:[%s2806_s29 + $0x150] sm:$0xff] }
  0x3f   : > { %4789 = vst [vmem:[#allocation20_spill] sm:$0xff] %v3154_v34  ;;  %v3162_v23 = vsel %vm514_vm2, %v480_v16, 0.0  ;;  %v481_v62 = vmax.f32 %v427_v27, 0.0  ;;  %v3164_v58 = vmax.f32 %v428_v1, 0.0  ;;  %v370_v24 = vmul.f32 %v2798_v5, %v309_v9  ;;  %v312_v16 = vld [vmem:[%s2806_s29 + $0x158] sm:$0xff] }
  0x40   : > { %4790 = vst [vmem:[#allocation21_spill] sm:$0xff] %v3162_v23  ;;  %756 = vrot.lane.b32.xlu1 %v3138_v63, %s2734_s24  ;;  %v3170_v26 = vsel %vm635_vm0, %v691_v15, %v692_v28  ;;  %v694_v0 = vrot.slane %v3162_v23, 1  ;;  %v429_v44 = vadd.f32 %v2811_v7, %v368_v45  ;;  %v430_v47 = vadd.f32 %v2811_v7, %v369_v33  ;;  %v313_v63 = vld [vmem:[%s2806_s29 + $0x160] sm:$0x3] }
  0x41   : > { %4791 = vst [vmem:[#allocation22_spill] sm:$0xff] %v3164_v58  ;;  %4792 = vst [vmem:[#allocation23_spill] sm:$0xff] %v3170_v26  ;;  %v3179_v1 = vsel %vm503_vm1, %v481_v62, 0.0  ;;  %v697_v9 = vrot.slane %v3164_v58, 1  ;;  %v431_v27 = vadd.f32 %v2811_v7, %v370_v24  ;;  %v371_v15 = vmul.f32 %v2798_v5, %v310_v4 }
  0x42   : > { %4793 = vst [vmem:[#allocation24_spill] sm:$0xff] %v3179_v1  ;;  %758 = vrot.lane.b32.xlu0 %v3154_v34, %s2734_s24  ;;  %v3188_v33 = vsel %vm635_vm0, %v692_v28, %v694_v0  ;;  %v696_v45 = vrot.slane %v3179_v1, 1  ;;  %v483_v23 = vmax.f32 %v429_v44, 0.0  ;;  %v484_v17 = vmax.f32 %v430_v47, 0.0  ;;  %v315_v47 = vld [vmem:[%s2806_s29 + $0x170] sm:$0xff] }
  0x43   : > { %v3191_v62 = vmax.f32 %v431_v27, 0.0  ;;  %v432_v58 = vadd.f32 %v2811_v7, %v371_v15  ;;  %v372_v24 = vmul.f32 %v2798_v5, %v311_v54  ;;  %v373_v4 = vmul.f32 %v2798_v5, %v312_v16 }
  0x44   : > { %760 = vrot.lane.b32.xlu1 %v3170_v26, %s2734_s24  ;;  %v3200_v28 = vsel %vm635_vm0, %v696_v45, %v697_v9  ;;  %v3204_v0 = vsel %vm514_vm2, %v483_v23, 0.0  ;;  %v3208_v44 = vsel %vm503_vm1, %v484_v17, 0.0  ;;  %v374_v54 = vmul.f32 %v2798_v5, %v313_v63  ;;  %v316_v63 = vld [vmem:[%s2806_s29 + $0x178] sm:$0x3] }
  0x45   : > { %4794 = vst [vmem:[#allocation25_spill] sm:$0xff] %v3191_v62  ;;  %4795 = vst [vmem:[#allocation26_spill] sm:$0xff] %v3204_v0  ;;  %v699_v16 = vrot.slane %v3204_v0, 1  ;;  %v701_v27 = vrot.slane %v3208_v44, 1  ;;  %v702_v15 = vrot.slane %v3191_v62, 1  ;;  %v486_v1 = vmax.f32 %v432_v58, 0.0 }
  0x46   : > { %4796 = vst [vmem:[#allocation27_spill] sm:$0xff] %v3208_v44  ;;  %762 = vrot.lane.b32.xlu0 %v3188_v33, %s2734_s24  ;;  %v433_v23 = vadd.f32 %v2811_v7, %v372_v24  ;;  %v434_v45 = vadd.f32 %v2811_v7, %v373_v4  ;;  %v435_v17 = vadd.f32 %v2811_v7, %v374_v54 }
  0x47   : > { %v375_v26 = vmul.f32 %v2798_v5, %v314_v21  ;;  %v3223_v34 = vsel %vm635_vm0, %v697_v9, %v699_v16  ;;  %v3227_v44 = vsel %vm514_vm2, %v486_v1, 0.0  ;;  %v376_v58 = vmul.f32 %v2798_v5, %v315_v47 }
  0x48   : > { %4797 = vst [vmem:[#allocation28_spill] sm:$0xff] %v3223_v34  ;;  %4798 = vst [vmem:[#allocation29_spill] sm:$0xff] %v3227_v44  ;;  %764 = vrot.lane.b32.xlu1 %v3200_v28, %s2734_s24  ;;  %v704_v24 = vrot.slane %v3227_v44, 1  ;;  %v487_v4 = vmax.f32 %v433_v23, 0.0  ;;  %v3233_v62 = vmax.f32 %v434_v45, 0.0  ;;  %v489_v54 = vmax.f32 %v435_v17, 0.0 }
  0x49   : > { %v3236_v21 = vsel %vm635_vm0, %v701_v27, %v702_v15  ;;  %v436_v9 = vadd.f32 %v2811_v7, %v375_v26  ;;  %v437_v16 = vadd.f32 %v2811_v7, %v376_v58  ;;  %v377_v1 = vmul.f32 %v2798_v5, %v316_v63 }
  0x4a   : > { %4799 = vst [vmem:[#allocation30_spill] sm:$0xff] %v3233_v62  ;;  %4800 = vst [vmem:[#allocation31_spill] sm:$0xff] %v3236_v21  ;;  %766 = vrot.lane.b32.xlu0 %v3223_v34, %s2734_s24  ;;  %v3244_v47 = vsel %vm635_vm0, %v702_v15, %v704_v24  ;;  %v3248_v23 = vsel %vm503_vm1, %v487_v4, 0.0  ;;  %v707_v45 = vrot.slane %v3233_v62, 1  ;;  %v3253_v27 = vsel %vm514_vm2, %v489_v54, 0.0 }
  0x4b   : > { %4801 = vst [vmem:[#allocation32_spill] sm:$0xff] %v3244_v47  ;;  %4802 = vst [vmem:[#allocation33_spill] sm:$0xff] %v3248_v23  ;;  %v706_v26 = vrot.slane %v3248_v23, 1  ;;  %v709_v5 = vrot.slane %v3253_v27, 1  ;;  %v490_v17 = vmax.f32 %v436_v9, 0.0  ;;  %v3257_v63 = vmax.f32 %v437_v16, 0.0 }
  0x4c   : > { %4803 = vst [vmem:[#allocation34_spill] sm:$0xff] %v3253_v27  ;;  %768 = vrot.lane.b32.xlu1 %v3236_v21, %s2734_s24  ;;  %v438_v15 = vadd.f32 %v2811_v7, %v377_v1  ;;  %v4809_v1 = vmov 0.0  }
  0x4d   : > { %4804 = vst [vmem:[#allocation35_spill] sm:$0xff] %v3257_v63  ;;  %v3263_v58 = vsel %vm635_vm0, %v706_v26, %v707_v45  ;;  %v3267_v24 = vsel %vm503_vm1, %v490_v17, 0.0  ;;  %v712_v4 = vrot.slane %v3257_v63, 1  ;;  %v3274_v16 = vsel %vm635_vm0, %v707_v45, %v709_v5 }
  0x4e   : > { %4805 = vst [vmem:[#allocation36_spill] sm:$0xff] %v3263_v58  ;;  %4806 = vst [vmem:[#allocation37_spill] sm:$0xff] %v3267_v24  ;;  %770 = vrot.lane.b32.xlu0 %v3244_v47, %s2734_s24  ;;  %v711_v54 = vrot.slane %v3267_v24, 1  ;;  %v492_v9 = vmax.f32 %v438_v15, 0.0  ;;  %v813_v26 = vrot.slane %v4809_v1, 2  ;;  %v818_v5 = vrot.slane %v2851_v41, 2 }
  0x4f   : > { %4807 = vst [vmem:[#allocation38_spill] sm:$0xff] %v3274_v16  ;;  %v819_v15 = vrot.slane %v2837_v30, 2 }
  0x50   : > { %772 = vrot.lane.b32.xlu1 %v3263_v58, %s2734_s24  ;;  %v3280_v7 = vsel %vm514_vm2, %v492_v9, 0.0  ;;  %v3284_v17 = vsel %vm635_vm0, %v711_v54, %v712_v4  ;;  %v3296_v9 = vpack.i.bf16 %v813_v26, %v813_v26  ;;  %v821_v54 = vrot.slane %v2846_v39, 2 }
  0x51   : > { %4808 = vst [vmem:[#allocation39_spill] sm:$0xff] %v3280_v7  ;;  %4810 = vst [vmem:[#allocation40_spill] sm:$0xff] %v3284_v17  ;;  %v714_v3 = vrot.slane %v3280_v7, 1  ;;  %v820_v1 = vsel %vm812_vm3, %v818_v5, %v819_v15  ;;  %v826_v26 = vrot.slane %v2865_v50, 2  ;;  %v828_v7 = vrot.slane %v2871_v52, 2 }
  0x52   : > { %774 = vrot.lane.b32.xlu0 %v3274_v16, %s2734_s24  ;;  %4812 = vst [vmem:[#allocation42_spill] sm:$0xff] %v3296_v9  ;;  %v822_v6 = vsel %vm812_vm3, %v819_v15, %v821_v54  ;;  %v829_v5 = vrot.slane %v2867_v51, 2  ;;  %v833_v15 = vrot.slane %v2928_v31, 2  ;;  %v834_v54 = vrot.slane %v2919_v25, 2 }
  0x53   : > { %v3290_v45 = vsel %vm635_vm0, %v712_v4, %v714_v3  ;;  %v823_v3 = vrot.slane %v2858_v46, 2  ;;  %v824_v4 = vrot.slane %v2840_v35, 2 }
  0x54   : > { %4811 = vst [vmem:[#allocation41_spill] sm:$0xff] %v3290_v45  ;;  %776 = vrot.lane.b32.xlu1 %v3284_v17, %s2734_s24  ;;  %v3322_v50 = vsel %vm812_vm3, %v828_v7, %v829_v5  ;;  %v838_v7 = vrot.slane %v2946_v43, 2 }
  0x55   : > { %v3310_v39 = vsel %vm812_vm3, %v823_v3, %v824_v4 }
  0x56   : > { %778 = vrot.lane.b32.xlu0 %v3290_v45, %s2734_s24  ;;  %v3316_v45 = vsel %vm812_vm3, %v824_v4, %v826_v26  ;;  %v836_v4 = vrot.slane %v2938_v38, 2  ;;  %v839_v26 = vrot.slane %v2930_v32, 2 }
  0x58   : > { %2704 = vrot.lane.b32.xlu1 %v3296_v9, %s2735_s8  ;;  %v831_v9 = vrot.slane %v2924_v29, 2  ;;  %v3335_v29 = vsel %vm812_vm3, %v833_v15, %v834_v54  ;;  %v3342_v17 = vsel %vm812_vm3, %v834_v54, %v836_v4  ;;  %v3348_v38 = vsel %vm812_vm3, %v838_v7, %v839_v26 }
  0x59   : > { %v844_v15 = vrot.slane %v2979_v13, 2  ;;  %v846_v54 = vrot.slane %v3010_v40, 2  ;;  %v848_v4 = vrot.slane %v3019_v53, 2  ;;  %v4751_v7 = vrot.slane %v3012_v42, 2 }
  0x5a   : > { %897 = vrot.lane.b32.xlu0 %v820_v1, %s2735_s8  ;;  %v3329_v3 = vsel %vm812_vm3, %v829_v5, %v831_v9  ;;  %v841_v9 = vrot.slane %v2967_v61, 2  ;;  %v843_v5 = vrot.slane %v2990_v19, 2 }
  0x5b   : > { %v3368_v24 = vsel %vm812_vm3, %v844_v15, %v846_v54  ;;  %v3375_v40 = vsel %vm812_vm3, %v848_v4, %v4751_v7 }
  0x5c   : > { %899 = vrot.lane.b32.xlu1 %v822_v6, %s2735_s8  ;;  %v3355_v63 = vsel %vm812_vm3, %v839_v26, %v841_v9  ;;  %v3361_v61 = vsel %vm812_vm3, %v843_v5, %v844_v15  ;;  %v1859_v26 = vld [vmem:[%s4696_s3 + $0x20] sm:$0xf] }
  0x5d   : > { %2612 = vmatprep.subr.msk.mxu0 %vm1957_vm4, %v1859_v26  ;;  %2670 = vmatprep.subr.msk.mxu1 %vm1957_vm4, %v1859_v26 }
  0x5e   : > { %901 = vrot.lane.b32.xlu0 %v3310_v39, %s2735_s8  ;;  %2613 = vmatpush3.msk.msra.mxu0 %vm1957_vm4, %v1859_v26 }
  0x5f   : > { %2675 = vmatpush3.msk.msra.mxu1 %vm1957_vm4, %v1859_v26 }
  0x60   : > { %903 = vrot.lane.b32.xlu1 %v3316_v45, %s2735_s8 }
  0x62   : > { %905 = vrot.lane.b32.xlu0 %v3322_v50, %s2735_s8 }
  0x64   : > { %907 = vrot.lane.b32.xlu1 %v3329_v3, %s2735_s8 }
  0x66   : > { %909 = vrot.lane.b32.xlu0 %v3335_v29, %s2735_s8 }
  0x68   : > { %911 = vrot.lane.b32.xlu1 %v3342_v17, %s2735_s8 }
  0x6a   : > { %913 = vrot.lane.b32.xlu0 %v3348_v38, %s2735_s8 }
  0x6c   : > { %915 = vrot.lane.b32.xlu1 %v3355_v63, %s2735_s8 }
  0x6e   : > { %917 = vrot.lane.b32.xlu0 %v3361_v61, %s2735_s8 }
  0x70   : > { %919 = vrot.lane.b32.xlu1 %v3368_v24, %s2735_s8 }
  0x72   : > { %921 = vrot.lane.b32.xlu0 %v3375_v40, %s2735_s8 }
  0x74   : > { %991 = vrot.lane.b32.xlu1 %v2851_v41, %s2736_s9 }
  0x76   : > { %993 = vrot.lane.b32.xlu0 %v2837_v30, %s2736_s9 }
  0x78   : > { %1093 = vrot.lane.b32.xlu1 %v2879_v56, %s2737_s10  ;;  %v1856_v56 = vld [vmem:[%s4696_s3 + $0x8] sm:$0xff] }
  0x7a   : > { %1095 = vrot.lane.b32.xlu0 %v2876_v55, %s2737_s10  ;;  %v1858_v55 = vld [vmem:[%s4696_s3 + $0x18] sm:$0xff] }
  0x7b   : > { %2614 = vmatprep.subr.mxu0 %v1858_v55  ;;  %2671 = vmatprep.subr.mxu1 %v1858_v55 }
  0x7c   : > { %1194 = vrot.lane.b32.xlu1 %v820_v1, %s2738_s11  ;;  %2615 = vmatpush3.msra.mxu0 %v1858_v55  ;;  %v1855_v1 = vld [vmem:[%s4696_s3] sm:$0xff] }
  0x7d   : > { %2676 = vmatpush3.msra.mxu1 %v1858_v55 }
  0x7e   : > { %1196 = vrot.lane.b32.xlu0 %v822_v6, %s2738_s11  ;;  %v1857_v6 = vld [vmem:[%s4696_s3 + $0x10] sm:$0xff] }
  0x7f   : > { %2616 = vmatprep.subr.mxu0 %v1857_v6  ;;  %2672 = vmatprep.subr.mxu1 %v1857_v6 }
  0x80   : > { %1292 = vrot.lane.b32.xlu1 %v2858_v46, %s2739_s14  ;;  %2617 = vmatpush3.msra.mxu0 %v1857_v6 }
  0x81   : > { %2618 = vmatprep.subr.mxu0 %v1856_v56  ;;  %2677 = vmatpush3.msra.mxu1 %v1857_v6 }
  0x82   : > { %995 = vrot.lane.b32.xlu0 %v2858_v46, %s2736_s9  ;;  %2619 = vmatpush3.msra.mxu0 %v1856_v56  ;;  %v3416_v9 = vpop.permute.xlu0 %2699 }
  0x83   : > { %2620 = vmatprep.subr.mxu0 %v1855_v1  ;;  %2673 = vmatprep.subr.mxu1 %v1856_v56 }
  0x84   : > { %1294 = vrot.lane.b32.xlu1 %v2840_v35, %s2739_s14  ;;  %2621 = vmatpush3.msra.mxu0 %v1855_v1 }
  0x85   : > { %2678 = vmatpush3.msra.mxu1 %v1856_v56 }
  0x86   : > { %1394 = vrot.lane.b32.xlu0 %v2889_v60, %s2740_s23  ;;  %2674 = vmatprep.subr.mxu1 %v1855_v1 }
  0x87   : > { %2679 = vmatpush3.msra.mxu1 %v1855_v1 }
  0x88   : > { %997 = vrot.lane.b32.xlu1 %v2840_v35, %s2736_s9 }
  0x8a   : > { %1097 = vrot.lane.b32.xlu0 %v2889_v60, %s2737_s10 }
  0x8c   : > { %1396 = vrot.lane.b32.xlu1 %v2896_v2, %s2740_s23 }
  0x8e   : > { %1495 = vrot.lane.b32.xlu0 %v3310_v39, %s2741_s26  ;;  %v3424_v5 = vpop.permute.xlu1 %722  ;;  %v3426_v15 = vpop.permute.xlu0 %720 }
  0x90   : > { %1099 = vrot.lane.b32.xlu1 %v2896_v2, %s2737_s10 }
  0x92   : > { %1198 = vrot.lane.b32.xlu0 %v3310_v39, %s2738_s11  ;;  %v3432_v60 = vpop.permute.xlu1 %724  ;;  %v3434_v54 = vpop.permute.xlu0 %726 }
  0x94   : > { %1497 = vrot.lane.b32.xlu1 %v3316_v45, %s2741_s26 }
  0x96   : > { %1200 = vrot.lane.b32.xlu0 %v3316_v45, %s2738_s11  ;;  %v3440_v4 = vpop.permute.xlu1 %728 }
  0x98   : > { %v3442_v26 = vpop.permute.xlu0 %730  ;;  %1296 = vrot.lane.b32.xlu1 %v2871_v52, %s2739_s14 }
  0x9a   : > { %999 = vrot.lane.b32.xlu0 %v2871_v52, %s2736_s9  ;;  %v3448_v2 = vpop.permute.xlu1 %732 }
  0x9c   : > { %v3450_v39 = vpop.permute.xlu0 %734  ;;  %1298 = vrot.lane.b32.xlu1 %v2867_v51, %s2739_s14 }
  0x9e   : > { %1398 = vrot.lane.b32.xlu0 %v2903_v12, %s2740_s23  ;;  %v3456_v45 = vpop.permute.xlu1 %736 }
  0xa0   : > { %v3458_v55 = vpop.permute.xlu0 %738  ;;  %1001 = vrot.lane.b32.xlu1 %v2867_v51, %s2736_s9 }
  0xa2   : > { %1101 = vrot.lane.b32.xlu0 %v2903_v12, %s2737_s10  ;;  %v3464_v6 = vpop.permute.xlu1 %740 }
  0xa4   : > { %v3466_v56 = vpop.permute.xlu0 %742  ;;  %1400 = vrot.lane.b32.xlu1 %v2951_v48, %s2740_s23 }
  0xa5   : > { %4813 = vst [vmem:[#allocation43_spill] sm:$0xff] %v3466_v56  ;;  %v2702_v56 = vunpack.i.h.bf16 %v3416_v9 }
  0xa6   : > { %1499 = vrot.lane.b32.xlu0 %v3322_v50, %s2741_s26  ;;  %v3472_v1 = vpop.permute.xlu1 %744 }
  0xa7   : > { %4814 = vst [vmem:[#allocation44_spill] sm:$0xff] %v3472_v1 }
  0xa8   : > { %v3474_v7 = vpop.permute.xlu0 %746  ;;  %1103 = vrot.lane.b32.xlu1 %v2951_v48, %s2737_s10 }
  0xa9   : > { %4815 = vst [vmem:[#allocation45_spill] sm:$0xff] %v3474_v7 }
  0xaa   : > { %1202 = vrot.lane.b32.xlu0 %v3322_v50, %s2738_s11  ;;  %v3480_v12 = vpop.permute.xlu1 %748 }
  0xab   : > { %4816 = vst [vmem:[#allocation46_spill] sm:$0xff] %v3480_v12 }
  0xac   : > { %v3482_v27 = vpop.permute.xlu0 %750  ;;  %1501 = vrot.lane.b32.xlu1 %v3329_v3, %s2741_s26 }
  0xad   : > { %4817 = vst [vmem:[#allocation47_spill] sm:$0xff] %v3482_v27 }
  0xae   : > { %1204 = vrot.lane.b32.xlu0 %v3329_v3, %s2738_s11  ;;  %v3488_v16 = vpop.permute.xlu1 %752 }
  0xaf   : > { %4818 = vst [vmem:[#allocation48_spill] sm:$0xff] %v3488_v16 }
  0xb0   : > { %v3490_v58 = vpop.permute.xlu0 %754  ;;  %1300 = vrot.lane.b32.xlu1 %v2928_v31, %s2739_s14 }
  0xb1   : > { %4819 = vst [vmem:[#allocation49_spill] sm:$0xff] %v3490_v58 }
  0xb2   : > { %1003 = vrot.lane.b32.xlu0 %v2928_v31, %s2736_s9  ;;  %v3496_v48 = vpop.permute.xlu1 %756 }
  0xb3   : > { %4820 = vst [vmem:[#allocation50_spill] sm:$0xff] %v3496_v48 }
  0xb4   : > { %v3498_v50 = vpop.permute.xlu0 %758  ;;  %1302 = vrot.lane.b32.xlu1 %v2919_v25, %s2739_s14 }
  0xb5   : > { %4821 = vst [vmem:[#allocation51_spill] sm:$0xff] %v3498_v50 }
  0xb6   : > { %1402 = vrot.lane.b32.xlu0 %v2954_v49, %s2740_s23  ;;  %v3504_v3 = vpop.permute.xlu1 %760 }
  0xb7   : > { %4822 = vst [vmem:[#allocation52_spill] sm:$0xff] %v3504_v3 }
  0xb8   : > { %v3506_v16 = vpop.permute.xlu0 %762  ;;  %1005 = vrot.lane.b32.xlu1 %v2919_v25, %s2736_s9 }
  0xb9   : > { %4823 = vst [vmem:[#allocation53_spill] sm:$0xff] %v3506_v16 }
  0xba   : > { %1105 = vrot.lane.b32.xlu0 %v2954_v49, %s2737_s10  ;;  %v3512_v58 = vpop.permute.xlu1 %764 }
  0xbb   : > { %4824 = vst [vmem:[#allocation54_spill] sm:$0xff] %v3512_v58 }
  0xbc   : > { %v3514_v48 = vpop.permute.xlu0 %766  ;;  %1404 = vrot.lane.b32.xlu1 %v2963_v59, %s2740_s23 }
  0xbd   : > { %4825 = vst [vmem:[#allocation55_spill] sm:$0xff] %v3514_v48 }
  0xbe   : > { %1503 = vrot.lane.b32.xlu0 %v3335_v29, %s2741_s26  ;;  %v3520_v50 = vpop.permute.xlu1 %768 }
  0xbf   : > { %4826 = vst [vmem:[#allocation56_spill] sm:$0xff] %v3520_v50 }
  0xc0   : > { %v3522_v3 = vpop.permute.xlu0 %770  ;;  %1107 = vrot.lane.b32.xlu1 %v2963_v59, %s2737_s10 }
  0xc1   : > { %4827 = vst [vmem:[#allocation57_spill] sm:$0xff] %v3522_v3 }
  0xc2   : > { %1206 = vrot.lane.b32.xlu0 %v3335_v29, %s2738_s11  ;;  %v3528_v49 = vpop.permute.xlu1 %772 }
  0xc3   : > { %4828 = vst [vmem:[#allocation58_spill] sm:$0xff] %v3528_v49 }
  0xc4   : > { %v3530_v58 = vpop.permute.xlu0 %774  ;;  %1505 = vrot.lane.b32.xlu1 %v3342_v17, %s2741_s26 }
  0xc5   : > { %4829 = vst [vmem:[#allocation59_spill] sm:$0xff] %v3530_v58 }
  0xc6   : > { %1208 = vrot.lane.b32.xlu0 %v3342_v17, %s2738_s11  ;;  %v3536_v48 = vpop.permute.xlu1 %776 }
  0xc7   : > { %4830 = vst [vmem:[#allocation60_spill] sm:$0xff] %v3536_v48 }
  0xc8   : > { %v3538_v50 = vpop.permute.xlu0 %778  ;;  %1304 = vrot.lane.b32.xlu1 %v2946_v43, %s2739_s14 }
  0xc9   : > { %4831 = vst [vmem:[#allocation61_spill] sm:$0xff] %v3538_v50 }
  0xca   : > { %1007 = vrot.lane.b32.xlu0 %v2946_v43, %s2736_s9  ;;  %v3544_v59 = vpop.permute.xlu1 %2704 }
  0xcc   : > { %v3546_v29 = vpop.permute.xlu0 %897  ;;  %1306 = vrot.lane.b32.xlu1 %v2930_v32, %s2739_s14 }
  0xce   : > { %1406 = vrot.lane.b32.xlu0 %v2973_v8, %s2740_s23  ;;  %v3552_v17 = vpop.permute.xlu1 %899 }
  0xd0   : > { %v3554_v48 = vpop.permute.xlu0 %901  ;;  %1009 = vrot.lane.b32.xlu1 %v2930_v32, %s2736_s9 }
  0xd2   : > { %1109 = vrot.lane.b32.xlu0 %v2973_v8, %s2737_s10  ;;  %v3560_v50 = vpop.permute.xlu1 %903 }
  0xd4   : > { %v3562_v58 = vpop.permute.xlu0 %905  ;;  %1408 = vrot.lane.b32.xlu1 %v2986_v18, %s2740_s23 }
  0xd6   : > { %1507 = vrot.lane.b32.xlu0 %v3348_v38, %s2741_s26  ;;  %v3568_v49 = vpop.permute.xlu1 %907 }
  0xd8   : > { %v3570_v3 = vpop.permute.xlu0 %909  ;;  %1111 = vrot.lane.b32.xlu1 %v2986_v18, %s2737_s10 }
  0xda   : > { %1210 = vrot.lane.b32.xlu0 %v3348_v38, %s2738_s11  ;;  %v3576_v8 = vpop.permute.xlu1 %911 }
  0xdc   : > { %v3578_v16 = vpop.permute.xlu0 %913  ;;  %1509 = vrot.lane.b32.xlu1 %v3355_v63, %s2741_s26 }
  0xde   : > { %1212 = vrot.lane.b32.xlu0 %v3355_v63, %s2738_s11  ;;  %v3584_v27 = vpop.permute.xlu1 %915 }
  0xe0   : > { %v3586_v12 = vpop.permute.xlu0 %917  ;;  %1308 = vrot.lane.b32.xlu1 %v2990_v19, %s2739_s14 }
  0xe1   : > { %4832 = vst [vmem:[#allocation62_spill] sm:$0xff] %v3586_v12 }
  0xe2   : > { %1011 = vrot.lane.b32.xlu0 %v2990_v19, %s2736_s9  ;;  %v3592_v18 = vpop.permute.xlu1 %919 }
  0xe3   : > { %4833 = vst [vmem:[#allocation63_spill] sm:$0xff] %v3592_v18  ;;  %v2706_v18 = vunpack.i.l.bf16 %v3544_v59 }
  0xe4   : > { %v3594_v38 = vpop.permute.xlu0 %921  ;;  %1310 = vrot.lane.b32.xlu1 %v2979_v13, %s2739_s14 }
  0xe5   : > { %4834 = vst [vmem:[#allocation64_spill] sm:$0xff] %v3594_v38 }
  0xe6   : > { %1410 = vrot.lane.b32.xlu0 %v3006_v37, %s2740_s23  ;;  %v992_v63 = vpop.permute.xlu1 %991 }
  0xe8   : > { %v994_v62 = vpop.permute.xlu0 %993  ;;  %1013 = vrot.lane.b32.xlu1 %v2979_v13, %s2736_s9 }
  0xea   : > { %1113 = vrot.lane.b32.xlu0 %v3006_v37, %s2737_s10  ;;  %v1094_v23 = vpop.permute.xlu1 %1093  ;;  %v2701_v37 = vunpack.i.l.bf16 %v3416_v9 }
  0xec   : > { %v1096_v7 = vpop.permute.xlu0 %1095  ;;  %1412 = vrot.lane.b32.xlu1 %v3029_v10, %s2740_s23 }
  0xee   : > { %1511 = vrot.lane.b32.xlu0 %v3361_v61, %s2741_s26  ;;  %v1195_v44 = vpop.permute.xlu1 %1194 }
  0xf0   : > { %v1197_v47 = vpop.permute.xlu0 %1196  ;;  %1115 = vrot.lane.b32.xlu1 %v3029_v10, %s2737_s10  ;;  %v1592_v10 = vsel %vm1591_vm5, 0.0, %v2701_v37  ;;  %v2707_v37 = vunpack.i.h.bf16 %v3544_v59 }
  0xf2   : > { %1214 = vrot.lane.b32.xlu0 %v3361_v61, %s2738_s11  ;;  %v1293_v38 = vpop.permute.xlu1 %1292 }
  0xf4   : > { %v3612_v1 = vpop.permute.xlu0 %995  ;;  %1513 = vrot.lane.b32.xlu1 %v3368_v24, %s2741_s26 }
  0xf6   : > { %1216 = vrot.lane.b32.xlu0 %v3368_v24, %s2738_s11  ;;  %v1295_v21 = vpop.permute.xlu1 %1294  ;;  %v1625_v24 = vsel %vm1624_vm7, %v1592_v10, %v2706_v18 }
  0xf7   : > { %v1658_v0 = vsel %vm1657_vm6, %v1625_v24, %v992_v63  ;;  %v1593_v63 = vsel %vm1591_vm5, 0.0, %v2702_v56 }
  0xf8   : > { %v1395_v13 = vpop.permute.xlu0 %1394  ;;  %1312 = vrot.lane.b32.xlu1 %v3019_v53, %s2739_s14  ;;  %v1691_v12 = vsel %vm1690_vm8, %v1658_v0, %v1094_v23  ;;  %v1626_v0 = vsel %vm1624_vm7, %v1593_v63, %v2707_v37 }
  0xf9   : > { %v1659_v23 = vsel %vm1657_vm6, %v1626_v0, %v994_v62 }
  0xfa   : > { %1015 = vrot.lane.b32.xlu0 %v3019_v53, %s2736_s9  ;;  %v3625_v61 = vpop.permute.xlu1 %997  ;;  %v1724_v53 = vsel %vm1723_vm9, %v1691_v12, %v1195_v44  ;;  %v1692_v56 = vsel %vm1690_vm8, %v1659_v23, %v1096_v7 }
  0xfb   : > { %v1757_v9 = vsel %vm1756_vm10, %v1724_v53, %v1293_v38  ;;  %v851_v38 = vrot.slane %v3033_v11, 2 }
  0xfc   : > { %v1098_v34 = vpop.permute.xlu0 %1097  ;;  %1314 = vrot.lane.b32.xlu1 %v3012_v42, %s2739_s14  ;;  %v1790_v10 = vsel %vm1789_vm11, %v1757_v9, %v1395_v13  ;;  %v1725_v13 = vsel %vm1723_vm9, %v1692_v56, %v1197_v47  ;;  %v4835_v47 = vrot.slane %v3012_v42, 2 }
  0xfd   : > { %v1758_v59 = vsel %vm1756_vm10, %v1725_v13, %v1295_v21 }
  0xfe   : > { %1414 = vrot.lane.b32.xlu0 %v3043_v20, %s2740_s23  ;;  %v1397_v18 = vpop.permute.xlu1 %1396  ;;  %v852_v21 = vsel %vm812_vm3, %v4835_v47, %v851_v38  ;;  %v4836_v47 = vld [vmem:[#allocation8_spill] sm:$0xff] }
  0xff   : > { %v1791_v62 = vsel %vm1789_vm11, %v1758_v59, %v1397_v18  ;;  %v854_v59 = vrot.slane %v3035_v14, 2 }
 0x100   : > { %v1496_v24 = vpop.permute.xlu0 %1495  ;;  %1017 = vrot.lane.b32.xlu1 %v3012_v42, %s2736_s9 }
 0x101   : > { %v1823_v44 = vsel %vm1822_vm12, %v1790_v10, %v1496_v24 }
 0x102   : > { %1117 = vrot.lane.b32.xlu0 %v3043_v20, %s2737_s10  ;;  %2622 = vmatprep.mubr.msk.f32.mxu0 %vm1860_vm13, %v1823_v44  ;;  %v1100_v53 = vpop.permute.xlu1 %1099 }
 0x104   : > { %v1199_v12 = vpop.permute.xlu0 %1198  ;;  %1416 = vrot.lane.b32.xlu1 %v3059_v36, %s2740_s23 }
 0x106   : > { %1515 = vrot.lane.b32.xlu0 %v3375_v40, %s2741_s26  ;;  %v1498_v20 = vpop.permute.xlu1 %1497 }
 0x107   : > { %v1824_v37 = vsel %vm1822_vm12, %v1791_v62, %v1498_v20 }
 0x108   : > { %v1201_v9 = vpop.permute.xlu0 %1200  ;;  %1119 = vrot.lane.b32.xlu1 %v3059_v36, %s2737_s10  ;;  %2623 = vmatmul.mubr.msk.f32.vlgmr.msra.gmra.mxu0 %vm1860_vm13, %v1824_v37  ;;  %v1594_v36 = vsel %vm1591_vm5, %v2851_v41, %v3426_v15 }
 0x10a   : > { %1218 = vrot.lane.b32.xlu0 %v3375_v40, %s2738_s11  ;;  %v1297_v11 = vpop.permute.xlu1 %1296  ;;  %v1627_v40 = vsel %vm1624_vm7, %v1594_v36, %v3546_v29  ;;  %v1595_v29 = vsel %vm1591_vm5, %v2837_v30, %v3424_v5 }
 0x10b   : > { %v1660_v24 = vsel %vm1657_vm6, %v1627_v40, %v3612_v1 }
 0x10c   : > { %v1000_v7 = vpop.permute.xlu0 %999  ;;  %1517 = vrot.lane.b32.xlu1 %v852_v21, %s2741_s26  ;;  %v1693_v44 = vsel %vm1690_vm8, %v1660_v24, %v1098_v34  ;;  %v1628_v34 = vsel %vm1624_vm7, %v1595_v29, %v3552_v17 }
 0x10d   : > { %v1726_v23 = vsel %vm1723_vm9, %v1693_v44, %v1199_v12  ;;  %v853_v12 = vrot.slane %v3048_v22, 2  ;;  %v1661_v38 = vsel %vm1657_vm6, %v1628_v34, %v3625_v61  ;;  %v1596_v44 = vsel %vm1591_vm5, %v2858_v46, %v3432_v60 }
 0x10e   : > { %1220 = vrot.lane.b32.xlu0 %v852_v21, %s2738_s11  ;;  %v1299_v18 = vpop.permute.xlu1 %1298  ;;  %v1759_v15 = vsel %vm1756_vm10, %v1726_v23, %v1297_v11  ;;  %v1694_v5 = vsel %vm1690_vm8, %v1661_v38, %v1100_v53  ;;  %v4839_v38 = vld [vmem:[#allocation9_spill] sm:$0xff] }
 0x10f   : > { %v1727_v62 = vsel %vm1723_vm9, %v1694_v5, %v1201_v9  ;;  %v855_v37 = vsel %vm812_vm3, %v853_v12, %v854_v59 }
 0x110   : > { %v1399_v63 = vpop.permute.xlu0 %1398  ;;  %1316 = vrot.lane.b32.xlu1 %v3048_v22, %s2739_s14  ;;  %v1760_v20 = vsel %vm1756_vm10, %v1727_v62, %v1299_v18 }
 0x111   : > { %v1792_v1 = vsel %vm1789_vm11, %v1759_v15, %v1399_v63  ;;  %v4837_v63 = vld [vmem:[#allocation7_spill] sm:$0xff] }
 0x112   : > { %923 = vrot.lane.b32.xlu0 %v852_v21, %s2735_s8  ;;  %v3674_v10 = vpop.permute.xlu1 %1001  ;;  %v856_v53 = vrot.slane %v4837_v63, 2 }
 0x114   : > { %v1102_v0 = vpop.permute.xlu0 %1101  ;;  %1019 = vrot.lane.b32.xlu1 %v3048_v22, %s2736_s9  ;;  %v857_v9 = vsel %vm812_vm3, %v854_v59, %v856_v53  ;;  %v4842_v53 = vld [vmem:[#allocation11_spill] sm:$0xff] }
 0x116   : > { %1318 = vrot.lane.b32.xlu0 %v3035_v14, %s2739_s14  ;;  %v1401_v41 = vpop.permute.xlu1 %1400 }
 0x117   : > { %v1793_v61 = vsel %vm1789_vm11, %v1760_v20, %v1401_v41  ;;  %v1629_v41 = vsel %vm1624_vm7, %v1596_v44, %v3554_v48  ;;  %v1598_v44 = vsel %vm1591_vm5, %v2871_v52, %v3440_v4  ;;  %v1599_v4 = vsel %vm1591_vm5, %v2867_v51, %v3442_v26 }
 0x118   : > { %v1500_v56 = vpop.permute.xlu0 %1499  ;;  %1418 = vrot.lane.b32.xlu1 %v3069_v57, %s2740_s23  ;;  %v1662_v15 = vsel %vm1657_vm6, %v1629_v41, %v1000_v7 }
 0x119   : > { %v1825_v13 = vsel %vm1822_vm12, %v1792_v1, %v1500_v56  ;;  %v4838_v1 = vld [vmem:[#allocation10_spill] sm:$0xff]  ;;  %v1695_v56 = vsel %vm1690_vm8, %v1662_v15, %v1102_v0  ;;  %v1631_v15 = vsel %vm1624_vm7, %v1598_v44, %v3562_v58 }
 0x11a   : > { %1021 = vrot.lane.b32.xlu0 %v3035_v14, %s2736_s9  ;;  %2625 = vmatprep.mubr.msk.f32.mxu0 %vm1860_vm13, %v1825_v13  ;;  %v1104_v30 = vpop.permute.xlu1 %1103  ;;  %v1597_v13 = vsel %vm1591_vm5, %v2840_v35, %v3434_v54  ;;  %v858_v20 = vrot.slane %v4838_v1, 2 }
 0x11b   : > { %v1630_v0 = vsel %vm1624_vm7, %v1597_v13, %v3560_v50 }
 0x11c   : > { %v1203_v17 = vpop.permute.xlu0 %1202  ;;  %1121 = vrot.lane.b32.xlu1 %v3069_v57, %s2737_s10  ;;  %v1663_v59 = vsel %vm1657_vm6, %v1630_v0, %v3674_v10  ;;  %v859_v10 = vrot.slane %v4839_v38, 2 }
 0x11d   : > { %v1728_v34 = vsel %vm1723_vm9, %v1695_v56, %v1203_v17  ;;  %v1696_v54 = vsel %vm1690_vm8, %v1663_v59, %v1104_v30  ;;  %v4840_v17 = vld [vmem:[#allocation14_spill] sm:$0xff] }
 0x11e   : > { %1420 = vrot.lane.b32.xlu0 %v4836_v47, %s2740_s23  ;;  %v1502_v21 = vpop.permute.xlu1 %1501 }
 0x11f   : > { %v1826_v11 = vsel %vm1822_vm12, %v1793_v61, %v1502_v21  ;;  %v860_v21 = vsel %vm812_vm3, %v858_v20, %v859_v10 }
 0x120   : > { %v1205_v36 = vpop.permute.xlu0 %1204  ;;  %1519 = vrot.lane.b32.xlu1 %v855_v37, %s2741_s26  ;;  %2626 = vmatmul.mubr.msk.f32.gmra.mxu0 %vm1860_vm13, %v1826_v11  ;;  %v4841_v11 = vld [vmem:[#allocation15_spill] sm:$0xff] }
 0x121   : > { %v1729_v5 = vsel %vm1723_vm9, %v1696_v54, %v1205_v36  ;;  %v861_v36 = vrot.slane %v4842_v53, 2  ;;  %v1600_v53 = vsel %vm1591_vm5, %v2928_v31, %v3448_v2 }
 0x122   : > { %1123 = vrot.lane.b32.xlu0 %v4836_v47, %s2737_s10  ;;  %v1301_v57 = vpop.permute.xlu1 %1300 }
 0x123   : > { %v1761_v60 = vsel %vm1756_vm10, %v1728_v34, %v1301_v57 }
 0x124   : > { %v1004_v18 = vpop.permute.xlu0 %1003  ;;  %1222 = vrot.lane.b32.xlu1 %v855_v37, %s2738_s11 }
 0x125   : > { %v1664_v56 = vsel %vm1657_vm6, %v1631_v15, %v1004_v18  ;;  %v4843_v18 = vld [vmem:[#allocation13_spill] sm:$0xff] }
 0x126   : > { %1521 = vrot.lane.b32.xlu0 %v857_v9, %s2741_s26  ;;  %v1303_v40 = vpop.permute.xlu1 %1302 }
 0x127   : > { %v1762_v50 = vsel %vm1756_vm10, %v1729_v5, %v1303_v40  ;;  %v862_v40 = vsel %vm812_vm3, %v859_v10, %v861_v36  ;;  %v4844_v5 = vld [vmem:[#allocation12_spill] sm:$0xff] }
 0x128   : > { %v1403_v24 = vpop.permute.xlu0 %1402  ;;  %925 = vrot.lane.b32.xlu1 %v855_v37, %s2735_s8  ;;  %v864_v20 = vrot.slane %v4844_v5, 2 }
 0x129   : > { %v1794_v48 = vsel %vm1789_vm11, %v1761_v60, %v1403_v24 }
 0x12a   : > { %1224 = vrot.lane.b32.xlu0 %v857_v9, %s2738_s11  ;;  %v3726_v23 = vpop.permute.xlu1 %1005 }
 0x12c   : > { %v1106_v29 = vpop.permute.xlu0 %1105  ;;  %1320 = vrot.lane.b32.xlu1 %v4838_v1, %s2739_s14 }
 0x12e   : > { %927 = vrot.lane.b32.xlu0 %v857_v9, %s2735_s8  ;;  %v1405_v46 = vpop.permute.xlu1 %1404 }
 0x12f   : > { %v1795_v37 = vsel %vm1789_vm11, %v1762_v50, %v1405_v46  ;;  %v1697_v46 = vsel %vm1690_vm8, %v1664_v56, %v1106_v29  ;;  %v1632_v29 = vsel %vm1624_vm7, %v1599_v4, %v3568_v49  ;;  %v4845_v50 = vld [vmem:[#allocation17_spill] sm:$0xff] }
 0x130   : > { %v1504_v7 = vpop.permute.xlu0 %1503  ;;  %1023 = vrot.lane.b32.xlu1 %v4838_v1, %s2736_s9  ;;  %v1665_v0 = vsel %vm1657_vm6, %v1632_v29, %v3726_v23 }
 0x131   : > { %v1827_v12 = vsel %vm1822_vm12, %v1794_v48, %v1504_v7 }
 0x132   : > { %1322 = vrot.lane.b32.xlu0 %v4839_v38, %s2739_s14  ;;  %2628 = vmatprep.mubr.msk.f32.mxu0 %vm1860_vm13, %v1827_v12  ;;  %v1108_v35 = vpop.permute.xlu1 %1107 }
 0x133   : > { %v1698_v51 = vsel %vm1690_vm8, %v1665_v0, %v1108_v35  ;;  %v863_v35 = vrot.slane %v4843_v18, 2  ;;  %v4849_v0 = vld [vmem:[#allocation18_spill] sm:$0xff] }
 0x134   : > { %v1207_v62 = vpop.permute.xlu0 %1206  ;;  %1422 = vrot.lane.b32.xlu1 %v4840_v17, %s2740_s23 }
 0x135   : > { %v1730_v60 = vsel %vm1723_vm9, %v1697_v46, %v1207_v62 }
 0x136   : > { %1025 = vrot.lane.b32.xlu0 %v4839_v38, %s2736_s9  ;;  %v1506_v61 = vpop.permute.xlu1 %1505 }
 0x137   : > { %v1828_v30 = vsel %vm1822_vm12, %v1795_v37, %v1506_v61  ;;  %v865_v61 = vsel %vm812_vm3, %v863_v35, %v864_v20 }
 0x138   : > { %v1209_v47 = vpop.permute.xlu0 %1208  ;;  %1125 = vrot.lane.b32.xlu1 %v4840_v17, %s2737_s10  ;;  %2629 = vmatmul.mubr.msk.f32.gmra.mxu0 %vm1860_vm13, %v1828_v30  ;;  %v4846_v30 = vld [vmem:[#allocation20_spill] sm:$0xff] }
 0x139   : > { %v1731_v26 = vsel %vm1723_vm9, %v1698_v51, %v1209_v47 }
 0x13a   : > { %1424 = vrot.lane.b32.xlu0 %v4841_v11, %s2740_s23  ;;  %v1305_v63 = vpop.permute.xlu1 %1304 }
 0x13b   : > { %v1763_v52 = vsel %vm1756_vm10, %v1730_v60, %v1305_v63 }
 0x13c   : > { %v1008_v57 = vpop.permute.xlu0 %1007  ;;  %1523 = vrot.lane.b32.xlu1 %v860_v21, %s2741_s26 }
 0x13e   : > { %1127 = vrot.lane.b32.xlu0 %v4841_v11, %s2737_s10  ;;  %v1307_v9 = vpop.permute.xlu1 %1306 }
 0x13f   : > { %v1764_v49 = vsel %vm1756_vm10, %v1731_v26, %v1307_v9  ;;  %v1633_v9 = vsel %vm1624_vm7, %v1600_v53, %v3570_v3  ;;  %v1601_v3 = vsel %vm1591_vm5, %v2919_v25, %v3450_v39  ;;  %v4850_v26 = vld [vmem:[#allocation23_spill] sm:$0xff] }
 0x140   : > { %v1407_v24 = vpop.permute.xlu0 %1406  ;;  %1226 = vrot.lane.b32.xlu1 %v860_v21, %s2738_s11 }
 0x141   : > { %v1796_v58 = vsel %vm1789_vm11, %v1763_v52, %v1407_v24  ;;  %v1666_v24 = vsel %vm1657_vm6, %v1633_v9, %v1008_v57  ;;  %v1634_v57 = vsel %vm1624_vm7, %v1601_v3, %v3576_v8 }
 0x142   : > { %1525 = vrot.lane.b32.xlu0 %v862_v40, %s2741_s26  ;;  %v3778_v41 = vpop.permute.xlu1 %1009 }
 0x144   : > { %v1110_v34 = vpop.permute.xlu0 %1109  ;;  %929 = vrot.lane.b32.xlu1 %v860_v21, %s2735_s8  ;;  %v4847_v21 = vld [vmem:[#allocation16_spill] sm:$0xff] }
 0x145   : > { %v866_v11 = vrot.slane %v4847_v21, 2  ;;  %v1699_v15 = vsel %vm1690_vm8, %v1666_v24, %v1110_v34 }
 0x146   : > { %1228 = vrot.lane.b32.xlu0 %v862_v40, %s2738_s11  ;;  %v1409_v13 = vpop.permute.xlu1 %1408 }
 0x147   : > { %v1797_v54 = vsel %vm1789_vm11, %v1764_v49, %v1409_v13  ;;  %v1667_v13 = vsel %vm1657_vm6, %v1634_v57, %v3778_v41  ;;  %v869_v49 = vrot.slane %v4849_v0, 2 }
 0x148   : > { %v1508_v48 = vpop.permute.xlu0 %1507  ;;  %1324 = vrot.lane.b32.xlu1 %v4843_v18, %s2739_s14 }
 0x149   : > { %v1829_v7 = vsel %vm1822_vm12, %v1796_v58, %v1508_v48  ;;  %v4848_v58 = vld [vmem:[#allocation19_spill] sm:$0xff] }
 0x14a   : > { %931 = vrot.lane.b32.xlu0 %v862_v40, %s2735_s8  ;;  %2631 = vmatprep.mubr.msk.f32.mxu0 %vm1860_vm13, %v1829_v7  ;;  %v1112_v12 = vpop.permute.xlu1 %1111  ;;  %v867_v40 = vsel %vm812_vm3, %v864_v20, %v866_v11  ;;  %v4851_v20 = vld [vmem:[#allocation21_spill] sm:$0xff] }
 0x14b   : > { %v1700_v25 = vsel %vm1690_vm8, %v1667_v13, %v1112_v12 }
 0x14c   : > { %v1211_v59 = vpop.permute.xlu0 %1210  ;;  %1027 = vrot.lane.b32.xlu1 %v4843_v18, %s2736_s9 }
 0x14d   : > { %v1732_v56 = vsel %vm1723_vm9, %v1699_v15, %v1211_v59  ;;  %v868_v59 = vrot.slane %v4848_v58, 2 }
 0x14e   : > { %1326 = vrot.lane.b32.xlu0 %v4844_v5, %s2739_s14  ;;  %v1510_v23 = vpop.permute.xlu1 %1509 }
 0x14f   : > { %v1830_v62 = vsel %vm1822_vm12, %v1797_v54, %v1510_v23 }
 0x150   : > { %v1213_v17 = vpop.permute.xlu0 %1212  ;;  %1426 = vrot.lane.b32.xlu1 %v4845_v50, %s2740_s23  ;;  %2632 = vmatmul.mubr.msk.f32.gmra.mxu0 %vm1860_vm13, %v1830_v62  ;;  %v870_v62 = vsel %vm812_vm3, %v868_v59, %v869_v49 }
 0x151   : > { %v1733_v39 = vsel %vm1723_vm9, %v1700_v25, %v1213_v17  ;;  %v1602_v17 = vsel %vm1591_vm5, %v2946_v43, %v3456_v45  ;;  %v1604_v25 = vsel %vm1591_vm5, %v2990_v19, %v3464_v6  ;;  %v4856_v19 = vld [vmem:[#allocation26_spill] sm:$0xff] }
 0x152   : > { %1029 = vrot.lane.b32.xlu0 %v4844_v5, %s2736_s9  ;;  %v1309_v10 = vpop.permute.xlu1 %1308  ;;  %v1635_v35 = vsel %vm1624_vm7, %v1602_v17, %v3578_v16  ;;  %v1603_v16 = vsel %vm1591_vm5, %v2930_v32, %v3458_v55  ;;  %v876_v6 = vrot.slane %v4856_v19, 2  ;;  %v4859_v17 = vld [vmem:[#allocation63_spill] sm:$0xff] }
 0x153   : > { %v1765_v2 = vsel %vm1756_vm10, %v1732_v56, %v1309_v10  ;;  %v871_v10 = vrot.slane %v4851_v20, 2  ;;  %v1636_v53 = vsel %vm1624_vm7, %v1603_v16, %v3584_v27 }
 0x154   : > { %v1012_v37 = vpop.permute.xlu0 %1011  ;;  %1129 = vrot.lane.b32.xlu1 %v4845_v50, %s2737_s10 }
 0x155   : > { %v872_v11 = vsel %vm812_vm3, %v869_v49, %v871_v10  ;;  %v4857_v49 = vld [vmem:[#allocation43_spill] sm:$0xff] }
 0x156   : > { %1428 = vrot.lane.b32.xlu0 %v4846_v30, %s2740_s23  ;;  %v1311_v47 = vpop.permute.xlu1 %1310 }
 0x157   : > { %v1766_v8 = vsel %vm1756_vm10, %v1733_v39, %v1311_v47 }
 0x158   : > { %v1411_v63 = vpop.permute.xlu0 %1410  ;;  %1527 = vrot.lane.b32.xlu1 %v865_v61, %s2741_s26 }
 0x159   : > { %v1798_v46 = vsel %vm1789_vm11, %v1765_v2, %v1411_v63 }
 0x15a   : > { %1131 = vrot.lane.b32.xlu0 %v4846_v30, %s2737_s10  ;;  %v3829_v36 = vpop.permute.xlu1 %1013 }
 0x15c   : > { %v1114_v44 = vpop.permute.xlu0 %1113  ;;  %1230 = vrot.lane.b32.xlu1 %v865_v61, %s2738_s11 }
 0x15e   : > { %1529 = vrot.lane.b32.xlu0 %v867_v40, %s2741_s26  ;;  %v1413_v31 = vpop.permute.xlu1 %1412 }
 0x15f   : > { %v1799_v48 = vsel %vm1789_vm11, %v1766_v8, %v1413_v31  ;;  %v4852_v31 = vld [vmem:[#allocation24_spill] sm:$0xff] }
 0x160   : > { %v1512_v60 = vpop.permute.xlu0 %1511  ;;  %933 = vrot.lane.b32.xlu1 %v865_v61, %s2735_s8  ;;  %v1668_v61 = vsel %vm1657_vm6, %v1635_v35, %v1012_v37 }
 0x161   : > { %v1831_v34 = vsel %vm1822_vm12, %v1798_v46, %v1512_v60  ;;  %v1701_v47 = vsel %vm1690_vm8, %v1668_v61, %v1114_v44  ;;  %v4853_v46 = vld [vmem:[#allocation22_spill] sm:$0xff] }
 0x162   : > { %1232 = vrot.lane.b32.xlu0 %v867_v40, %s2738_s11  ;;  %2634 = vmatprep.mubr.msk.f32.mxu0 %vm1860_vm13, %v1831_v34  ;;  %v1116_v52 = vpop.permute.xlu1 %1115  ;;  %v873_v34 = vrot.slane %v4852_v31, 2  ;;  %v874_v13 = vrot.slane %v4853_v46, 2 }
 0x164   : > { %v1215_v4 = vpop.permute.xlu0 %1214  ;;  %1328 = vrot.lane.b32.xlu1 %v4848_v58, %s2739_s14  ;;  %v877_v10 = vsel %vm812_vm3, %v874_v13, %v876_v6 }
 0x165   : > { %v1734_v21 = vsel %vm1723_vm9, %v1701_v47, %v1215_v4  ;;  %v4854_v4 = vld [vmem:[#allocation62_spill] sm:$0xff] }
 0x166   : > { %935 = vrot.lane.b32.xlu0 %v867_v40, %s2735_s8  ;;  %v1514_v41 = vpop.permute.xlu1 %1513  ;;  %v1637_v8 = vsel %vm1624_vm7, %v1604_v25, %v4854_v4  ;;  %v4866_v4 = vld [vmem:[#allocation32_spill] sm:$0xff] }
 0x167   : > { %v1832_v29 = vsel %vm1822_vm12, %v1799_v48, %v1514_v41  ;;  %v875_v48 = vsel %vm812_vm3, %v873_v34, %v874_v13  ;;  %v4865_v34 = vld [vmem:[#allocation64_spill] sm:$0xff] }
 0x168   : > { %v1217_v7 = vpop.permute.xlu0 %1216  ;;  %1031 = vrot.lane.b32.xlu1 %v4848_v58, %s2736_s9  ;;  %2635 = vmatmul.mubr.msk.f32.gmra.mxu0 %vm1860_vm13, %v1832_v29  ;;  %v4855_v29 = vld [vmem:[#allocation28_spill] sm:$0xff] }
 0x16a   : > { %1330 = vrot.lane.b32.xlu0 %v4849_v0, %s2739_s14  ;;  %v1313_v12 = vpop.permute.xlu1 %1312 }
 0x16b   : > { %v1767_v45 = vsel %vm1756_vm10, %v1734_v21, %v1313_v12 }
 0x16c   : > { %v3865_v51 = vpop.permute.xlu0 %1015  ;;  %1430 = vrot.lane.b32.xlu1 %v4850_v26, %s2740_s23 }
 0x16d   : > { %v1670_v41 = vsel %vm1657_vm6, %v1637_v8, %v3865_v51 }
 0x16e   : > { %1033 = vrot.lane.b32.xlu0 %v4849_v0, %s2736_s9  ;;  %v1315_v54 = vpop.permute.xlu1 %1314 }
 0x170   : > { %v1415_v23 = vpop.permute.xlu0 %1414  ;;  %1133 = vrot.lane.b32.xlu1 %v4850_v26, %s2737_s10 }
 0x171   : > { %v1800_v37 = vsel %vm1789_vm11, %v1767_v45, %v1415_v23 }
 0x172   : > { %1432 = vrot.lane.b32.xlu0 %v3188_v33, %s2740_s23  ;;  %v3881_v50 = vpop.permute.xlu1 %1017 }
 0x174   : > { %v1118_v30 = vpop.permute.xlu0 %1117  ;;  %1531 = vrot.lane.b32.xlu1 %v870_v62, %s2741_s26 }
 0x175   : > { %v1703_v12 = vsel %vm1690_vm8, %v1670_v41, %v1118_v30  ;;  %v4867_v41 = vld [vmem:[#allocation29_spill] sm:$0xff] }
 0x176   : > { %1135 = vrot.lane.b32.xlu0 %v3188_v33, %s2737_s10  ;;  %v1417_v43 = vpop.permute.xlu1 %1416  ;;  %v1669_v33 = vsel %vm1657_vm6, %v1636_v53, %v3829_v36  ;;  %v4860_v53 = vld [vmem:[#allocation27_spill] sm:$0xff] }
 0x177   : > { %v1702_v32 = vsel %vm1690_vm8, %v1669_v33, %v1116_v52 }
 0x178   : > { %v1516_v63 = vpop.permute.xlu0 %1515  ;;  %1234 = vrot.lane.b32.xlu1 %v870_v62, %s2738_s11  ;;  %v1735_v55 = vsel %vm1723_vm9, %v1702_v32, %v1217_v7 }
 0x179   : > { %v1833_v9 = vsel %vm1822_vm12, %v1800_v37, %v1516_v63  ;;  %v1768_v44 = vsel %vm1756_vm10, %v1735_v55, %v1315_v54  ;;  %v4858_v54 = vld [vmem:[#allocation5_spill] sm:$0xff] }
 0x17a   : > { %1533 = vrot.lane.b32.xlu0 %v872_v11, %s2741_s26  ;;  %2637 = vmatprep.mubr.msk.f32.mxu0 %vm1860_vm13, %v1833_v9  ;;  %v1120_v40 = vpop.permute.xlu1 %1119  ;;  %v1801_v27 = vsel %vm1789_vm11, %v1768_v44, %v1417_v43  ;;  %v1605_v23 = vsel %vm1591_vm5, %v4858_v54, %v4857_v49  ;;  %v878_v44 = vrot.slane %v4860_v53, 2 }
 0x17b   : > { %v1638_v35 = vsel %vm1624_vm7, %v1605_v23, %v4859_v17 }
 0x17c   : > { %v1219_v24 = vpop.permute.xlu0 %1218  ;;  %937 = vrot.lane.b32.xlu1 %v870_v62, %s2735_s8  ;;  %v1671_v61 = vsel %vm1657_vm6, %v1638_v35, %v3881_v50 }
 0x17d   : > { %v1736_v26 = vsel %vm1723_vm9, %v1703_v12, %v1219_v24  ;;  %v1704_v47 = vsel %vm1690_vm8, %v1671_v61, %v1120_v40  ;;  %v4861_v40 = vld [vmem:[#allocation25_spill] sm:$0xff]  ;;  %v4862_v24 = vld [vmem:[#allocation31_spill] sm:$0xff] }
 0x17e   : > { %1236 = vrot.lane.b32.xlu0 %v872_v11, %s2738_s11  ;;  %v1518_v15 = vpop.permute.xlu1 %1517 }
 0x17f   : > { %v1834_v36 = vsel %vm1822_vm12, %v1801_v27, %v1518_v15  ;;  %v879_v27 = vrot.slane %v4861_v40, 2 }
 0x180   : > { %v1221_v56 = vpop.permute.xlu0 %1220  ;;  %1332 = vrot.lane.b32.xlu1 %v4852_v31, %s2739_s14  ;;  %2638 = vmatmul.mubr.msk.f32.gmra.mxu0 %vm1860_vm13, %v1834_v36  ;;  %v4863_v36 = vld [vmem:[#allocation44_spill] sm:$0xff] }
 0x181   : > { %v1737_v21 = vsel %vm1723_vm9, %v1704_v47, %v1221_v56  ;;  %v4864_v56 = vld [vmem:[#allocation6_spill] sm:$0xff] }
 0x182   : > { %939 = vrot.lane.b32.xlu0 %v872_v11, %s2735_s8  ;;  %v1317_v2 = vpop.permute.xlu1 %1316 }
 0x184   : > { %v3917_v3 = vpop.permute.xlu0 %923  ;;  %1035 = vrot.lane.b32.xlu1 %v4852_v31, %s2736_s9 }
 0x186   : > { %1334 = vrot.lane.b32.xlu0 %v4853_v46, %s2739_s14  ;;  %v3923_v60 = vpop.permute.xlu1 %1019 }
 0x188   : > { %v1319_v57 = vpop.permute.xlu0 %1318  ;;  %1434 = vrot.lane.b32.xlu1 %v3200_v28, %s2740_s23 }
 0x189   : > { %v1770_v45 = vsel %vm1756_vm10, %v1737_v21, %v1319_v57 }
 0x18a   : > { %1037 = vrot.lane.b32.xlu0 %v4853_v46, %s2736_s9  ;;  %v1419_v52 = vpop.permute.xlu1 %1418 }
 0x18c   : > { %v3934_v39 = vpop.permute.xlu0 %1021  ;;  %1137 = vrot.lane.b32.xlu1 %v3200_v28, %s2737_s10  ;;  %v1769_v28 = vsel %vm1756_vm10, %v1736_v26, %v1317_v2  ;;  %v1606_v2 = vsel %vm1591_vm5, %v4864_v56, %v4863_v36  ;;  %v4868_v26 = vld [vmem:[#allocation45_spill] sm:$0xff]  ;;  %v4873_v56 = vld [vmem:[#allocation38_spill] sm:$0xff] }
 0x18d   : > { %v1802_v51 = vsel %vm1789_vm11, %v1769_v28, %v1419_v52  ;;  %v1639_v13 = vsel %vm1624_vm7, %v1606_v2, %v4865_v34  ;;  %v880_v52 = vsel %vm812_vm3, %v878_v44, %v879_v27 }
 0x18e   : > { %1436 = vrot.lane.b32.xlu0 %v4855_v29, %s2740_s23  ;;  %v1122_v7 = vpop.permute.xlu1 %1121  ;;  %v1672_v25 = vsel %vm1657_vm6, %v1639_v13, %v3923_v60 }
 0x190   : > { %v1421_v59 = vpop.permute.xlu0 %1420  ;;  %1535 = vrot.lane.b32.xlu1 %v875_v48, %s2741_s26 }
 0x191   : > { %v1803_v11 = vsel %vm1789_vm11, %v1770_v45, %v1421_v59  ;;  %v1607_v59 = vsel %vm1591_vm5, %v3012_v42, %v4868_v26 }
 0x192   : > { %1139 = vrot.lane.b32.xlu0 %v4855_v29, %s2737_s10  ;;  %v1520_v62 = vpop.permute.xlu1 %1519  ;;  %v881_v29 = vrot.slane %v4867_v41, 2 }
 0x193   : > { %v1835_v20 = vsel %vm1822_vm12, %v1802_v51, %v1520_v62 }
 0x194   : > { %v1124_v30 = vpop.permute.xlu0 %1123  ;;  %1238 = vrot.lane.b32.xlu1 %v875_v48, %s2738_s11  ;;  %2640 = vmatprep.mubr.msk.f32.mxu0 %vm1860_vm13, %v1835_v20  ;;  %v882_v54 = vsel %vm812_vm3, %v879_v27, %v881_v29 }
 0x196   : > { %1537 = vrot.lane.b32.xlu0 %v877_v10, %s2741_s26  ;;  %v1223_v43 = vpop.permute.xlu1 %1222 }
 0x198   : > { %v1522_v16 = vpop.permute.xlu0 %1521  ;;  %941 = vrot.lane.b32.xlu1 %v875_v48, %s2735_s8  ;;  %v1705_v48 = vsel %vm1690_vm8, %v1672_v25, %v1122_v7  ;;  %v1640_v7 = vsel %vm1624_vm7, %v1607_v59, %v3917_v3 }
 0x199   : > { %v1836_v50 = vsel %vm1822_vm12, %v1803_v11, %v1522_v16  ;;  %v1738_v12 = vsel %vm1723_vm9, %v1705_v48, %v1223_v43  ;;  %v1673_v23 = vsel %vm1657_vm6, %v1640_v7, %v3934_v39  ;;  %v4870_v43 = vld [vmem:[#allocation30_spill] sm:$0xff]  ;;  %v4871_v16 = vld [vmem:[#allocation36_spill] sm:$0xff] }
 0x19a   : > { %1240 = vrot.lane.b32.xlu0 %v877_v10, %s2738_s11  ;;  %2641 = vmatmul.mubr.msk.f32.gmra.mxu0 %vm1860_vm13, %v1836_v50  ;;  %v3973_v37 = vpop.permute.xlu1 %925  ;;  %v1706_v42 = vsel %vm1690_vm8, %v1673_v23, %v1124_v30  ;;  %v4869_v30 = vld [vmem:[#allocation33_spill] sm:$0xff] }
 0x19b   : > { %v883_v50 = vrot.slane %v4869_v30, 2 }
 0x19c   : > { %v1225_v63 = vpop.permute.xlu0 %1224  ;;  %1336 = vrot.lane.b32.xlu1 %v4860_v53, %s2739_s14 }
 0x19d   : > { %v1739_v62 = vsel %vm1723_vm9, %v1706_v42, %v1225_v63  ;;  %v884_v63 = vrot.slane %v4870_v43, 2 }
 0x19e   : > { %943 = vrot.lane.b32.xlu0 %v877_v10, %s2735_s8  ;;  %v1321_v9 = vpop.permute.xlu1 %1320 }
 0x19f   : > { %v1771_v6 = vsel %vm1756_vm10, %v1738_v12, %v1321_v9 }
 0x1a0   : > { %v3978_v33 = vpop.permute.xlu0 %927  ;;  %1039 = vrot.lane.b32.xlu1 %v4860_v53, %s2736_s9 }
 0x1a2   : > { %1338 = vrot.lane.b32.xlu0 %v4861_v40, %s2739_s14  ;;  %v3984_v32 = vpop.permute.xlu1 %1023 }
 0x1a4   : > { %v1323_v55 = vpop.permute.xlu0 %1322  ;;  %1438 = vrot.lane.b32.xlu1 %v4862_v24, %s2740_s23 }
 0x1a5   : > { %v1772_v3 = vsel %vm1756_vm10, %v1739_v62, %v1323_v55  ;;  %v4872_v55 = vld [vmem:[#allocation46_spill] sm:$0xff] }
 0x1a6   : > { %1041 = vrot.lane.b32.xlu0 %v4861_v40, %s2736_s9  ;;  %v1423_v15 = vpop.permute.xlu1 %1422 }
 0x1a7   : > { %v1804_v60 = vsel %vm1789_vm11, %v1771_v6, %v1423_v15  ;;  %v885_v15 = vsel %vm812_vm3, %v883_v50, %v884_v63 }
 0x1a8   : > { %v3995_v57 = vpop.permute.xlu0 %1025  ;;  %1141 = vrot.lane.b32.xlu1 %v4862_v24, %s2737_s10  ;;  %v1608_v24 = vsel %vm1591_vm5, %v3048_v22, %v4872_v55 }
 0x1a9   : > { %v1641_v27 = vsel %vm1624_vm7, %v1608_v24, %v3973_v37  ;;  %v4874_v37 = vld [vmem:[#allocation34_spill] sm:$0xff] }
 0x1aa   : > { %1440 = vrot.lane.b32.xlu0 %v4866_v4, %s2740_s23  ;;  %v1126_v8 = vpop.permute.xlu1 %1125  ;;  %v1674_v36 = vsel %vm1657_vm6, %v1641_v27, %v3984_v32  ;;  %v886_v34 = vrot.slane %v4874_v37, 2  ;;  %v2723_v27 = vld [vmem:[%s4694_s1] ss:$0 sm:$0xff] }
 0x1ab   : > { %v1707_v22 = vsel %vm1690_vm8, %v1674_v36, %v1126_v8  ;;  %v4880_v36 = vld [vmem:[#allocation41_spill] sm:$0xff] }
 0x1ac   : > { %v1425_v19 = vpop.permute.xlu0 %1424  ;;  %1539 = vrot.lane.b32.xlu1 %v880_v52, %s2741_s26  ;;  %v887_v6 = vsel %vm812_vm3, %v884_v63, %v886_v34  ;;  %v4881_v34 = vld [vmem:[#allocation39_spill] sm:$0xff] }
 0x1ad   : > { %v1805_v35 = vsel %vm1789_vm11, %v1772_v3, %v1425_v19 }
 0x1ae   : > { %1143 = vrot.lane.b32.xlu0 %v4866_v4, %s2737_s10  ;;  %v1524_v28 = vpop.permute.xlu1 %1523  ;;  %v4875_v4 = vld [vmem:[#allocation47_spill] sm:$0xff] }
 0x1af   : > { %v1837_v49 = vsel %vm1822_vm12, %v1804_v60, %v1524_v28  ;;  %v1609_v48 = vsel %vm1591_vm5, %v3035_v14, %v4875_v4  ;;  %v2724_v4 = vld [vmem:[%s4695_s2] ss:$0 sm:$0xff] }
 0x1b0   : > { %v1128_v51 = vpop.permute.xlu0 %1127  ;;  %1242 = vrot.lane.b32.xlu1 %v880_v52, %s2738_s11  ;;  %2643 = vmatprep.mubr.msk.f32.mxu0 %vm1860_vm13, %v1837_v49  ;;  %v1642_v12 = vsel %vm1624_vm7, %v1609_v48, %v3978_v33 }
 0x1b1   : > { %v1675_v14 = vsel %vm1657_vm6, %v1642_v12, %v3995_v57 }
 0x1b2   : > { %1541 = vrot.lane.b32.xlu0 %v882_v54, %s2741_s26  ;;  %v1227_v17 = vpop.permute.xlu1 %1226  ;;  %v1708_v59 = vsel %vm1690_vm8, %v1675_v14, %v1128_v51  ;;  %v4876_v51 = vld [vmem:[#allocation37_spill] sm:$0xff] }
 0x1b3   : > { %v1740_v13 = vsel %vm1723_vm9, %v1707_v22, %v1227_v17  ;;  %v4877_v17 = vld [vmem:[#allocation35_spill] sm:$0xff] }
 0x1b4   : > { %v1526_v20 = vpop.permute.xlu0 %1525  ;;  %945 = vrot.lane.b32.xlu1 %v880_v52, %s2735_s8  ;;  %v318_v22 = vld [vmem:[%s2806_s29 + $0x188] sm:$0xff] }
 0x1b5   : > { %v1838_v39 = vsel %vm1822_vm12, %v1805_v35, %v1526_v20  ;;  %v4878_v20 = vld [vmem:[#allocation40_spill] sm:$0xff] }
 0x1b6   : > { %1244 = vrot.lane.b32.xlu0 %v882_v54, %s2738_s11  ;;  %2644 = vmatmul.mubr.msk.f32.gmra.mxu0 %vm1860_vm13, %v1838_v39  ;;  %v4034_v10 = vpop.permute.xlu1 %929  ;;  %v888_v39 = vrot.slane %v4876_v51, 2 }
 0x1b8   : > { %v1229_v61 = vpop.permute.xlu0 %1228  ;;  %1340 = vrot.lane.b32.xlu1 %v4869_v30, %s2739_s14 }
 0x1b9   : > { %v1741_v33 = vsel %vm1723_vm9, %v1708_v59, %v1229_v61  ;;  %v889_v61 = vrot.slane %v4877_v17, 2 }
 0x1ba   : > { %947 = vrot.lane.b32.xlu0 %v882_v54, %s2735_s8  ;;  %v1325_v47 = vpop.permute.xlu1 %1324 }
 0x1bb   : > { %v1773_v25 = vsel %vm1756_vm10, %v1740_v13, %v1325_v47  ;;  %v890_v24 = vsel %vm812_vm3, %v888_v39, %v889_v61  ;;  %v891_v13 = vrot.slane %v4881_v34, 2 }
 0x1bc   : > { %v4039_v21 = vpop.permute.xlu0 %931  ;;  %1043 = vrot.lane.b32.xlu1 %v4869_v30, %s2736_s9 }
 0x1be   : > { %1342 = vrot.lane.b32.xlu0 %v4870_v43, %s2739_s14  ;;  %v4045_v45 = vpop.permute.xlu1 %1027 }
 0x1c0   : > { %v1327_v11 = vpop.permute.xlu0 %1326  ;;  %1442 = vrot.lane.b32.xlu1 %v4871_v16, %s2740_s23 }
 0x1c1   : > { %v1774_v28 = vsel %vm1756_vm10, %v1741_v33, %v1327_v11  ;;  %v317_v11 = vld [vmem:[%s2806_s29 + $0x180] sm:$0xff]  ;;  %v892_v33 = vsel %vm812_vm3, %v889_v61, %v891_v13 }
 0x1c2   : > { %1045 = vrot.lane.b32.xlu0 %v4870_v43, %s2736_s9  ;;  %v1427_v9 = vpop.permute.xlu1 %1426 }
 0x1c3   : > { %v1806_v8 = vsel %vm1789_vm11, %v1773_v25, %v1427_v9 }
 0x1c4   : > { %v4057_v44 = vpop.permute.xlu0 %1029  ;;  %1145 = vrot.lane.b32.xlu1 %v4871_v16, %s2737_s10  ;;  %v4879_v16 = vld [vmem:[#allocation48_spill] sm:$0xff] }
 0x1c5   : > { %v1610_v50 = vsel %vm1591_vm5, %v4838_v1, %v4879_v16  ;;  %v378_v1 = vmul.f32 %v2723_v27, %v317_v11 }
 0x1c6   : > { %1444 = vrot.lane.b32.xlu0 %v4873_v56, %s2740_s23  ;;  %v4068_v2 = vpop.permute.xlu1 %1129  ;;  %v1643_v55 = vsel %vm1624_vm7, %v1610_v50, %v4034_v10 }
 0x1c7   : > { %v439_v48 = vadd.f32 %v2724_v4, %v378_v1 }
 0x1c8   : > { %v1429_v52 = vpop.permute.xlu0 %1428  ;;  %1543 = vrot.lane.b32.xlu1 %v885_v15, %s2741_s26  ;;  %v4079_v32 = vpop.f32.mrf.mxu0 }
 0x1c9   : > { %2187 = vst.msk [vmem:[%s4073_s7 + $0x8] sm:$0xff] %vm1591_vm5, %v4079_v32  ;;  %v1807_v7 = vsel %vm1789_vm11, %v1774_v28, %v1429_v52 }
 0x1ca   : > { %1147 = vrot.lane.b32.xlu0 %v4873_v56, %s2737_s10  ;;  %v1528_v41 = vpop.permute.xlu1 %1527  ;;  %v4091_v29 = vpop.f32.mrf.mxu0 }
 0x1cb   : > { %2186 = vst.msk [vmem:[%s4073_s7] sm:$0xff] %vm1591_vm5, %v4091_v29  ;;  %v1839_v19 = vsel %vm1822_vm12, %v1806_v8, %v1528_v41  ;;  %v379_v8 = vmul.f32 %v2723_v27, %v318_v22  ;;  %v319_v41 = vld [vmem:[%s2806_s29 + $0x190] sm:$0x3] }
 0x1cc   : > { %v4102_v26 = vpop.permute.xlu0 %1131  ;;  %1246 = vrot.lane.b32.xlu1 %v885_v15, %s2738_s11  ;;  %2646 = vmatprep.mubr.msk.f32.mxu1 %vm1860_vm13, %v1839_v19 }
 0x1ce   : > { %1545 = vrot.lane.b32.xlu0 %v887_v6, %s2741_s26  ;;  %v1231_v60 = vpop.permute.xlu1 %1230 }
 0x1d0   : > { %v1530_v49 = vpop.permute.xlu0 %1529  ;;  %949 = vrot.lane.b32.xlu1 %v885_v15, %s2735_s8  ;;  %v1676_v15 = vsel %vm1657_vm6, %v1643_v55, %v4045_v45 }
 0x1d1   : > { %v1840_v57 = vsel %vm1822_vm12, %v1807_v7, %v1530_v49  ;;  %v1709_v37 = vsel %vm1690_vm8, %v1676_v15, %v4068_v2  ;;  %v4882_v2 = vld [vmem:[#allocation49_spill] sm:$0xff]  ;;  %v493_v49 = vmax.f32 %v439_v48, 0.0 }
 0x1d2   : > { %1248 = vrot.lane.b32.xlu0 %v887_v6, %s2738_s11  ;;  %2647 = vmatmul.mubr.msk.f32.vlgmr.msra.gmra.mxu1 %vm1860_vm13, %v1840_v57  ;;  %v4115_v54 = vpop.permute.xlu1 %933  ;;  %v1742_v52 = vsel %vm1723_vm9, %v1709_v37, %v1231_v60  ;;  %v1611_v12 = vsel %vm1591_vm5, %v4839_v38, %v4882_v2  ;;  %v380_v38 = vmul.f32 %v2723_v27, %v319_v41  ;;  %v4885_v41 = vld [vmem:[#allocation50_spill] sm:$0xff] }
 0x1d3   : > { %v1644_v14 = vsel %vm1624_vm7, %v1611_v12, %v4039_v21  ;;  %v440_v57 = vadd.f32 %v2724_v4, %v379_v8  ;;  %v1612_v2 = vsel %vm1591_vm5, %v4843_v18, %v4885_v41 }
 0x1d4   : > { %v1233_v23 = vpop.permute.xlu0 %1232  ;;  %1344 = vrot.lane.b32.xlu1 %v4876_v51, %s2739_s14  ;;  %v1677_v60 = vsel %vm1657_vm6, %v1644_v14, %v4057_v44  ;;  %v441_v61 = vadd.f32 %v2724_v4, %v380_v38 }
 0x1d5   : > { %v1710_v7 = vsel %vm1690_vm8, %v1677_v60, %v4102_v26  ;;  %v581_v26 = vsel %vm503_vm1, %v493_v49, 0.0  ;;  %v494_v16 = vmax.f32 %v440_v57, 0.0 }
 0x1d6   : > { %951 = vrot.lane.b32.xlu0 %v887_v6, %s2735_s8  ;;  %v1329_v42 = vpop.permute.xlu1 %1328  ;;  %v1743_v21 = vsel %vm1723_vm9, %v1710_v7, %v1233_v23  ;;  %v1088_v55 = vrot.slane %v581_v26, 1 }
 0x1d7   : > { %v1775_v45 = vsel %vm1756_vm10, %v1742_v52, %v1329_v42 }
 0x1d8   : > { %v4120_v62 = vpop.permute.xlu0 %935  ;;  %1047 = vrot.lane.b32.xlu1 %v4876_v51, %s2736_s9 }
 0x1da   : > { %1346 = vrot.lane.b32.xlu0 %v4877_v17, %s2739_s14  ;;  %v4126_v3 = vpop.permute.xlu1 %1031 }
 0x1dc   : > { %v1331_v35 = vpop.permute.xlu0 %1330  ;;  %1446 = vrot.lane.b32.xlu1 %v4878_v20, %s2740_s23 }
 0x1de   : > { %1049 = vrot.lane.b32.xlu0 %v4877_v17, %s2736_s9  ;;  %v1431_v47 = vpop.permute.xlu1 %1430 }
 0x1df   : > { %v1808_v19 = vsel %vm1789_vm11, %v1775_v45, %v1431_v47  ;;  %v1190_v45 = vrot.slane %v494_v16, 2 }
 0x1e0   : > { %v4138_v63 = vpop.permute.xlu0 %1033  ;;  %1149 = vrot.lane.b32.xlu1 %v4878_v20, %s2737_s10  ;;  %v4142_v9 = vpop.f32.mrf.mxu0  ;;  %v1776_v20 = vsel %vm1756_vm10, %v1743_v21, %v1331_v35  ;;  %v495_v35 = vmax.f32 %v441_v61, 0.0 }
 0x1e1   : > { %2189 = vst.msk [vmem:[%s4073_s7 + $0x18] sm:$0xff] %vm1591_vm5, %v4142_v9 }
 0x1e2   : > { %1448 = vrot.lane.b32.xlu0 %v4880_v36, %s2740_s23  ;;  %v4157_v56 = vpop.permute.xlu1 %1133  ;;  %v4159_v10 = vpop.f32.mrf.mxu0 }
 0x1e3   : > { %2188 = vst.msk [vmem:[%s4073_s7 + $0x10] sm:$0xff] %vm1591_vm5, %v4159_v10 }
 0x1e4   : > { %v1433_v25 = vpop.permute.xlu0 %1432  ;;  %1547 = vrot.lane.b32.xlu1 %v890_v24, %s2741_s26 }
 0x1e5   : > { %v1809_v44 = vsel %vm1789_vm11, %v1776_v20, %v1433_v25  ;;  %v1189_v25 = vrot.slane %v581_v26, 2 }
 0x1e6   : > { %1151 = vrot.lane.b32.xlu0 %v4880_v36, %s2737_s10  ;;  %v1532_v6 = vpop.permute.xlu1 %1531  ;;  %v583_v36 = vsel %vm514_vm2, %v495_v35, 0.0  ;;  %v4889_v35 = vld [vmem:[#allocation42_spill] sm:$0xff] }
 0x1e7   : > { %v1841_v59 = vsel %vm1822_vm12, %v1808_v19, %v1532_v6  ;;  %v1091_v34 = vrot.slane %v583_v36, 1  ;;  %v1645_v19 = vsel %vm1624_vm7, %v1612_v2, %v4115_v54  ;;  %v1191_v6 = vsel %vm812_vm3, %v1189_v25, %v1190_v45  ;;  %v4886_v54 = vld [vmem:[#allocation51_spill] sm:$0xff] }
 0x1e8   : > { %v4187_v28 = vpop.permute.xlu0 %1135  ;;  %1250 = vrot.lane.b32.xlu1 %v890_v24, %s2738_s11  ;;  %2649 = vmatprep.mubr.msk.f32.mxu1 %vm1860_vm13, %v1841_v59  ;;  %v1678_v14 = vsel %vm1657_vm6, %v1645_v19, %v4126_v3  ;;  %v1192_v60 = vrot.slane %v583_v36, 2  ;;  %v1613_v49 = vsel %vm1591_vm5, %v4844_v5, %v4886_v54 }
 0x1ea   : > { %1549 = vrot.lane.b32.xlu0 %v892_v33, %s2741_s26  ;;  %v1235_v42 = vpop.permute.xlu1 %1234 }
 0x1ec   : > { %v1534_v39 = vpop.permute.xlu0 %1533  ;;  %953 = vrot.lane.b32.xlu1 %v890_v24, %s2735_s8  ;;  %v1089_v24 = vrot.slane %v494_v16, 1 }
 0x1ed   : > { %v1842_v47 = vsel %vm1822_vm12, %v1809_v44, %v1534_v39 }
 0x1ee   : > { %1252 = vrot.lane.b32.xlu0 %v892_v33, %s2738_s11  ;;  %2650 = vmatmul.mubr.msk.f32.gmra.mxu1 %vm1860_vm13, %v1842_v47  ;;  %v4203_v23 = vpop.permute.xlu1 %937  ;;  %v1090_v22 = vsel %vm635_vm0, %v1088_v55, %v1089_v24  ;;  %v1092_v8 = vsel %vm635_vm0, %v1089_v24, %v1091_v34 }
 0x1f0   : > { %v1237_v50 = vpop.permute.xlu0 %1236  ;;  %1348 = vrot.lane.b32.xlu1 %v581_v26, %s2739_s14 }
 0x1f2   : > { %955 = vrot.lane.b32.xlu0 %v892_v33, %s2735_s8  ;;  %v1333_v27 = vpop.permute.xlu1 %1332  ;;  %v1711_v33 = vsel %vm1690_vm8, %v1678_v14, %v4157_v56  ;;  %v1646_v56 = vsel %vm1624_vm7, %v1613_v49, %v4120_v62 }
 0x1f3   : > { %v1744_v18 = vsel %vm1723_vm9, %v1711_v33, %v1235_v42  ;;  %v1193_v42 = vsel %vm812_vm3, %v1190_v45, %v1192_v60  ;;  %v1679_v20 = vsel %vm1657_vm6, %v1646_v56, %v4138_v63  ;;  %v4891_v33 = vld [vmem:[#allocation53_spill] sm:$0xff] }
 0x1f4   : > { %v4207_v1 = vpop.permute.xlu0 %939  ;;  %1051 = vrot.lane.b32.xlu1 %v581_v26, %s2736_s9  ;;  %v1777_v7 = vsel %vm1756_vm10, %v1744_v18, %v1333_v27  ;;  %v1712_v5 = vsel %vm1690_vm8, %v1679_v20, %v4187_v28  ;;  %v4887_v26 = vmov 0.0   ;;  %v1615_v60 = vsel %vm1591_vm5, %v4849_v0, %v4891_v33 }
 0x1f5   : > { %v1745_v39 = vsel %vm1723_vm9, %v1712_v5, %v1237_v50  ;;  %v4888_v50 = vld [vmem:[#allocation3_spill] sm:$0xff] }
 0x1f6   : > { %1350 = vrot.lane.b32.xlu0 %v494_v16, %s2739_s14  ;;  %v4214_v37 = vpop.permute.xlu1 %1035 }
 0x1f8   : > { %v1335_v13 = vpop.permute.xlu0 %1334  ;;  %1450 = vrot.lane.b32.xlu1 %v1090_v22, %s2740_s23  ;;  %v4217_v52 = vpop.f32.mrf.mxu0 }
 0x1f9   : > { %2191 = vst.msk [vmem:[%s4073_s7 + $0x28] sm:$0xff] %vm1591_vm5, %v4217_v52  ;;  %v1778_v61 = vsel %vm1756_vm10, %v1745_v39, %v1335_v13  ;;  %v4890_v13 = vld [vmem:[#allocation52_spill] sm:$0xff] }
 0x1fa   : > { %1053 = vrot.lane.b32.xlu0 %v494_v16, %s2736_s9  ;;  %v1435_v4 = vpop.permute.xlu1 %1434  ;;  %v4223_v48 = vpop.f32.mrf.mxu0  ;;  %v1614_v25 = vsel %vm1591_vm5, %v4848_v58, %v4890_v13  ;;  %s265_s9 = scalar_lea.vmem %s4698_s5, %s4901_s22 }
 0x1fb   : > { %2190 = vst.msk [vmem:[%s4073_s7 + $0x20] sm:$0xff] %vm1591_vm5, %v4223_v48  ;;  %v1810_v3 = vsel %vm1789_vm11, %v1777_v7, %v1435_v4  ;;  %v1647_v4 = vsel %vm1624_vm7, %v1614_v25, %v4203_v23  ;;  %v1648_v23 = vsel %vm1624_vm7, %v1615_v60, %v4207_v1 }
 0x1fc   : > { %v4232_v12 = vpop.permute.xlu0 %1037  ;;  %1153 = vrot.lane.b32.xlu1 %v1090_v22, %s2737_s10 }
 0x1fe   : > { %1452 = vrot.lane.b32.xlu0 %v1092_v8, %s2740_s23  ;;  %v1138_v59 = vpop.permute.xlu1 %1137 }
 0x200   : > { %v1437_v38 = vpop.permute.xlu0 %1436  ;;  %1551 = vrot.lane.b32.xlu1 %v1191_v6, %s2741_s26 }
 0x201   : > { %v1811_v47 = vsel %vm1789_vm11, %v1778_v61, %v1437_v38  ;;  %v4892_v61 = vld [vmem:[#allocation54_spill] sm:$0xff] }
 0x202   : > { %1155 = vrot.lane.b32.xlu0 %v1092_v8, %s2737_s10  ;;  %v1536_v57 = vpop.permute.xlu1 %1535  ;;  %v1680_v8 = vsel %vm1657_vm6, %v1647_v4, %v4214_v37 }
 0x203   : > { %v1843_v21 = vsel %vm1822_vm12, %v1810_v3, %v1536_v57  ;;  %v1713_v2 = vsel %vm1690_vm8, %v1680_v8, %v1138_v59  ;;  %v1681_v59 = vsel %vm1657_vm6, %v1648_v23, %v4232_v12 }
 0x204   : > { %v1140_v44 = vpop.permute.xlu0 %1139  ;;  %1254 = vrot.lane.b32.xlu1 %v1191_v6, %s2738_s11  ;;  %2652 = vmatprep.mubr.msk.f32.mxu1 %vm1860_vm13, %v1843_v21 }
 0x205   : > { %v1714_v7 = vsel %vm1690_vm8, %v1681_v59, %v1140_v44 }
 0x206   : > { %1553 = vrot.lane.b32.xlu0 %v1193_v42, %s2741_s26  ;;  %v1239_v62 = vpop.permute.xlu1 %1238 }
 0x207   : > { %v1746_v19 = vsel %vm1723_vm9, %v1713_v2, %v1239_v62 }
 0x208   : > { %v1538_v63 = vpop.permute.xlu0 %1537  ;;  %1256 = vrot.lane.b32.xlu1 %v1193_v42, %s2738_s11 }
 0x209   : > { %v1844_v11 = vsel %vm1822_vm12, %v1811_v47, %v1538_v63  ;;  %v1616_v47 = vsel %vm1591_vm5, %v4852_v31, %v4892_v61 }
 0x20a   : > { %2709 = vrot.lane.b32.xlu0 %v4887_v26, %s2739_s14  ;;  %2653 = vmatmul.mubr.msk.f32.gmra.mxu1 %vm1860_vm13, %v1844_v11  ;;  %v942_v28 = vpop.permute.xlu1 %941  ;;  %s268_s14 = scalar_lea.vmem %s4699_s6, %s4901_s22 }
 0x20b   : > { %v1649_v11 = vsel %vm1624_vm7, %v1616_v47, %v942_v28 }
 0x20c   : > { %v1241_v16 = vpop.permute.xlu0 %1240  ;;  %2714 = vrot.lane.b32.xlu1 %v4888_v50, %s2740_s23 }
 0x20d   : > { %v1747_v0 = vsel %vm1723_vm9, %v1714_v7, %v1241_v16  ;;  %v4894_v7 = vld [vmem:[#allocation56_spill] sm:$0xff] }
 0x20e   : > { %2719 = vrot.lane.b32.xlu0 %v4889_v35, %s2741_s26  ;;  %v1337_v55 = vpop.permute.xlu1 %1336 }
 0x20f   : > { %v1779_v14 = vsel %vm1756_vm10, %v1746_v19, %v1337_v55 }
 0x210   : > { %v944_v24 = vpop.permute.xlu0 %943  ;;  %v4274_v27 = vpop.f32.mrf.mxu0 }
 0x211   : > { %2193 = vst.msk [vmem:[%s4073_s7 + $0x38] sm:$0xff] %vm1591_vm5, %v4274_v27 }
 0x212   : > { %v1040_v15 = vpop.permute.xlu1 %1039  ;;  %v4279_v36 = vpop.f32.mrf.mxu0 }
 0x213   : > { %2192 = vst.msk [vmem:[%s4073_s7 + $0x30] sm:$0xff] %vm1591_vm5, %v4279_v36  ;;  %v1682_v26 = vsel %vm1657_vm6, %v1649_v11, %v1040_v15 }
 0x214   : > { %v1339_v22 = vpop.permute.xlu0 %1338 }
 0x215   : > { %v1780_v49 = vsel %vm1756_vm10, %v1747_v0, %v1339_v22  ;;  %v1618_v0 = vsel %vm1591_vm5, %v4860_v53, %v4894_v7 }
 0x216   : > { %v1439_v34 = vpop.permute.xlu1 %1438 }
 0x217   : > { %v1812_v58 = vsel %vm1789_vm11, %v1779_v14, %v1439_v34  ;;  %v4893_v34 = vld [vmem:[#allocation55_spill] sm:$0xff] }
 0x218   : > { %v1042_v45 = vpop.permute.xlu0 %1041  ;;  %v1617_v13 = vsel %vm1591_vm5, %v4853_v46, %v4893_v34 }
 0x219   : > { %v1650_v28 = vsel %vm1624_vm7, %v1617_v13, %v944_v24 }
 0x21a   : > { %v1142_v41 = vpop.permute.xlu1 %1141  ;;  %v1683_v4 = vsel %vm1657_vm6, %v1650_v28, %v1042_v45 }
 0x21b   : > { %v1715_v50 = vsel %vm1690_vm8, %v1682_v26, %v1142_v41 }
 0x21c   : > { %v1441_v6 = vpop.permute.xlu0 %1440 }
 0x21d   : > { %v1813_v3 = vsel %vm1789_vm11, %v1780_v49, %v1441_v6 }
 0x21e   : > { %v1540_v18 = vpop.permute.xlu1 %1539 }
 0x21f   : > { %v1845_v37 = vsel %vm1822_vm12, %v1812_v58, %v1540_v18 }
 0x220   : > { %v1144_v38 = vpop.permute.xlu0 %1143  ;;  %2655 = vmatprep.mubr.msk.f32.mxu1 %vm1860_vm13, %v1845_v37 }
 0x221   : > { %v1716_v41 = vsel %vm1690_vm8, %v1683_v4, %v1144_v38 }
 0x222   : > { %v1243_v54 = vpop.permute.xlu1 %1242 }
 0x223   : > { %v1748_v35 = vsel %vm1723_vm9, %v1715_v50, %v1243_v54 }
 0x224   : > { %v1542_v1 = vpop.permute.xlu0 %1541 }
 0x225   : > { %v1846_v57 = vsel %vm1822_vm12, %v1813_v3, %v1542_v1 }
 0x226   : > { %2656 = vmatmul.mubr.msk.f32.gmra.mxu1 %vm1860_vm13, %v1846_v57  ;;  %v946_v56 = vpop.permute.xlu1 %945 }
 0x227   : > { %v1651_v49 = vsel %vm1624_vm7, %v1618_v0, %v946_v56 }
 0x228   : > { %v1245_v12 = vpop.permute.xlu0 %1244  ;;  %v4310_v21 = vpop.f32.mrf.mxu0 }
 0x229   : > { %2195 = vst.msk [vmem:[%s4073_s7 + $0x48] sm:$0xff] %vm1591_vm5, %v4310_v21  ;;  %v1749_v2 = vsel %vm1723_vm9, %v1716_v41, %v1245_v12  ;;  %v4896_v41 = vld [vmem:[#allocation58_spill] sm:$0xff] }
 0x22a   : > { %v1341_v42 = vpop.permute.xlu1 %1340  ;;  %v4315_v20 = vpop.f32.mrf.mxu0 }
 0x22b   : > { %2194 = vst.msk [vmem:[%s4073_s7 + $0x40] sm:$0xff] %vm1591_vm5, %v4315_v20  ;;  %v1781_v22 = vsel %vm1756_vm10, %v1748_v35, %v1341_v42 }
 0x22c   : > { %v948_v44 = vpop.permute.xlu0 %947 }
 0x22e   : > { %v1044_v5 = vpop.permute.xlu1 %1043 }
 0x22f   : > { %v1684_v3 = vsel %vm1657_vm6, %v1651_v49, %v1044_v5 }
 0x230   : > { %v1343_v39 = vpop.permute.xlu0 %1342 }
 0x231   : > { %v1782_v46 = vsel %vm1756_vm10, %v1749_v2, %v1343_v39  ;;  %v1620_v2 = vsel %vm1591_vm5, %v4869_v30, %v4896_v41 }
 0x232   : > { %v1443_v62 = vpop.permute.xlu1 %1442 }
 0x233   : > { %v1814_v31 = vsel %vm1789_vm11, %v1781_v22, %v1443_v62  ;;  %v4895_v62 = vld [vmem:[#allocation57_spill] sm:$0xff] }
 0x234   : > { %v1046_v63 = vpop.permute.xlu0 %1045  ;;  %v1619_v61 = vsel %vm1591_vm5, %v4861_v40, %v4895_v62  ;;  %v4898_v62 = vld [vmem:[#allocation61_spill] sm:$0xff] }
 0x235   : > { %v1652_v56 = vsel %vm1624_vm7, %v1619_v61, %v948_v44  ;;  %v1623_v61 = vsel %vm1591_vm5, %v4877_v17, %v4898_v62 }
 0x236   : > { %v1146_v16 = vpop.permute.xlu1 %1145  ;;  %v1685_v11 = vsel %vm1657_vm6, %v1652_v56, %v1046_v63 }
 0x237   : > { %v1717_v57 = vsel %vm1690_vm8, %v1684_v3, %v1146_v16 }
 0x238   : > { %v1445_v55 = vpop.permute.xlu0 %1444 }
 0x239   : > { %v1815_v6 = vsel %vm1789_vm11, %v1782_v46, %v1445_v55 }
 0x23a   : > { %v1544_v25 = vpop.permute.xlu1 %1543 }
 0x23b   : > { %v1847_v15 = vsel %vm1822_vm12, %v1814_v31, %v1544_v25 }
 0x23c   : > { %v1148_v8 = vpop.permute.xlu0 %1147  ;;  %2658 = vmatprep.mubr.msk.f32.mxu1 %vm1860_vm13, %v1847_v15 }
 0x23d   : > { %v1718_v16 = vsel %vm1690_vm8, %v1685_v11, %v1148_v8 }
 0x23e   : > { %v1247_v19 = vpop.permute.xlu1 %1246 }
 0x23f   : > { %v1750_v12 = vsel %vm1723_vm9, %v1717_v57, %v1247_v19 }
 0x240   : > { %v1546_v14 = vpop.permute.xlu0 %1545  ;;  %v4340_v33 = vpop.f32.mrf.mxu0 }
 0x241   : > { %v1848_v24 = vsel %vm1822_vm12, %v1815_v6, %v1546_v14  ;;  %2197 = vst.msk [vmem:[%s4073_s7 + $0x58] sm:$0xff] %vm1591_vm5, %v4340_v33 }
 0x242   : > { %2659 = vmatmul.mubr.msk.f32.gmra.mxu1 %vm1860_vm13, %v1848_v24  ;;  %v950_v45 = vpop.permute.xlu1 %949  ;;  %v4347_v60 = vpop.f32.mrf.mxu0 }
 0x243   : > { %2196 = vst.msk [vmem:[%s4073_s7 + $0x50] sm:$0xff] %vm1591_vm5, %v4347_v60  ;;  %v1653_v46 = vsel %vm1624_vm7, %v1620_v2, %v950_v45 }
 0x244   : > { %v1249_v58 = vpop.permute.xlu0 %1248 }
 0x245   : > { %v1751_v50 = vsel %vm1723_vm9, %v1718_v16, %v1249_v58 }
 0x246   : > { %v1345_v18 = vpop.permute.xlu1 %1344 }
 0x247   : > { %v1783_v39 = vsel %vm1756_vm10, %v1750_v12, %v1345_v18 }
 0x248   : > { %v952_v23 = vpop.permute.xlu0 %951 }
 0x24a   : > { %v1048_v37 = vpop.permute.xlu1 %1047 }
 0x24b   : > { %v1686_v6 = vsel %vm1657_vm6, %v1653_v46, %v1048_v37 }
 0x24c   : > { %v1347_v59 = vpop.permute.xlu0 %1346 }
 0x24d   : > { %v1784_v55 = vsel %vm1756_vm10, %v1751_v50, %v1347_v59 }
 0x24e   : > { %v1447_v38 = vpop.permute.xlu1 %1446 }
 0x24f   : > { %v1816_v53 = vsel %vm1789_vm11, %v1783_v39, %v1447_v38  ;;  %v4897_v38 = vld [vmem:[#allocation59_spill] sm:$0xff] }
 0x250   : > { %v1050_v54 = vpop.permute.xlu0 %1049  ;;  %v1621_v7 = vsel %vm1591_vm5, %v4870_v43, %v4897_v38 }
 0x251   : > { %v1654_v45 = vsel %vm1624_vm7, %v1621_v7, %v952_v23 }
 0x252   : > { %v1150_v1 = vpop.permute.xlu1 %1149  ;;  %v1687_v49 = vsel %vm1657_vm6, %v1654_v45, %v1050_v54  ;;  %v2219_v45 = vsel %vm1591_vm5, %v4079_v32, 0.0 }
 0x253   : > { %v1719_v24 = vsel %vm1690_vm8, %v1686_v6, %v1150_v1 }
 0x254   : > { %v1449_v42 = vpop.permute.xlu0 %1448 }
 0x255   : > { %v1817_v44 = vsel %vm1789_vm11, %v1784_v55, %v1449_v42 }
 0x256   : > { %v1548_v47 = vpop.permute.xlu1 %1547 }
 0x257   : > { %v1849_v5 = vsel %vm1822_vm12, %v1816_v53, %v1548_v47 }
 0x258   : > { %v1152_v26 = vpop.permute.xlu0 %1151  ;;  %2661 = vmatprep.mubr.msk.f32.mxu1 %vm1860_vm13, %v1849_v5  ;;  %v4899_v5 = vld [vmem:[#allocation60_spill] sm:$0xff] }
 0x259   : > { %v1720_v1 = vsel %vm1690_vm8, %v1687_v49, %v1152_v26  ;;  %v1622_v11 = vsel %vm1591_vm5, %v4876_v51, %v4899_v5 }
 0x25a   : > { %v4370_v35 = vpop.f32.mrf.mxu0  ;;  %v1251_v40 = vpop.permute.xlu1 %1250 }
 0x25b   : > { %2199 = vst.msk [vmem:[%s4073_s7 + $0x68] sm:$0xff] %vm1591_vm5, %v4370_v35  ;;  %v1752_v58 = vsel %vm1723_vm9, %v1719_v24, %v1251_v40 }
 0x25c   : > { %v4377_v22 = vpop.f32.mrf.mxu0  ;;  %v1550_v63 = vpop.permute.xlu0 %1549 }
 0x25d   : > { %2198 = vst.msk [vmem:[%s4073_s7 + $0x60] sm:$0xff] %vm1591_vm5, %v4377_v22  ;;  %v1850_v34 = vsel %vm1822_vm12, %v1817_v44, %v1550_v63 }
 0x25e   : > { %2662 = vmatmul.mubr.msk.f32.gmra.mxu1 %vm1860_vm13, %v1850_v34  ;;  %v954_v13 = vpop.permute.xlu1 %953 }
 0x25f   : > { %v1655_v16 = vsel %vm1624_vm7, %v1622_v11, %v954_v13 }
 0x260   : > { %v1253_v31 = vpop.permute.xlu0 %1252 }
 0x261   : > { %v1753_v57 = vsel %vm1723_vm9, %v1720_v1, %v1253_v31  ;;  %v2223_v1 = vsel %vm1591_vm5, %v4142_v9, 0.0 }
 0x262   : > { %v1349_v25 = vpop.permute.xlu1 %1348 }
 0x263   : > { %v1785_v59 = vsel %vm1756_vm10, %v1752_v58, %v1349_v25 }
 0x264   : > { %v956_v28 = vpop.permute.xlu0 %955 }
 0x265   : > { %v1656_v47 = vsel %vm1624_vm7, %v1623_v61, %v956_v28 }
 0x266   : > { %v1052_v15 = vpop.permute.xlu1 %1051 }
 0x267   : > { %v1688_v40 = vsel %vm1657_vm6, %v1655_v16, %v1052_v15  ;;  %v2235_v16 = vsel %vm1591_vm5, %v4310_v21, 0.0 }
 0x268   : > { %v1351_v4 = vpop.permute.xlu0 %1350 }
 0x269   : > { %v1786_v42 = vsel %vm1756_vm10, %v1753_v57, %v1351_v4  ;;  %v2225_v57 = vsel %vm1591_vm5, %v4223_v48, 0.0 }
 0x26a   : > { %v1451_v8 = vpop.permute.xlu1 %1450 }
 0x26b   : > { %v1818_v30 = vsel %vm1789_vm11, %v1785_v59, %v1451_v8 }
 0x26c   : > { %v1054_v19 = vpop.permute.xlu0 %1053 }
 0x26d   : > { %v1689_v26 = vsel %vm1657_vm6, %v1656_v47, %v1054_v19  ;;  %v2231_v47 = vsel %vm1591_vm5, %v4274_v27, 0.0 }
 0x26e   : > { %v1154_v14 = vpop.permute.xlu1 %1153 }
 0x26f   : > { %v1721_v34 = vsel %vm1690_vm8, %v1688_v40, %v1154_v14 }
 0x270   : > { %v1453_v18 = vpop.permute.xlu0 %1452 }
 0x271   : > { %v1819_v23 = vsel %vm1789_vm11, %v1786_v42, %v1453_v18 }
 0x272   : > { %v1552_v0 = vpop.permute.xlu1 %1551 }
 0x273   : > { %v1851_v37 = vsel %vm1822_vm12, %v1818_v30, %v1552_v0  ;;  %v2218_v0 = vsel %vm1591_vm5, %v4091_v29, 0.0 }
 0x274   : > { %v1156_v3 = vpop.permute.xlu0 %1155  ;;  %2664 = vmatprep.mubr.msk.f32.mxu1 %vm1860_vm13, %v1851_v37  ;;  %v2221_v37 = vsel %vm1591_vm5, %v4159_v10, 0.0  ;;  %v2220_v49 = vadd.f32 %v2219_v45, %v2218_v0 }
 0x275   : > { %v1722_v17 = vsel %vm1690_vm8, %v1689_v26, %v1156_v3 }
 0x276   : > { %v4402_v12 = vpop.f32.mrf.mxu0  ;;  %v1255_v43 = vpop.permute.xlu1 %1254  ;;  %v2222_v3 = vadd.f32 %v2221_v37, %v2220_v49 }
 0x277   : > { %2201 = vst.msk [vmem:[%s4073_s7 + $0x78] sm:$0xff] %vm1591_vm5, %v4402_v12  ;;  %v1754_v25 = vsel %vm1723_vm9, %v1721_v34, %v1255_v43 }
 0x278   : > { %v4409_v39 = vpop.f32.mrf.mxu0  ;;  %v1554_v54 = vpop.permute.xlu0 %1553  ;;  %v2224_v43 = vadd.f32 %v2223_v1, %v2222_v3 }
 0x279   : > { %2200 = vst.msk [vmem:[%s4073_s7 + $0x70] sm:$0xff] %vm1591_vm5, %v4409_v39  ;;  %v1852_v53 = vsel %vm1822_vm12, %v1819_v23, %v1554_v54  ;;  %v2227_v23 = vsel %vm1591_vm5, %v4217_v52, 0.0  ;;  %v2229_v54 = vsel %vm1591_vm5, %v4279_v36, 0.0 }
 0x27a   : > { %2665 = vmatmul.mubr.msk.f32.gmra.mxu1 %vm1860_vm13, %v1852_v53  ;;  %v1257_v56 = vpop.permute.xlu1 %1256  ;;  %v2226_v42 = vadd.f32 %v2225_v57, %v2224_v43 }
 0x27b   : > { %v1755_v55 = vsel %vm1723_vm9, %v1722_v17, %v1257_v56  ;;  %v2233_v56 = vsel %vm1591_vm5, %v4315_v20, 0.0  ;;  %v2237_v17 = vsel %vm1591_vm5, %v4347_v60, 0.0 }
 0x27c   : > { %v2710_v50 = vpop.permute.xlu0 %2709  ;;  %v2228_v62 = vadd.f32 %v2227_v23, %v2226_v42 }
 0x27d   : > { %v2712_v44 = vunpack.i.h.bf16 %v2710_v50  ;;  %v2711_v63 = vunpack.i.l.bf16 %v2710_v50 }
 0x27e   : > { %v2715_v31 = vpop.permute.xlu1 %2714  ;;  %v2230_v61 = vadd.f32 %v2229_v54, %v2228_v62 }
 0x27f   : > { %v2717_v51 = vunpack.i.h.bf16 %v2715_v31  ;;  %v2716_v28 = vunpack.i.l.bf16 %v2715_v31  ;;  %v1788_v13 = vsel %vm1756_vm10, %v1755_v55, %v2712_v44  ;;  %v1787_v4 = vsel %vm1756_vm10, %v1754_v25, %v2711_v63 }
 0x280   : > { %v2720_v8 = vpop.permute.xlu0 %2719  ;;  %v2232_v11 = vadd.f32 %v2231_v47, %v2230_v61  ;;  %v2239_v55 = vsel %vm1591_vm5, %v4340_v33, 0.0  ;;  %v2241_v44 = vsel %vm1591_vm5, %v4377_v22, 0.0  ;;  %v2243_v31 = vsel %vm1591_vm5, %v4370_v35, 0.0 }
 0x281   : > { %v1820_v15 = vsel %vm1789_vm11, %v1787_v4, %v2716_v28  ;;  %v1821_v41 = vsel %vm1789_vm11, %v1788_v13, %v2717_v51  ;;  %v2722_v2 = vunpack.i.h.bf16 %v2720_v8  ;;  %v2721_v19 = vunpack.i.l.bf16 %v2720_v8 }
 0x282   : > { %v2234_v26 = vadd.f32 %v2233_v56, %v2232_v11  ;;  %v2245_v25 = vsel %vm1591_vm5, %v4409_v39, 0.0  ;;  %v2247_v13 = vsel %vm1591_vm5, %v4402_v12, 0.0 }
 0x283   : > { %v1853_v46 = vsel %vm1822_vm12, %v1820_v15, %v2721_v19  ;;  %v1854_v6 = vsel %vm1822_vm12, %v1821_v41, %v2722_v2 }
 0x284   : > { %2667 = vmatprep.mubr.msk.f32.mxu1 %vm1860_vm13, %v1853_v46  ;;  %v2236_v50 = vadd.f32 %v2235_v16, %v2234_v26 }
 0x285   : > { %2668 = vmatmul.mubr.msk.f32.gmra.mxu1 %vm1860_vm13, %v1854_v6 }
 0x286   : > { %v2238_v40 = vadd.f32 %v2237_v17, %v2236_v50 }
 0x288   : > { %v2240_v63 = vadd.f32 %v2239_v55, %v2238_v40 }
 0x28a   : > { %v2242_v34 = vadd.f32 %v2241_v44, %v2240_v63 }
 0x28c   : > { %v2244_v51 = vadd.f32 %v2243_v31, %v2242_v34 }
 0x28e   : > { %v2246_v28 = vadd.f32 %v2245_v25, %v2244_v51 }
 0x290   : > { %v2248_v8 = vadd.f32 %v2247_v13, %v2246_v28 }
 0x292   : > { %v4438_v14 = vpop.f32.mrf.mxu1 }
 0x293   : > { %2203 = vst.msk [vmem:[%s4073_s7 + $0x88] sm:$0xff] %vm1591_vm5, %v4438_v14  ;;  %v2251_v19 = vsel %vm1591_vm5, %v4438_v14, 0.0 }
 0x294   : > { %v4443_v24 = vpop.f32.mrf.mxu1 }
 0x295   : > { %2202 = vst.msk [vmem:[%s4073_s7 + $0x80] sm:$0xff] %vm1591_vm5, %v4443_v24  ;;  %v2249_v4 = vsel %vm1591_vm5, %v4443_v24, 0.0 }
 0x296   : > { %v2250_v41 = vadd.f32 %v2249_v4, %v2248_v8 }
 0x298   : > { %v2252_v6 = vadd.f32 %v2251_v19, %v2250_v41 }
 0x2ae   : > { %v4448_v58 = vpop.f32.mrf.mxu1 }
 0x2af   : > { %2205 = vst.msk [vmem:[%s4073_s7 + $0x98] sm:$0xff] %vm1591_vm5, %v4448_v58  ;;  %v2255_v45 = vsel %vm1591_vm5, %v4448_v58, 0.0 }
 0x2b0   : > { %v4453_v18 = vpop.f32.mrf.mxu1 }
 0x2b1   : > { %2204 = vst.msk [vmem:[%s4073_s7 + $0x90] sm:$0xff] %vm1591_vm5, %v4453_v18  ;;  %v2253_v46 = vsel %vm1591_vm5, %v4453_v18, 0.0 }
 0x2b2   : > { %v2254_v0 = vadd.f32 %v2253_v46, %v2252_v6 }
 0x2b4   : > { %v2256_v49 = vadd.f32 %v2255_v45, %v2254_v0 }
 0x2ca   : > { %v4458_v59 = vpop.f32.mrf.mxu1 }
 0x2cb   : > { %2207 = vst.msk [vmem:[%s4073_s7 + $0xa8] sm:$0xff] %vm1591_vm5, %v4458_v59  ;;  %v2259_v1 = vsel %vm1591_vm5, %v4458_v59, 0.0 }
 0x2cc   : > { %v4463_v38 = vpop.f32.mrf.mxu1 }
 0x2cd   : > { %2206 = vst.msk [vmem:[%s4073_s7 + $0xa0] sm:$0xff] %vm1591_vm5, %v4463_v38  ;;  %v2257_v37 = vsel %vm1591_vm5, %v4463_v38, 0.0 }
 0x2ce   : > { %v2258_v3 = vadd.f32 %v2257_v37, %v2256_v49 }
 0x2d0   : > { %v2260_v43 = vadd.f32 %v2259_v1, %v2258_v3 }
 0x2e6   : > { %v4468_v7 = vpop.f32.mrf.mxu1 }
 0x2e7   : > { %2209 = vst.msk [vmem:[%s4073_s7 + $0xb8] sm:$0xff] %vm1591_vm5, %v4468_v7  ;;  %v2263_v23 = vsel %vm1591_vm5, %v4468_v7, 0.0 }
 0x2e8   : > { %v4473_v30 = vpop.f32.mrf.mxu1 }
 0x2e9   : > { %2208 = vst.msk [vmem:[%s4073_s7 + $0xb0] sm:$0xff] %vm1591_vm5, %v4473_v30  ;;  %v2261_v57 = vsel %vm1591_vm5, %v4473_v30, 0.0 }
 0x2ea   : > { %v2262_v42 = vadd.f32 %v2261_v57, %v2260_v43 }
 0x2ec   : > { %v2264_v62 = vadd.f32 %v2263_v23, %v2262_v42 }
 0x302   : > { %v4492_v53 = vpop.f32.mrf.mxu1 }
 0x303   : > { %2211 = vst.msk [vmem:[%s4073_s7 + $0xc8] sm:$0xff] %vm1591_vm5, %v4492_v53  ;;  %v2267_v47 = vsel %vm1591_vm5, %v4492_v53, 0.0 }
 0x304   : > { %v4501_v5 = vpop.f32.mrf.mxu1 }
 0x305   : > { %2210 = vst.msk [vmem:[%s4073_s7 + $0xc0] sm:$0xff] %vm1591_vm5, %v4501_v5  ;;  %v2265_v54 = vsel %vm1591_vm5, %v4501_v5, 0.0 }
 0x306   : > { %v2266_v61 = vadd.f32 %v2265_v54, %v2264_v62 }
 0x308   : > { %v2268_v26 = vadd.f32 %v2267_v47, %v2266_v61 }
 0x31e   : > { %v4522_v15 = vpop.f32.mrf.mxu1 }
 0x31f   : > { %2213 = vst.msk [vmem:[%s4073_s7 + $0xd8] sm:$0xff] %vm1591_vm5, %v4522_v15  ;;  %v2271_v50 = vsel %vm1591_vm5, %v4522_v15, 0.0 }
 0x320   : > { %v4527_v2 = vpop.f32.mrf.mxu1 }
 0x321   : > { %2212 = vst.msk [vmem:[%s4073_s7 + $0xd0] sm:$0xff] %vm1591_vm5, %v4527_v2  ;;  %v2269_v56 = vsel %vm1591_vm5, %v4527_v2, 0.0 }
 0x322   : > { %v2270_v17 = vadd.f32 %v2269_v56, %v2268_v26 }
 0x324   : > { %v2272_v55 = vadd.f32 %v2271_v50, %v2270_v17 }
 0x33a   : > { %v4552_v11 = vpop.f32.mrf.mxu1 }
 0x33b   : > { %2215 = vst.msk [vmem:[%s4073_s7 + $0xe8] sm:$0xff] %vm1591_vm5, %v4552_v11  ;;  %v2275_v34 = vsel %vm1591_vm5, %v4552_v11, 0.0 }
 0x33c   : > { %v4557_v16 = vpop.f32.mrf.mxu1 }
 0x33d   : > { %2214 = vst.msk [vmem:[%s4073_s7 + $0xe0] sm:$0xff] %vm1591_vm5, %v4557_v16  ;;  %v2273_v40 = vsel %vm1591_vm5, %v4557_v16, 0.0 }
 0x33e   : > { %v2274_v44 = vadd.f32 %v2273_v40, %v2272_v55 }
 0x340   : > { %v2276_v25 = vadd.f32 %v2275_v34, %v2274_v44 }
 0x345   : > { %v4566_v63 = vpop.f32.mrf.mxu1 }
 0x346   : > { %2217 = vst.msk [vmem:[%s4073_s7 + $0xf8] sm:$0xff] %vm1591_vm5, %v4566_v63  ;;  %v2279_v13 = vsel %vm1591_vm5, %v4566_v63, 0.0 }
 0x347   : > { %v4573_v31 = vpop.f32.mrf.mxu1 }
 0x348   : > { %2216 = vst.msk [vmem:[%s4073_s7 + $0xf0] sm:$0xff] %vm1591_vm5, %v4573_v31  ;;  %v2277_v51 = vsel %vm1591_vm5, %v4573_v31, 0.0 }
 0x349   : > { %v2278_v28 = vadd.f32 %v2277_v51, %v2276_v25 }
 0x34b   : > { %v2280_v4 = vadd.f32 %v2279_v13, %v2278_v28 }
 0x34d   : > { %v2281_v8 = vrot.slane %v2280_v4, 4 }
 0x34f   : > { %v2282_v41 = vadd.f32 %v2281_v8, %v2280_v4 }
 0x351   : > { %v2283_v19 = vrot.slane %v2282_v41, 2 }
 0x353   : > { %v2284_v46 = vadd.f32 %v2283_v19, %v2282_v41 }
 0x355   : > { %v2285_v6 = vrot.slane %v2284_v46, 1 }
 0x357   : > { %v2286_v0 = vadd.f32 %v2285_v6, %v2284_v46 }
 0x359   : > { %2422 = vst.msk [vmem:[%s265_s9] sm:$0x1] %vm2421_vm14, %v2286_v0  ;;  %v4587_v45 = vmul.f32 0.00390625, %v2286_v0 }
 0x35b   : > { %v2288_v37 = vsub.f32 %v4091_v29, %v4587_v45  ;;  %v2289_v49 = vsub.f32 %v4079_v32, %v4587_v45  ;;  %v2290_v3 = vsub.f32 %v4159_v10, %v4587_v45  ;;  %v2291_v1 = vsub.f32 %v4142_v9, %v4587_v45 }
 0x35c   : > { %v2292_v42 = vsub.f32 %v4223_v48, %v4587_v45  ;;  %v2293_v54 = vsub.f32 %v4217_v52, %v4587_v45  ;;  %v2294_v10 = vsub.f32 %v4279_v36, %v4587_v45  ;;  %v2295_v48 = vsub.f32 %v4274_v27, %v4587_v45 }
 0x35d   : > { %v2320_v57 = vmul.f32 %v2288_v37, %v2288_v37  ;;  %v2321_v43 = vmul.f32 %v2289_v49, %v2289_v49  ;;  %v2322_v23 = vmul.f32 %v2290_v3, %v2290_v3  ;;  %v2323_v62 = vmul.f32 %v2291_v1, %v2291_v1 }
 0x35e   : > { %v2324_v47 = vmul.f32 %v2292_v42, %v2292_v42  ;;  %v2325_v26 = vmul.f32 %v2293_v54, %v2293_v54  ;;  %v2296_v50 = vsub.f32 %v4315_v20, %v4587_v45  ;;  %v2326_v40 = vmul.f32 %v2294_v10, %v2294_v10 }
 0x35f   : > { %v2352_v29 = vsel %vm1591_vm5, %v2320_v57, 0.0  ;;  %v2353_v32 = vsel %vm1591_vm5, %v2321_v43, 0.0  ;;  %v2355_v9 = vsel %vm1591_vm5, %v2322_v23, 0.0  ;;  %v2357_v17 = vsel %vm1591_vm5, %v2323_v62, 0.0 }
 0x360   : > { %v2354_v61 = vadd.f32 %v2353_v32, %v2352_v29  ;;  %v2359_v55 = vsel %vm1591_vm5, %v2324_v47, 0.0  ;;  %v2297_v36 = vsub.f32 %v4310_v21, %v4587_v45  ;;  %v2327_v34 = vmul.f32 %v2295_v48, %v2295_v48 }
 0x361   : > { %v2361_v25 = vsel %vm1591_vm5, %v2325_v26, 0.0  ;;  %v2298_v27 = vsub.f32 %v4347_v60, %v4587_v45  ;;  %v2328_v28 = vmul.f32 %v2296_v50, %v2296_v50  ;;  %v2363_v13 = vsel %vm1591_vm5, %v2326_v40, 0.0 }
 0x362   : > { %v2356_v56 = vadd.f32 %v2355_v9, %v2354_v61  ;;  %v2299_v20 = vsub.f32 %v4340_v33, %v4587_v45  ;;  %v2329_v8 = vmul.f32 %v2297_v36, %v2297_v36  ;;  %v2365_v41 = vsel %vm1591_vm5, %v2327_v34, 0.0 }
 0x363   : > { %v2300_v21 = vsub.f32 %v4377_v22, %v4587_v45  ;;  %v2330_v46 = vmul.f32 %v2298_v27, %v2298_v27  ;;  %v2367_v6 = vsel %vm1591_vm5, %v2328_v28, 0.0  ;;  %v2301_v60 = vsub.f32 %v4370_v35, %v4587_v45 }
 0x364   : > { %v2358_v52 = vadd.f32 %v2357_v17, %v2356_v56  ;;  %v2331_v37 = vmul.f32 %v2299_v20, %v2299_v20  ;;  %v2369_v49 = vsel %vm1591_vm5, %v2329_v8, 0.0  ;;  %v2302_v33 = vsub.f32 %v4409_v39, %v4587_v45 }
 0x365   : > { %v2332_v1 = vmul.f32 %v2300_v21, %v2300_v21  ;;  %v2371_v57 = vsel %vm1591_vm5, %v2330_v46, 0.0  ;;  %v2303_v22 = vsub.f32 %v4402_v12, %v4587_v45  ;;  %v2333_v42 = vmul.f32 %v2301_v60, %v2301_v60 }
 0x366   : > { %v2360_v44 = vadd.f32 %v2359_v55, %v2358_v52  ;;  %v2373_v23 = vsel %vm1591_vm5, %v2331_v37, 0.0  ;;  %v2304_v35 = vsub.f32 %v4443_v24, %v4587_v45  ;;  %v2334_v62 = vmul.f32 %v2302_v33, %v2302_v33 }
 0x367   : > { %v2375_v29 = vsel %vm1591_vm5, %v2332_v1, 0.0  ;;  %v2305_v39 = vsub.f32 %v4438_v14, %v4587_v45  ;;  %v2335_v61 = vmul.f32 %v2303_v22, %v2303_v22  ;;  %v2377_v10 = vsel %vm1591_vm5, %v2333_v42, 0.0 }
 0x368   : > { %v2362_v51 = vadd.f32 %v2361_v25, %v2360_v44  ;;  %v2306_v12 = vsub.f32 %v4453_v18, %v4587_v45  ;;  %v2336_v9 = vmul.f32 %v2304_v35, %v2304_v35  ;;  %v2379_v56 = vsel %vm1591_vm5, %v2334_v62, 0.0 }
 0x369   : > { %v2307_v24 = vsub.f32 %v4448_v58, %v4587_v45  ;;  %v2337_v26 = vmul.f32 %v2305_v39, %v2305_v39  ;;  %v2381_v17 = vsel %vm1591_vm5, %v2335_v61, 0.0  ;;  %v2308_v14 = vsub.f32 %v4463_v38, %v4587_v45 }
 0x36a   : > { %v2364_v4 = vadd.f32 %v2363_v13, %v2362_v51  ;;  %v2338_v50 = vmul.f32 %v2306_v12, %v2306_v12  ;;  %v2383_v40 = vsel %vm1591_vm5, %v2336_v9, 0.0  ;;  %v2309_v18 = vsub.f32 %v4458_v59, %v4587_v45 }
 0x36b   : > { %v2339_v44 = vmul.f32 %v2307_v24, %v2307_v24  ;;  %v2385_v36 = vsel %vm1591_vm5, %v2337_v26, 0.0  ;;  %v2310_v58 = vsub.f32 %v4473_v30, %v4587_v45  ;;  %v2340_v25 = vmul.f32 %v2308_v14, %v2308_v14 }
 0x36c   : > { %v2366_v19 = vadd.f32 %v2365_v41, %v2364_v4  ;;  %v2387_v51 = vsel %vm1591_vm5, %v2338_v50, 0.0  ;;  %v2311_v38 = vsub.f32 %v4468_v7, %v4587_v45  ;;  %v2341_v28 = vmul.f32 %v2309_v18, %v2309_v18 }
 0x36d   : > { %v2389_v13 = vsel %vm1591_vm5, %v2339_v44, 0.0  ;;  %v2312_v59 = vsub.f32 %v4501_v5, %v4587_v45  ;;  %v2342_v20 = vmul.f32 %v2310_v58, %v2310_v58  ;;  %v2391_v8 = vsel %vm1591_vm5, %v2340_v25, 0.0 }
 0x36e   : > { %v2368_v0 = vadd.f32 %v2367_v6, %v2366_v19  ;;  %v2313_v30 = vsub.f32 %v4492_v53, %v4587_v45  ;;  %v2343_v19 = vmul.f32 %v2311_v38, %v2311_v38  ;;  %v2393_v21 = vsel %vm1591_vm5, %v2341_v28, 0.0 }
 0x36f   : > { %v2314_v7 = vsub.f32 %v4527_v2, %v4587_v45  ;;  %v2344_v6 = vmul.f32 %v2312_v59, %v2312_v59  ;;  %v2315_v5 = vsub.f32 %v4522_v15, %v4587_v45  ;;  %v2316_v53 = vsub.f32 %v4557_v16, %v4587_v45 }
 0x370   : > { %v2370_v3 = vadd.f32 %v2369_v49, %v2368_v0  ;;  %v2395_v0 = vsel %vm1591_vm5, %v2342_v20, 0.0  ;;  %v2345_v37 = vmul.f32 %v2313_v30, %v2313_v30  ;;  %v2397_v49 = vsel %vm1591_vm5, %v2343_v19, 0.0 }
 0x371   : > { %v2346_v33 = vmul.f32 %v2314_v7, %v2314_v7  ;;  %v2399_v1 = vsel %vm1591_vm5, %v2344_v6, 0.0  ;;  %v2317_v2 = vsub.f32 %v4552_v11, %v4587_v45  ;;  %v2318_v15 = vsub.f32 %v4573_v31, %v4587_v45 }
 0x372   : > { %v2372_v43 = vadd.f32 %v2371_v57, %v2370_v3  ;;  %v2401_v22 = vsel %vm1591_vm5, %v2345_v37, 0.0  ;;  %v2319_v16 = vsub.f32 %v4566_v63, %v4587_v45 }
 0x373   : > { %v2349_v62 = vmul.f32 %v2317_v2, %v2317_v2  ;;  %v2350_v11 = vmul.f32 %v2318_v15, %v2318_v15 }
 0x374   : > { %v2374_v54 = vadd.f32 %v2373_v23, %v2372_v43  ;;  %v2347_v43 = vmul.f32 %v2315_v5, %v2315_v5  ;;  %v2348_v23 = vmul.f32 %v2316_v53, %v2316_v53 }
 0x375   : > { %v2411_v12 = vsel %vm1591_vm5, %v2350_v11, 0.0 }
 0x376   : > { %v2376_v32 = vadd.f32 %v2375_v29, %v2374_v54  ;;  %v2403_v54 = vsel %vm1591_vm5, %v2346_v33, 0.0  ;;  %v2405_v29 = vsel %vm1591_vm5, %v2347_v43, 0.0  ;;  %v2407_v39 = vsel %vm1591_vm5, %v2348_v23, 0.0 }
 0x378   : > { %v2378_v47 = vadd.f32 %v2377_v10, %v2376_v32  ;;  %v2351_v10 = vmul.f32 %v2319_v16, %v2319_v16 }
 0x37a   : > { %v2380_v48 = vadd.f32 %v2379_v56, %v2378_v47  ;;  %v2409_v47 = vsel %vm1591_vm5, %v2349_v62, 0.0  ;;  %v2413_v56 = vsel %vm1591_vm5, %v2351_v10, 0.0 }
 0x37c   : > { %v2382_v52 = vadd.f32 %v2381_v17, %v2380_v48 }
 0x37e   : > { %v2384_v55 = vadd.f32 %v2383_v40, %v2382_v52 }
 0x380   : > { %v2386_v34 = vadd.f32 %v2385_v36, %v2384_v55 }
 0x382   : > { %v2388_v27 = vadd.f32 %v2387_v51, %v2386_v34 }
 0x384   : > { %v2390_v4 = vadd.f32 %v2389_v13, %v2388_v27 }
 0x386   : > { %v2392_v41 = vadd.f32 %v2391_v8, %v2390_v4 }
 0x388   : > { %v2394_v46 = vadd.f32 %v2393_v21, %v2392_v41 }
 0x38a   : > { %v2396_v60 = vadd.f32 %v2395_v0, %v2394_v46 }
 0x38c   : > { %v2398_v3 = vadd.f32 %v2397_v49, %v2396_v60 }
 0x38e   : > { %v2400_v57 = vadd.f32 %v2399_v1, %v2398_v3 }
 0x390   : > { %v2402_v42 = vadd.f32 %v2401_v22, %v2400_v57 }
 0x392   : > { %v2404_v35 = vadd.f32 %v2403_v54, %v2402_v42 }
 0x394   : > { %v2406_v32 = vadd.f32 %v2405_v29, %v2404_v35 }
 0x396   : > { %v2408_v61 = vadd.f32 %v2407_v39, %v2406_v32 }
 0x398   : > { %v2410_v31 = vadd.f32 %v2409_v47, %v2408_v61 }
 0x39a   : > { %v2412_v9 = vadd.f32 %v2411_v12, %v2410_v31 }
 0x39c   : > { %v2414_v48 = vadd.f32 %v2413_v56, %v2412_v9 }
 0x39e   : > { %v2415_v63 = vrot.slane %v2414_v48, 4 }
 0x3a0   : > { %v2416_v45 = vadd.f32 %v2415_v63, %v2414_v48 }
 0x3a2   : > { %v2417_v24 = vrot.slane %v2416_v45, 2 }
 0x3a4   : > { %v2418_v26 = vadd.f32 %v2417_v24, %v2416_v45 }
 0x3a6   : > { %v2419_v17 = vrot.slane %v2418_v26, 1 }
 0x3a8   : > { %v2420_v52 = vadd.f32 %v2419_v17, %v2418_v26 }
 0x3aa   : > { %2423 = vst.msk [vmem:[%s268_s14] sm:$0x1] %vm2421_vm14, %v2420_v52 }
 0x3ab PF: > { %s17_s21 = sadd.s32 1, %s2731_s21  }
 0x3ac   : > { %p14_p4 = scmp.ge.s32.totalorder %s17_s21, 4  }
 0x3ae   :  { %16 = sbr.rel (!%p14_p4) target bundleno = 1 (0x1), region = 90 }

</bundles_post_ra>
